<compile_context>
chip_gen: v7x
topology: tpu7x:2x2x1
jax: 0.10.0
libtpu: 0.0.40
codegen_flags: <defaults>
</compile_context>

<pallas_src>
import jax
import jax.numpy as jnp
from jax.experimental import pallas as pl
from jax.experimental.pallas import tpu as pltpu

EPS = 1e-5
LANES = 128


def _round_up(x, m):
    return ((x + m - 1) // m) * m


def _vmem_limit_bytes():
    """~3/4 of per-core VMEM (v5e/v6e: 128 MiB, v7x: 64 MiB), capped at 100 MiB."""
    try:
        cap = int(pltpu.get_tpu_info().vmem_capacity_bytes)
    except Exception:  # pragma: no cover - conservative fallback
        cap = 64 * 1024 * 1024
    return max(32 * 1024 * 1024, min(cap * 3 // 4, 100 * 1024 * 1024))


# ---------------------------------------------------------------------------
# Pallas kernels
# ---------------------------------------------------------------------------
def _pool_conv_stats_kernel(x_ref, w_ref, y_ref, s_ref, q_ref, pad_ref, col_ref):
    # x_ref  : (Hp, 2, Wp, 2, Cin)  bf16  -- one image's pre-pool activation (view)
    # w_ref  : (9*Cin, Cm)          bf16  -- conv1 weights, tap-major (kh*3+kw, cin)
    # y_ref  : (1, Hp*Wp, Cm)       bf16  -- pre-BN conv1 output
    # s_ref  : (1, 1, Cm)           f32   -- per-image channel sum (BN partial)
    # q_ref  : (1, 1, Cm)           f32   -- per-image channel sum-of-squares
    # pad_ref: (Hp+2, Wp+2, Cin)    bf16  VMEM scratch (spatially zero-padded input)
    # col_ref: (Hp*Wp, 9*Cin)       bf16  VMEM scratch (im2col tile)
    hp, _, wp, _, cin = x_ref.shape

    # Fused 2x2 max-pool (f32 math on the bf16 load; max commutes with the cast).
    v = x_ref[...].astype(jnp.float32)             # (Hp, 2, Wp, 2, Cin)
    m = jnp.maximum(v[:, 0], v[:, 1])              # (Hp, Wp, 2, Cin)
    pooled = jnp.maximum(m[:, :, 0], m[:, :, 1])   # (Hp, Wp, Cin)

    # Spatial padding=1 done in VMEM (no HBM-materialized padded tensor).
    pad_ref[...] = jnp.zeros_like(pad_ref)
    pad_ref[1:hp + 1, 1:wp + 1, :] = pooled.astype(jnp.bfloat16)

    # im2col tile in VMEM, then a single MXU matmul with K = 9*Cin.
    for kh in range(3):
        for kw in range(3):
            t = kh * 3 + kw
            col_ref[:, t * cin:(t + 1) * cin] = (
                pad_ref[kh:kh + hp, kw:kw + wp, :].reshape(hp * wp, cin))

    acc = jnp.dot(col_ref[...], w_ref[...],
                  preferred_element_type=jnp.float32)          # (Hp*Wp, Cm) f32

    y_ref[0] = acc.astype(y_ref.dtype)                         # bf16 to HBM
    s_ref[0] = jnp.sum(acc, axis=0, keepdims=True)             # f32 stats
    q_ref[0] = jnp.sum(acc * acc, axis=0, keepdims=True)


def _bn_relu_conv_stats_kernel(y_ref, scale_ref, shift_ref, w_ref,
                               o_ref, s_ref, q_ref, pad_ref, col_ref):
    # y_ref    : (1, Hp*Wp, Cm)  bf16  -- pre-BN conv1 output
    # scale_ref: (1, Cm) f32, shift_ref: (1, Cm) f32 (BN folded in the wrapper)
    # w_ref    : (9*Cm, Co)      bf16  -- conv2 weights
    # o_ref    : (1, Hp*Wp, Co)  bf16  -- pre-BN conv2 output
    # s_ref/q_ref: (1, 1, Co)    f32   -- BN2 partials
    # pad_ref  : (Hp+2, Wp+2, Cm) bf16 scratch; col_ref: (Hp*Wp, 9*Cm) bf16 scratch
    hp = pad_ref.shape[0] - 2
    wp = pad_ref.shape[1] - 2
    cm = pad_ref.shape[2]

    # BN1 apply + ReLU fused into conv2's input path (f32 math, one bf16 cast).
    a = jnp.maximum(y_ref[0].astype(jnp.float32) * scale_ref[...] + shift_ref[...],
                    0.0)
    a = a.astype(jnp.bfloat16).reshape(hp, wp, cm)

    pad_ref[...] = jnp.zeros_like(pad_ref)
    pad_ref[1:hp + 1, 1:wp + 1, :] = a

    for kh in range(3):
        for kw in range(3):
            t = kh * 3 + kw
            col_ref[:, t * cm:(t + 1) * cm] = (
                pad_ref[kh:kh + hp, kw:kw + wp, :].reshape(hp * wp, cm))

    acc = jnp.dot(col_ref[...], w_ref[...],
                  preferred_element_type=jnp.float32)          # (Hp*Wp, Co) f32

    o_ref[0] = acc.astype(o_ref.dtype)
    s_ref[0] = jnp.sum(acc, axis=0, keepdims=True)
    q_ref[0] = jnp.sum(acc * acc, axis=0, keepdims=True)


def _bn_relu_kernel(y_ref, scale_ref, shift_ref, o_ref):
    # y_ref: (1, Hp*Wp, Co) bf16; scale/shift: (1, Co) f32; o_ref: (1, Hp*Wp, Co) f32
    o_ref[0] = jnp.maximum(
        y_ref[0].astype(jnp.float32) * scale_ref[...] + shift_ref[...],
        0.0).astype(o_ref.dtype)


# ---------------------------------------------------------------------------
# Wrappers
# ---------------------------------------------------------------------------
def _pack_weight(w_hwio, cp_in, cp_out):
    """HWIO (3,3,ci,co) -> zero channel-pad -> (9*cp_in, cp_out) bf16, tap-major."""
    kh, kw, ci, co = w_hwio.shape
    w = jnp.pad(w_hwio, ((0, 0), (0, 0), (0, cp_in - ci), (0, cp_out - co)))
    return w.reshape(kh * kw * cp_in, cp_out).astype(jnp.bfloat16)


def _bn_fold(psum, psq, gamma, beta, c, cp, count):
    """Combine per-image partials into per-channel scale/shift (train-mode BN)."""
    mean = jnp.sum(psum, axis=(0, 1)) / count                         # (cp,)
    # NOTE: E[y^2]-E[y]^2 is cancellation-prone for huge activations; clamp >= 0.
    var = jnp.maximum(jnp.sum(psq, axis=(0, 1)) / count - mean * mean, 0.0)
    inv = jax.lax.rsqrt(var + EPS)
    g = jnp.pad(gamma.astype(jnp.float32), (0, cp - c))               # padded ch: 0
    b = jnp.pad(beta.astype(jnp.float32), (0, cp - c))
    scale = g * inv
    shift = b - mean * scale
    return scale.reshape(1, cp), shift.reshape(1, cp)


def down_forward(x_nchw, params):
    """Down: MaxPool2d(2) -> Conv3x3 -> BN -> ReLU -> Conv3x3 -> BN -> ReLU."""
    n, cin, h, w = x_nchw.shape
    cout = params["w1"].shape[-1]           # DoubleConv default: mid == out channels
    assert h % 2 == 0 and w % 2 == 0, "MaxPool2d(2) path assumes even H, W"
    hp, wp = h // 2, w // 2

    cp_in = _round_up(cin, LANES)
    cp_mid = _round_up(cout, LANES)
    cp_out = _round_up(cout, LANES)
    vmem = _vmem_limit_bytes()

    # NCHW -> NHWC, channel-pad to lane multiples, cast to bf16 ONCE (halves DMA).
    x = jnp.transpose(x_nchw, (0, 2, 3, 1))
    x = jnp.pad(x, ((0, 0), (0, 0), (0, 0), (0, cp_in - cin))).astype(jnp.bfloat16)
    xr = x.reshape(n * hp, 2, wp, 2, cp_in)   # free contiguous view for 2x2 pooling

    w1 = _pack_weight(params["w1"], cp_in, cp_mid)    # (9*cp_in, cp_mid) bf16
    w2 = _pack_weight(params["w2"], cp_mid, cp_out)   # (9*cp_mid, cp_out) bf16

    # Pass A: fused maxpool + conv1 (single im2col matmul) + BN1 partials.
    y1, s1, q1 = pl.pallas_call(
        _pool_conv_stats_kernel,
        grid=(n,),
        in_specs=[
            pl.BlockSpec((hp, 2, wp, 2, cp_in), lambda i: (i, 0, 0, 0, 0)),
            pl.BlockSpec((9 * cp_in, cp_mid), lambda i: (0, 0)),
        ],
        out_specs=(
            pl.BlockSpec((1, hp * wp, cp_mid), lambda i: (i, 0, 0)),
            pl.BlockSpec((1, 1, cp_mid), lambda i: (i, 0, 0)),
            pl.BlockSpec((1, 1, cp_mid), lambda i: (i, 0, 0)),
        ),
        out_shape=(
            jax.ShapeDtypeStruct((n, hp * wp, cp_mid), jnp.bfloat16),
            jax.ShapeDtypeStruct((n, 1, cp_mid), jnp.float32),
            jax.ShapeDtypeStruct((n, 1, cp_mid), jnp.float32),
        ),
        scratch_shapes=[
            pltpu.VMEM((hp + 2, wp + 2, cp_in), jnp.bfloat16),
            pltpu.VMEM((hp * wp, 9 * cp_in), jnp.bfloat16),
        ],
        compiler_params=pltpu.CompilerParams(
            dimension_semantics=("parallel",), vmem_limit_bytes=vmem),
    )(xr, w1)

    scale1, shift1 = _bn_fold(s1, q1, params["g1"], params["b1"],
                              cout, cp_mid, float(n * hp * wp))

    # Pass B: fused BN1-apply + ReLU + conv2 + BN2 partials.
    y2, s2, q2 = pl.pallas_call(
        _bn_relu_conv_stats_kernel,
        grid=(n,),
        in_specs=[
            pl.BlockSpec((1, hp * wp, cp_mid), lambda i: (i, 0, 0)),
            pl.BlockSpec((1, cp_mid), lambda i: (0, 0)),
            pl.BlockSpec((1, cp_mid), lambda i: (0, 0)),
            pl.BlockSpec((9 * cp_mid, cp_out), lambda i: (0, 0)),
        ],
        out_specs=(
            pl.BlockSpec((1, hp * wp, cp_out), lambda i: (i, 0, 0)),
            pl.BlockSpec((1, 1, cp_out), lambda i: (i, 0, 0)),
            pl.BlockSpec((1, 1, cp_out), lambda i: (i, 0, 0)),
        ),
        out_shape=(
            jax.ShapeDtypeStruct((n, hp * wp, cp_out), jnp.bfloat16),
            jax.ShapeDtypeStruct((n, 1, cp_out), jnp.float32),
            jax.ShapeDtypeStruct((n, 1, cp_out), jnp.float32),
        ),
        scratch_shapes=[
            pltpu.VMEM((hp + 2, wp + 2, cp_mid), jnp.bfloat16),
            pltpu.VMEM((hp * wp, 9 * cp_mid), jnp.bfloat16),
        ],
        compiler_params=pltpu.CompilerParams(
            dimension_semantics=("parallel",), vmem_limit_bytes=vmem),
    )(y1, scale1, shift1, w2)

    scale2, shift2 = _bn_fold(s2, q2, params["g2"], params["b2"],
                              cout, cp_out, float(n * hp * wp))

    # Pass C: BN2-apply + ReLU -> final f32 output (lane-dense last dim).
    out = pl.pallas_call(
        _bn_relu_kernel,
        grid=(n,),
        in_specs=[
            pl.BlockSpec((1, hp * wp, cp_out), lambda i: (i, 0, 0)),
            pl.BlockSpec((1, cp_out), lambda i: (0, 0)),
            pl.BlockSpec((1, cp_out), lambda i: (0, 0)),
        ],
        out_specs=pl.BlockSpec((1, hp * wp, cp_out), lambda i: (i, 0, 0)),
        out_shape=jax.ShapeDtypeStruct((n, hp * wp, cp_out), jnp.float32),
        compiler_params=pltpu.CompilerParams(
            dimension_semantics=("parallel",), vmem_limit_bytes=vmem),
    )(y2, scale2, shift2)

    out = out.reshape(n, hp, wp, cp_out)[..., :cout]      # drop padded channels
    return jnp.transpose(out, (0, 3, 1, 2))               # NHWC -> NCHW


# ---------------------------------------------------------------------------
# Pure-JAX reference (for a loose numerical sanity check; conv uses bf16 on MXU)
# ---------------------------------------------------------------------------
def _reference(x_nchw, params):
    x = jax.lax.reduce_window(x_nchw, -jnp.inf, jax.lax.max,
                              (1, 1, 2, 2), (1, 1, 2, 2), "VALID")

    def block(x, w_hwio, g, b):
        y = jax.lax.conv_general_dilated(
            x, jnp.transpose(w_hwio, (3, 2, 0, 1)), (1, 1), ((1, 1), (1, 1)),
            dimension_numbers=("NCHW", "OIHW", "NCHW"))
        m = jnp.mean(y, axis=(0, 2, 3), keepdims=True)
        v = jnp.mean((y - m) ** 2, axis=(0, 2, 3), keepdims=True)
        y = (y - m) * jax.lax.rsqrt(v + EPS) * g.reshape(1, -1, 1, 1) \
            + b.reshape(1, -1, 1, 1)
        return jnp.maximum(y, 0.0)

    x = block(x, params["w1"], params["g1"], params["b1"])
    x = block(x, params["w2"], params["g2"], params["b2"])
    return x


# ---------------------------------------------------------------------------
# Main
# ---------------------------------------------------------------------------
if __name__ == "__main__":
    key = jax.random.PRNGKey(0)
    kx, k1, k2 = jax.random.split(key, 3)

    N, Cin, H, W = 2, 4, 16, 16
    Cout = 8  # mid_channels == out_channels (DoubleConv default)

    x = jax.random.normal(kx, (N, Cin, H, W), dtype=jnp.float32)

    # BN gamma=1, beta=0 matches nn.BatchNorm2d init.
    # TODO(synk): BatchNorm running-stat buffer updates (training side effect) are
    # not modeled; the forward output uses batch statistics as in .train() mode.
    params = {
        "w1": jax.random.normal(k1, (3, 3, Cin, Cout), jnp.float32) * (1.0 / (9 * Cin) ** 0.5),
        "g1": jnp.ones((Cout,), jnp.float32),
        "b1": jnp.zeros((Cout,), jnp.float32),
        "w2": jax.random.normal(k2, (3, 3, Cout, Cout), jnp.float32) * (1.0 / (9 * Cout) ** 0.5),
        "g2": jnp.ones((Cout,), jnp.float32),
        "b2": jnp.zeros((Cout,), jnp.float32),
    }

    y = jax.jit(down_forward)(x, params)
    jax.block_until_ready(y)

    assert y.shape == (N, Cout, H // 2, W // 2), y.shape
    assert bool(jnp.all(y >= 0.0))  # ReLU sanity

    ref = _reference(x, params)
    err = float(jnp.max(jnp.abs(y - ref)))
    assert err < 2e-1, f"max abs err vs reference too large: {err}"  # bf16 MXU tolerance

    print("KERNEL_OK")
</pallas_src>

<mosaic_0001>
module attributes {stable_mosaic.version = 11 : i64} {
  func.func @_bn_relu_conv_stats_kernel(%arg0: i32, %arg1: memref<1x64x128xbf16, #tpu.memory_space<vmem>>, %arg2: memref<1x128xf32, #tpu.memory_space<vmem>>, %arg3: memref<1x128xf32, #tpu.memory_space<vmem>>, %arg4: memref<1152x128xbf16, #tpu.memory_space<vmem>>, %arg5: memref<1x64x128xbf16, #tpu.memory_space<vmem>>, %arg6: memref<1x1x128xf32, #tpu.memory_space<vmem>>, %arg7: memref<1x1x128xf32, #tpu.memory_space<vmem>>, %arg8: memref<10x10x128xbf16, #tpu.memory_space<vmem>>, %arg9: memref<64x1152xbf16, #tpu.memory_space<vmem>>) attributes {dimension_semantics = [#tpu.dimension_semantics<parallel>], iteration_bounds = array<i64: 2>, scalar_prefetch = 0 : i64, scratch_operands = 2 : i64, tpu.core_type = #tpu.core_type<tc>, window_params = [{transform_indices = @transform_0, window_bounds = array<i64: 1, 64, 128>}, {pipeline_mode = #tpu.pipeline_mode<synchronous>, transform_indices = @transform_1, window_bounds = array<i64: 1, 128>}, {pipeline_mode = #tpu.pipeline_mode<synchronous>, transform_indices = @transform_2, window_bounds = array<i64: 1, 128>}, {pipeline_mode = #tpu.pipeline_mode<synchronous>, transform_indices = @transform_3, window_bounds = array<i64: 1152, 128>}, {transform_indices = @transform_4, window_bounds = array<i64: 1, 64, 128>}, {transform_indices = @transform_5, window_bounds = array<i64: 1, 1, 128>}, {transform_indices = @transform_6, window_bounds = array<i64: 1, 1, 128>}]} {
    %c0 = arith.constant 0 : index
    %c0_0 = arith.constant 0 : index
    %c0_1 = arith.constant 0 : index
    %0 = vector.load %arg1[%c0, %c0_0, %c0_1] : memref<1x64x128xbf16, #tpu.memory_space<vmem>>, vector<1x64x128xbf16>
    %1 = vector.shape_cast %0 : vector<1x64x128xbf16> to vector<64x128xbf16>
    %2 = arith.extf %1 : vector<64x128xbf16> to vector<64x128xf32>
    %c0_2 = arith.constant 0 : index
    %c0_3 = arith.constant 0 : index
    %3 = vector.load %arg2[%c0_2, %c0_3] : memref<1x128xf32, #tpu.memory_space<vmem>>, vector<1x128xf32>
    %4 = vector.broadcast %3 : vector<1x128xf32> to vector<64x128xf32>
    %5 = arith.mulf %2, %4 : vector<64x128xf32>
    %c0_4 = arith.constant 0 : index
    %c0_5 = arith.constant 0 : index
    %6 = vector.load %arg3[%c0_4, %c0_5] : memref<1x128xf32, #tpu.memory_space<vmem>>, vector<1x128xf32>
    %7 = vector.broadcast %6 : vector<1x128xf32> to vector<64x128xf32>
    %8 = arith.addf %5, %7 : vector<64x128xf32>
    %cst = arith.constant 0.000000e+00 : f32
    %9 = vector.broadcast %cst : f32 to vector<64x128xf32>
    %10 = arith.maximumf %8, %9 : vector<64x128xf32>
    %11 = arith.truncf %10 : vector<64x128xf32> to vector<64x128xbf16>
    %12 = vector.shape_cast %11 : vector<64x128xbf16> to vector<8x8x128xbf16>
    %cst_6 = arith.constant 0.000000e+00 : bf16
    %13 = vector.broadcast %cst_6 : bf16 to vector<10x10x128xbf16>
    %c0_7 = arith.constant 0 : index
    %c0_8 = arith.constant 0 : index
    %c0_9 = arith.constant 0 : index
    %14 = vector.load %arg8[%c0_7, %c0_8, %c0_9] : memref<10x10x128xbf16, #tpu.memory_space<vmem>>, vector<10x10x128xbf16>
    tpu.vector_store %arg8[%c0_7, %c0_8, %c0_9], %13 {strides = array<i32>} : memref<10x10x128xbf16, #tpu.memory_space<vmem>>, vector<10x10x128xbf16>,
    %c1 = arith.constant 1 : index
    %c1_10 = arith.constant 1 : index
    %c0_11 = arith.constant 0 : index
    %15 = vector.load %arg8[%c1, %c1_10, %c0_11] : memref<10x10x128xbf16, #tpu.memory_space<vmem>>, vector<8x8x128xbf16>
    tpu.vector_store %arg8[%c1, %c1_10, %c0_11], %12 {strides = array<i32>} : memref<10x10x128xbf16, #tpu.memory_space<vmem>>, vector<8x8x128xbf16>,
    %c0_12 = arith.constant 0 : index
    %c0_13 = arith.constant 0 : index
    %c0_14 = arith.constant 0 : index
    %16 = vector.load %arg8[%c0_12, %c0_13, %c0_14] : memref<10x10x128xbf16, #tpu.memory_space<vmem>>, vector<8x8x128xbf16>
    %17 = vector.shape_cast %16 : vector<8x8x128xbf16> to vector<64x128xbf16>
    %c0_15 = arith.constant 0 : index
    %c0_16 = arith.constant 0 : index
    %18 = vector.load %arg9[%c0_15, %c0_16] : memref<64x1152xbf16, #tpu.memory_space<vmem>>, vector<64x128xbf16>
    tpu.vector_store %arg9[%c0_15, %c0_16], %17 {strides = array<i32>} : memref<64x1152xbf16, #tpu.memory_space<vmem>>, vector<64x128xbf16>,
    %c0_17 = arith.constant 0 : index
    %c1_18 = arith.constant 1 : index
    %c0_19 = arith.constant 0 : index
    %19 = vector.load %arg8[%c0_17, %c1_18, %c0_19] : memref<10x10x128xbf16, #tpu.memory_space<vmem>>, vector<8x8x128xbf16>
    %20 = vector.shape_cast %19 : vector<8x8x128xbf16> to vector<64x128xbf16>
    %c0_20 = arith.constant 0 : index
    %c128 = arith.constant 128 : index
    %21 = vector.load %arg9[%c0_20, %c128] : memref<64x1152xbf16, #tpu.memory_space<vmem>>, vector<64x128xbf16>
    tpu.vector_store %arg9[%c0_20, %c128], %20 {strides = array<i32>} : memref<64x1152xbf16, #tpu.memory_space<vmem>>, vector<64x128xbf16>,
    %c0_21 = arith.constant 0 : index
    %c2 = arith.constant 2 : index
    %c0_22 = arith.constant 0 : index
    %22 = vector.load %arg8[%c0_21, %c2, %c0_22] : memref<10x10x128xbf16, #tpu.memory_space<vmem>>, vector<8x8x128xbf16>
    %23 = vector.shape_cast %22 : vector<8x8x128xbf16> to vector<64x128xbf16>
    %c0_23 = arith.constant 0 : index
    %c256 = arith.constant 256 : index
    %24 = vector.load %arg9[%c0_23, %c256] : memref<64x1152xbf16, #tpu.memory_space<vmem>>, vector<64x128xbf16>
    tpu.vector_store %arg9[%c0_23, %c256], %23 {strides = array<i32>} : memref<64x1152xbf16, #tpu.memory_space<vmem>>, vector<64x128xbf16>,
    %c1_24 = arith.constant 1 : index
    %c0_25 = arith.constant 0 : index
    %c0_26 = arith.constant 0 : index
    %25 = vector.load %arg8[%c1_24, %c0_25, %c0_26] : memref<10x10x128xbf16, #tpu.memory_space<vmem>>, vector<8x8x128xbf16>
    %26 = vector.shape_cast %25 : vector<8x8x128xbf16> to vector<64x128xbf16>
    %c0_27 = arith.constant 0 : index
    %c384 = arith.constant 384 : index
    %27 = vector.load %arg9[%c0_27, %c384] : memref<64x1152xbf16, #tpu.memory_space<vmem>>, vector<64x128xbf16>
    tpu.vector_store %arg9[%c0_27, %c384], %26 {strides = array<i32>} : memref<64x1152xbf16, #tpu.memory_space<vmem>>, vector<64x128xbf16>,
    %c1_28 = arith.constant 1 : index
    %c1_29 = arith.constant 1 : index
    %c0_30 = arith.constant 0 : index
    %28 = vector.load %arg8[%c1_28, %c1_29, %c0_30] : memref<10x10x128xbf16, #tpu.memory_space<vmem>>, vector<8x8x128xbf16>
    %29 = vector.shape_cast %28 : vector<8x8x128xbf16> to vector<64x128xbf16>
    %c0_31 = arith.constant 0 : index
    %c512 = arith.constant 512 : index
    %30 = vector.load %arg9[%c0_31, %c512] : memref<64x1152xbf16, #tpu.memory_space<vmem>>, vector<64x128xbf16>
    tpu.vector_store %arg9[%c0_31, %c512], %29 {strides = array<i32>} : memref<64x1152xbf16, #tpu.memory_space<vmem>>, vector<64x128xbf16>,
    %c1_32 = arith.constant 1 : index
    %c2_33 = arith.constant 2 : index
    %c0_34 = arith.constant 0 : index
    %31 = vector.load %arg8[%c1_32, %c2_33, %c0_34] : memref<10x10x128xbf16, #tpu.memory_space<vmem>>, vector<8x8x128xbf16>
    %32 = vector.shape_cast %31 : vector<8x8x128xbf16> to vector<64x128xbf16>
    %c0_35 = arith.constant 0 : index
    %c640 = arith.constant 640 : index
    %33 = vector.load %arg9[%c0_35, %c640] : memref<64x1152xbf16, #tpu.memory_space<vmem>>, vector<64x128xbf16>
    tpu.vector_store %arg9[%c0_35, %c640], %32 {strides = array<i32>} : memref<64x1152xbf16, #tpu.memory_space<vmem>>, vector<64x128xbf16>,
    %c2_36 = arith.constant 2 : index
    %c0_37 = arith.constant 0 : index
    %c0_38 = arith.constant 0 : index
    %34 = vector.load %arg8[%c2_36, %c0_37, %c0_38] : memref<10x10x128xbf16, #tpu.memory_space<vmem>>, vector<8x8x128xbf16>
    %35 = vector.shape_cast %34 : vector<8x8x128xbf16> to vector<64x128xbf16>
    %c0_39 = arith.constant 0 : index
    %c768 = arith.constant 768 : index
    %36 = vector.load %arg9[%c0_39, %c768] : memref<64x1152xbf16, #tpu.memory_space<vmem>>, vector<64x128xbf16>
    tpu.vector_store %arg9[%c0_39, %c768], %35 {strides = array<i32>} : memref<64x1152xbf16, #tpu.memory_space<vmem>>, vector<64x128xbf16>,
    %c2_40 = arith.constant 2 : index
    %c1_41 = arith.constant 1 : index
    %c0_42 = arith.constant 0 : index
    %37 = vector.load %arg8[%c2_40, %c1_41, %c0_42] : memref<10x10x128xbf16, #tpu.memory_space<vmem>>, vector<8x8x128xbf16>
    %38 = vector.shape_cast %37 : vector<8x8x128xbf16> to vector<64x128xbf16>
    %c0_43 = arith.constant 0 : index
    %c896 = arith.constant 896 : index
    %39 = vector.load %arg9[%c0_43, %c896] : memref<64x1152xbf16, #tpu.memory_space<vmem>>, vector<64x128xbf16>
    tpu.vector_store %arg9[%c0_43, %c896], %38 {strides = array<i32>} : memref<64x1152xbf16, #tpu.memory_space<vmem>>, vector<64x128xbf16>,
    %c2_44 = arith.constant 2 : index
    %c2_45 = arith.constant 2 : index
    %c0_46 = arith.constant 0 : index
    %40 = vector.load %arg8[%c2_44, %c2_45, %c0_46] : memref<10x10x128xbf16, #tpu.memory_space<vmem>>, vector<8x8x128xbf16>
    %41 = vector.shape_cast %40 : vector<8x8x128xbf16> to vector<64x128xbf16>
    %c0_47 = arith.constant 0 : index
    %c1024 = arith.constant 1024 : index
    %42 = vector.load %arg9[%c0_47, %c1024] : memref<64x1152xbf16, #tpu.memory_space<vmem>>, vector<64x128xbf16>
    tpu.vector_store %arg9[%c0_47, %c1024], %41 {strides = array<i32>} : memref<64x1152xbf16, #tpu.memory_space<vmem>>, vector<64x128xbf16>,
    %c0_48 = arith.constant 0 : index
    %c0_49 = arith.constant 0 : index
    %43 = vector.load %arg9[%c0_48, %c0_49] : memref<64x1152xbf16, #tpu.memory_space<vmem>>, vector<64x1152xbf16>
    %c0_50 = arith.constant 0 : index
    %c0_51 = arith.constant 0 : index
    %44 = vector.load %arg4[%c0_50, %c0_51] : memref<1152x128xbf16, #tpu.memory_space<vmem>>, vector<1152x128xbf16>
    %cst_52 = arith.constant dense<0.000000e+00> : vector<64x128xf32>
    %45 = tpu.matmul %43, %44, %cst_52 {dimension_numbers = #tpu.dot_dimension_numbers<[1], [0], [0], [1], [0, 0, 1, 1], [], []>} : vector<64x1152xbf16>, vector<1152x128xbf16>, vector<64x128xf32> -> vector<64x128xf32>
    %46 = arith.truncf %45 : vector<64x128xf32> to vector<64x128xbf16>
    %c0_53 = arith.constant 0 : index
    %c0_54 = arith.constant 0 : index
    %c0_55 = arith.constant 0 : index
    %47 = vector.load %arg5[%c0_53, %c0_54, %c0_55] : memref<1x64x128xbf16, #tpu.memory_space<vmem>>, vector<1x64x128xbf16>
    %48 = vector.shape_cast %47 : vector<1x64x128xbf16> to vector<64x128xbf16>
    %49 = vector.shape_cast %46 : vector<64x128xbf16> to vector<1x64x128xbf16>
    tpu.vector_store %arg5[%c0_53, %c0_54, %c0_55], %49 {strides = array<i32>} : memref<1x64x128xbf16, #tpu.memory_space<vmem>>, vector<1x64x128xbf16>,
    %cst_56 = arith.constant dense<0.000000e+00> : vector<128xf32>
    %50 = vector.multi_reduction <add>, %45, %cst_56 [0] : vector<64x128xf32> to vector<128xf32>
    %51 = vector.shape_cast %50 : vector<128xf32> to vector<1x128xf32>
    %c0_57 = arith.constant 0 : index
    %c0_58 = arith.constant 0 : index
    %c0_59 = arith.constant 0 : index
    %52 = vector.load %arg6[%c0_57, %c0_58, %c0_59] : memref<1x1x128xf32, #tpu.memory_space<vmem>>, vector<1x1x128xf32>
    %53 = vector.shape_cast %52 : vector<1x1x128xf32> to vector<1x128xf32>
    %54 = vector.shape_cast %51 : vector<1x128xf32> to vector<1x1x128xf32>
    tpu.vector_store %arg6[%c0_57, %c0_58, %c0_59], %54 {strides = array<i32>} : memref<1x1x128xf32, #tpu.memory_space<vmem>>, vector<1x1x128xf32>,
    %55 = arith.mulf %45, %45 : vector<64x128xf32>
    %cst_60 = arith.constant dense<0.000000e+00> : vector<128xf32>
    %56 = vector.multi_reduction <add>, %55, %cst_60 [0] : vector<64x128xf32> to vector<128xf32>
    %57 = vector.shape_cast %56 : vector<128xf32> to vector<1x128xf32>
    %c0_61 = arith.constant 0 : index
    %c0_62 = arith.constant 0 : index
    %c0_63 = arith.constant 0 : index
    %58 = vector.load %arg7[%c0_61, %c0_62, %c0_63] : memref<1x1x128xf32, #tpu.memory_space<vmem>>, vector<1x1x128xf32>
    %59 = vector.shape_cast %58 : vector<1x1x128xf32> to vector<1x128xf32>
    %60 = vector.shape_cast %57 : vector<1x128xf32> to vector<1x1x128xf32>
    tpu.vector_store %arg7[%c0_61, %c0_62, %c0_63], %60 {strides = array<i32>} : memref<1x1x128xf32, #tpu.memory_space<vmem>>, vector<1x1x128xf32>,
    return
  }
  func.func @transform_0(%arg0: i32) -> (i32, i32, i32) {
    %c0_i32 = arith.constant 0 : i32
    %c0_i32_0 = arith.constant 0 : i32
    %c0_i32_1 = arith.constant 0 : i32
    return %arg0, %c0_i32, %c0_i32_0 : i32, i32, i32
  }
  func.func @transform_1(%arg0: i32) -> (i32, i32) {
    %c0_i32 = arith.constant 0 : i32
    %c0_i32_0 = arith.constant 0 : i32
    %c0_i32_1 = arith.constant 0 : i32
    return %c0_i32, %c0_i32_0 : i32, i32
  }
  func.func @transform_2(%arg0: i32) -> (i32, i32) {
    %c0_i32 = arith.constant 0 : i32
    %c0_i32_0 = arith.constant 0 : i32
    %c0_i32_1 = arith.constant 0 : i32
    return %c0_i32, %c0_i32_0 : i32, i32
  }
  func.func @transform_3(%arg0: i32) -> (i32, i32) {
    %c0_i32 = arith.constant 0 : i32
    %c0_i32_0 = arith.constant 0 : i32
    %c0_i32_1 = arith.constant 0 : i32
    return %c0_i32, %c0_i32_0 : i32, i32
  }
  func.func @transform_4(%arg0: i32) -> (i32, i32, i32) {
    %c0_i32 = arith.constant 0 : i32
    %c0_i32_0 = arith.constant 0 : i32
    %c0_i32_1 = arith.constant 0 : i32
    return %arg0, %c0_i32, %c0_i32_0 : i32, i32, i32
  }
  func.func @transform_5(%arg0: i32) -> (i32, i32, i32) {
    %c0_i32 = arith.constant 0 : i32
    %c0_i32_0 = arith.constant 0 : i32
    %c0_i32_1 = arith.constant 0 : i32
    return %arg0, %c0_i32, %c0_i32_0 : i32, i32, i32
  }
  func.func @transform_6(%arg0: i32) -> (i32, i32, i32) {
    %c0_i32 = arith.constant 0 : i32
    %c0_i32_0 = arith.constant 0 : i32
    %c0_i32_1 = arith.constant 0 : i32
    return %arg0, %c0_i32, %c0_i32_0 : i32, i32, i32
  }
}

module attributes {stable_mosaic.version = 11 : i64} {
  func.func @_pool_conv_stats_kernel(%arg0: i32, %arg1: memref<8x2x8x2x128xbf16, #tpu.memory_space<vmem>>, %arg2: memref<1152x128xbf16, #tpu.memory_space<vmem>>, %arg3: memref<1x64x128xbf16, #tpu.memory_space<vmem>>, %arg4: memref<1x1x128xf32, #tpu.memory_space<vmem>>, %arg5: memref<1x1x128xf32, #tpu.memory_space<vmem>>, %arg6: memref<10x10x128xbf16, #tpu.memory_space<vmem>>, %arg7: memref<64x1152xbf16, #tpu.memory_space<vmem>>) attributes {dimension_semantics = [#tpu.dimension_semantics<parallel>], iteration_bounds = array<i64: 2>, scalar_prefetch = 0 : i64, scratch_operands = 2 : i64, tpu.core_type = #tpu.core_type<tc>, window_params = [{transform_indices = @transform_0, window_bounds = array<i64: 8, 2, 8, 2, 128>}, {pipeline_mode = #tpu.pipeline_mode<synchronous>, transform_indices = @transform_1, window_bounds = array<i64: 1152, 128>}, {transform_indices = @transform_2, window_bounds = array<i64: 1, 64, 128>}, {transform_indices = @transform_3, window_bounds = array<i64: 1, 1, 128>}, {transform_indices = @transform_4, window_bounds = array<i64: 1, 1, 128>}]} {
    %c0 = arith.constant 0 : index
    %c0_0 = arith.constant 0 : index
    %c0_1 = arith.constant 0 : index
    %c0_2 = arith.constant 0 : index
    %c0_3 = arith.constant 0 : index
    %0 = vector.load %arg1[%c0, %c0_0, %c0_1, %c0_2, %c0_3] : memref<8x2x8x2x128xbf16, #tpu.memory_space<vmem>>, vector<8x2x8x2x128xbf16>
    %1 = arith.extf %0 : vector<8x2x8x2x128xbf16> to vector<8x2x8x2x128xf32>
    %2 = vector.extract_strided_slice %1 {offsets = [0, 0, 0, 0, 0], sizes = [8, 1, 8, 2, 128], strides = [1, 1, 1, 1, 1]} : vector<8x2x8x2x128xf32> to vector<8x1x8x2x128xf32>
    %3 = vector.shape_cast %2 : vector<8x1x8x2x128xf32> to vector<8x8x2x128xf32>
    %4 = vector.extract_strided_slice %1 {offsets = [0, 1, 0, 0, 0], sizes = [8, 1, 8, 2, 128], strides = [1, 1, 1, 1, 1]} : vector<8x2x8x2x128xf32> to vector<8x1x8x2x128xf32>
    %5 = vector.shape_cast %4 : vector<8x1x8x2x128xf32> to vector<8x8x2x128xf32>
    %6 = arith.maximumf %3, %5 : vector<8x8x2x128xf32>
    %7 = vector.extract_strided_slice %6 {offsets = [0, 0, 0, 0], sizes = [8, 8, 1, 128], strides = [1, 1, 1, 1]} : vector<8x8x2x128xf32> to vector<8x8x1x128xf32>
    %8 = vector.shape_cast %7 : vector<8x8x1x128xf32> to vector<8x8x128xf32>
    %9 = vector.extract_strided_slice %6 {offsets = [0, 0, 1, 0], sizes = [8, 8, 1, 128], strides = [1, 1, 1, 1]} : vector<8x8x2x128xf32> to vector<8x8x1x128xf32>
    %10 = vector.shape_cast %9 : vector<8x8x1x128xf32> to vector<8x8x128xf32>
    %11 = arith.maximumf %8, %10 : vector<8x8x128xf32>
    %cst = arith.constant 0.000000e+00 : bf16
    %12 = vector.broadcast %cst : bf16 to vector<10x10x128xbf16>
    %c0_4 = arith.constant 0 : index
    %c0_5 = arith.constant 0 : index
    %c0_6 = arith.constant 0 : index
    %13 = vector.load %arg6[%c0_4, %c0_5, %c0_6] : memref<10x10x128xbf16, #tpu.memory_space<vmem>>, vector<10x10x128xbf16>
    tpu.vector_store %arg6[%c0_4, %c0_5, %c0_6], %12 {strides = array<i32>} : memref<10x10x128xbf16, #tpu.memory_space<vmem>>, vector<10x10x128xbf16>,
    %14 = arith.truncf %11 : vector<8x8x128xf32> to vector<8x8x128xbf16>
    %c1 = arith.constant 1 : index
    %c1_7 = arith.constant 1 : index
    %c0_8 = arith.constant 0 : index
    %15 = vector.load %arg6[%c1, %c1_7, %c0_8] : memref<10x10x128xbf16, #tpu.memory_space<vmem>>, vector<8x8x128xbf16>
    tpu.vector_store %arg6[%c1, %c1_7, %c0_8], %14 {strides = array<i32>} : memref<10x10x128xbf16, #tpu.memory_space<vmem>>, vector<8x8x128xbf16>,
    %c0_9 = arith.constant 0 : index
    %c0_10 = arith.constant 0 : index
    %c0_11 = arith.constant 0 : index
    %16 = vector.load %arg6[%c0_9, %c0_10, %c0_11] : memref<10x10x128xbf16, #tpu.memory_space<vmem>>, vector<8x8x128xbf16>
    %17 = vector.shape_cast %16 : vector<8x8x128xbf16> to vector<64x128xbf16>
    %c0_12 = arith.constant 0 : index
    %c0_13 = arith.constant 0 : index
    %18 = vector.load %arg7[%c0_12, %c0_13] : memref<64x1152xbf16, #tpu.memory_space<vmem>>, vector<64x128xbf16>
    tpu.vector_store %arg7[%c0_12, %c0_13], %17 {strides = array<i32>} : memref<64x1152xbf16, #tpu.memory_space<vmem>>, vector<64x128xbf16>,
    %c0_14 = arith.constant 0 : index
    %c1_15 = arith.constant 1 : index
    %c0_16 = arith.constant 0 : index
    %19 = vector.load %arg6[%c0_14, %c1_15, %c0_16] : memref<10x10x128xbf16, #tpu.memory_space<vmem>>, vector<8x8x128xbf16>
    %20 = vector.shape_cast %19 : vector<8x8x128xbf16> to vector<64x128xbf16>
    %c0_17 = arith.constant 0 : index
    %c128 = arith.constant 128 : index
    %21 = vector.load %arg7[%c0_17, %c128] : memref<64x1152xbf16, #tpu.memory_space<vmem>>, vector<64x128xbf16>
    tpu.vector_store %arg7[%c0_17, %c128], %20 {strides = array<i32>} : memref<64x1152xbf16, #tpu.memory_space<vmem>>, vector<64x128xbf16>,
    %c0_18 = arith.constant 0 : index
    %c2 = arith.constant 2 : index
    %c0_19 = arith.constant 0 : index
    %22 = vector.load %arg6[%c0_18, %c2, %c0_19] : memref<10x10x128xbf16, #tpu.memory_space<vmem>>, vector<8x8x128xbf16>
    %23 = vector.shape_cast %22 : vector<8x8x128xbf16> to vector<64x128xbf16>
    %c0_20 = arith.constant 0 : index
    %c256 = arith.constant 256 : index
    %24 = vector.load %arg7[%c0_20, %c256] : memref<64x1152xbf16, #tpu.memory_space<vmem>>, vector<64x128xbf16>
    tpu.vector_store %arg7[%c0_20, %c256], %23 {strides = array<i32>} : memref<64x1152xbf16, #tpu.memory_space<vmem>>, vector<64x128xbf16>,
    %c1_21 = arith.constant 1 : index
    %c0_22 = arith.constant 0 : index
    %c0_23 = arith.constant 0 : index
    %25 = vector.load %arg6[%c1_21, %c0_22, %c0_23] : memref<10x10x128xbf16, #tpu.memory_space<vmem>>, vector<8x8x128xbf16>
    %26 = vector.shape_cast %25 : vector<8x8x128xbf16> to vector<64x128xbf16>
    %c0_24 = arith.constant 0 : index
    %c384 = arith.constant 384 : index
    %27 = vector.load %arg7[%c0_24, %c384] : memref<64x1152xbf16, #tpu.memory_space<vmem>>, vector<64x128xbf16>
    tpu.vector_store %arg7[%c0_24, %c384], %26 {strides = array<i32>} : memref<64x1152xbf16, #tpu.memory_space<vmem>>, vector<64x128xbf16>,
    %c1_25 = arith.constant 1 : index
    %c1_26 = arith.constant 1 : index
    %c0_27 = arith.constant 0 : index
    %28 = vector.load %arg6[%c1_25, %c1_26, %c0_27] : memref<10x10x128xbf16, #tpu.memory_space<vmem>>, vector<8x8x128xbf16>
    %29 = vector.shape_cast %28 : vector<8x8x128xbf16> to vector<64x128xbf16>
    %c0_28 = arith.constant 0 : index
    %c512 = arith.constant 512 : index
    %30 = vector.load %arg7[%c0_28, %c512] : memref<64x1152xbf16, #tpu.memory_space<vmem>>, vector<64x128xbf16>
    tpu.vector_store %arg7[%c0_28, %c512], %29 {strides = array<i32>} : memref<64x1152xbf16, #tpu.memory_space<vmem>>, vector<64x128xbf16>,
    %c1_29 = arith.constant 1 : index
    %c2_30 = arith.constant 2 : index
    %c0_31 = arith.constant 0 : index
    %31 = vector.load %arg6[%c1_29, %c2_30, %c0_31] : memref<10x10x128xbf16, #tpu.memory_space<vmem>>, vector<8x8x128xbf16>
    %32 = vector.shape_cast %31 : vector<8x8x128xbf16> to vector<64x128xbf16>
    %c0_32 = arith.constant 0 : index
    %c640 = arith.constant 640 : index
    %33 = vector.load %arg7[%c0_32, %c640] : memref<64x1152xbf16, #tpu.memory_space<vmem>>, vector<64x128xbf16>
    tpu.vector_store %arg7[%c0_32, %c640], %32 {strides = array<i32>} : memref<64x1152xbf16, #tpu.memory_space<vmem>>, vector<64x128xbf16>,
    %c2_33 = arith.constant 2 : index
    %c0_34 = arith.constant 0 : index
    %c0_35 = arith.constant 0 : index
    %34 = vector.load %arg6[%c2_33, %c0_34, %c0_35] : memref<10x10x128xbf16, #tpu.memory_space<vmem>>, vector<8x8x128xbf16>
    %35 = vector.shape_cast %34 : vector<8x8x128xbf16> to vector<64x128xbf16>
    %c0_36 = arith.constant 0 : index
    %c768 = arith.constant 768 : index
    %36 = vector.load %arg7[%c0_36, %c768] : memref<64x1152xbf16, #tpu.memory_space<vmem>>, vector<64x128xbf16>
    tpu.vector_store %arg7[%c0_36, %c768], %35 {strides = array<i32>} : memref<64x1152xbf16, #tpu.memory_space<vmem>>, vector<64x128xbf16>,
    %c2_37 = arith.constant 2 : index
    %c1_38 = arith.constant 1 : index
    %c0_39 = arith.constant 0 : index
    %37 = vector.load %arg6[%c2_37, %c1_38, %c0_39] : memref<10x10x128xbf16, #tpu.memory_space<vmem>>, vector<8x8x128xbf16>
    %38 = vector.shape_cast %37 : vector<8x8x128xbf16> to vector<64x128xbf16>
    %c0_40 = arith.constant 0 : index
    %c896 = arith.constant 896 : index
    %39 = vector.load %arg7[%c0_40, %c896] : memref<64x1152xbf16, #tpu.memory_space<vmem>>, vector<64x128xbf16>
    tpu.vector_store %arg7[%c0_40, %c896], %38 {strides = array<i32>} : memref<64x1152xbf16, #tpu.memory_space<vmem>>, vector<64x128xbf16>,
    %c2_41 = arith.constant 2 : index
    %c2_42 = arith.constant 2 : index
    %c0_43 = arith.constant 0 : index
    %40 = vector.load %arg6[%c2_41, %c2_42, %c0_43] : memref<10x10x128xbf16, #tpu.memory_space<vmem>>, vector<8x8x128xbf16>
    %41 = vector.shape_cast %40 : vector<8x8x128xbf16> to vector<64x128xbf16>
    %c0_44 = arith.constant 0 : index
    %c1024 = arith.constant 1024 : index
    %42 = vector.load %arg7[%c0_44, %c1024] : memref<64x1152xbf16, #tpu.memory_space<vmem>>, vector<64x128xbf16>
    tpu.vector_store %arg7[%c0_44, %c1024], %41 {strides = array<i32>} : memref<64x1152xbf16, #tpu.memory_space<vmem>>, vector<64x128xbf16>,
    %c0_45 = arith.constant 0 : index
    %c0_46 = arith.constant 0 : index
    %43 = vector.load %arg7[%c0_45, %c0_46] : memref<64x1152xbf16, #tpu.memory_space<vmem>>, vector<64x1152xbf16>
    %c0_47 = arith.constant 0 : index
    %c0_48 = arith.constant 0 : index
    %44 = vector.load %arg2[%c0_47, %c0_48] : memref<1152x128xbf16, #tpu.memory_space<vmem>>, vector<1152x128xbf16>
    %cst_49 = arith.constant dense<0.000000e+00> : vector<64x128xf32>
    %45 = tpu.matmul %43, %44, %cst_49 {dimension_numbers = #tpu.dot_dimension_numbers<[1], [0], [0], [1], [0, 0, 1, 1], [], []>} : vector<64x1152xbf16>, vector<1152x128xbf16>, vector<64x128xf32> -> vector<64x128xf32>
    %46 = arith.truncf %45 : vector<64x128xf32> to vector<64x128xbf16>
    %c0_50 = arith.constant 0 : index
    %c0_51 = arith.constant 0 : index
    %c0_52 = arith.constant 0 : index
    %47 = vector.load %arg3[%c0_50, %c0_51, %c0_52] : memref<1x64x128xbf16, #tpu.memory_space<vmem>>, vector<1x64x128xbf16>
    %48 = vector.shape_cast %47 : vector<1x64x128xbf16> to vector<64x128xbf16>
    %49 = vector.shape_cast %46 : vector<64x128xbf16> to vector<1x64x128xbf16>
    tpu.vector_store %arg3[%c0_50, %c0_51, %c0_52], %49 {strides = array<i32>} : memref<1x64x128xbf16, #tpu.memory_space<vmem>>, vector<1x64x128xbf16>,
    %cst_53 = arith.constant dense<0.000000e+00> : vector<128xf32>
    %50 = vector.multi_reduction <add>, %45, %cst_53 [0] : vector<64x128xf32> to vector<128xf32>
    %51 = vector.shape_cast %50 : vector<128xf32> to vector<1x128xf32>
    %c0_54 = arith.constant 0 : index
    %c0_55 = arith.constant 0 : index
    %c0_56 = arith.constant 0 : index
    %52 = vector.load %arg4[%c0_54, %c0_55, %c0_56] : memref<1x1x128xf32, #tpu.memory_space<vmem>>, vector<1x1x128xf32>
    %53 = vector.shape_cast %52 : vector<1x1x128xf32> to vector<1x128xf32>
    %54 = vector.shape_cast %51 : vector<1x128xf32> to vector<1x1x128xf32>
    tpu.vector_store %arg4[%c0_54, %c0_55, %c0_56], %54 {strides = array<i32>} : memref<1x1x128xf32, #tpu.memory_space<vmem>>, vector<1x1x128xf32>,
    %55 = arith.mulf %45, %45 : vector<64x128xf32>
    %cst_57 = arith.constant dense<0.000000e+00> : vector<128xf32>
    %56 = vector.multi_reduction <add>, %55, %cst_57 [0] : vector<64x128xf32> to vector<128xf32>
    %57 = vector.shape_cast %56 : vector<128xf32> to vector<1x128xf32>
    %c0_58 = arith.constant 0 : index
    %c0_59 = arith.constant 0 : index
    %c0_60 = arith.constant 0 : index
    %58 = vector.load %arg5[%c0_58, %c0_59, %c0_60] : memref<1x1x128xf32, #tpu.memory_space<vmem>>, vector<1x1x128xf32>
    %59 = vector.shape_cast %58 : vector<1x1x128xf32> to vector<1x128xf32>
    %60 = vector.shape_cast %57 : vector<1x128xf32> to vector<1x1x128xf32>
    tpu.vector_store %arg5[%c0_58, %c0_59, %c0_60], %60 {strides = array<i32>} : memref<1x1x128xf32, #tpu.memory_space<vmem>>, vector<1x1x128xf32>,
    return
  }
  func.func @transform_0(%arg0: i32) -> (i32, i32, i32, i32, i32) {
    %c0_i32 = arith.constant 0 : i32
    %c0_i32_0 = arith.constant 0 : i32
    %c0_i32_1 = arith.constant 0 : i32
    %c0_i32_2 = arith.constant 0 : i32
    %c0_i32_3 = arith.constant 0 : i32
    return %arg0, %c0_i32, %c0_i32_0, %c0_i32_1, %c0_i32_2 : i32, i32, i32, i32, i32
  }
  func.func @transform_1(%arg0: i32) -> (i32, i32) {
    %c0_i32 = arith.constant 0 : i32
    %c0_i32_0 = arith.constant 0 : i32
    %c0_i32_1 = arith.constant 0 : i32
    return %c0_i32, %c0_i32_0 : i32, i32
  }
  func.func @transform_2(%arg0: i32) -> (i32, i32, i32) {
    %c0_i32 = arith.constant 0 : i32
    %c0_i32_0 = arith.constant 0 : i32
    %c0_i32_1 = arith.constant 0 : i32
    return %arg0, %c0_i32, %c0_i32_0 : i32, i32, i32
  }
  func.func @transform_3(%arg0: i32) -> (i32, i32, i32) {
    %c0_i32 = arith.constant 0 : i32
    %c0_i32_0 = arith.constant 0 : i32
    %c0_i32_1 = arith.constant 0 : i32
    return %arg0, %c0_i32, %c0_i32_0 : i32, i32, i32
  }
  func.func @transform_4(%arg0: i32) -> (i32, i32, i32) {
    %c0_i32 = arith.constant 0 : i32
    %c0_i32_0 = arith.constant 0 : i32
    %c0_i32_1 = arith.constant 0 : i32
    return %arg0, %c0_i32, %c0_i32_0 : i32, i32, i32
  }
}

module attributes {stable_mosaic.version = 11 : i64} {
  func.func @_bn_relu_kernel(%arg0: i32, %arg1: memref<1x64x128xbf16, #tpu.memory_space<vmem>>, %arg2: memref<1x128xf32, #tpu.memory_space<vmem>>, %arg3: memref<1x128xf32, #tpu.memory_space<vmem>>, %arg4: memref<1x64x128xf32, #tpu.memory_space<vmem>>) attributes {dimension_semantics = [#tpu.dimension_semantics<parallel>], iteration_bounds = array<i64: 2>, scalar_prefetch = 0 : i64, scratch_operands = 0 : i64, tpu.core_type = #tpu.core_type<tc>, window_params = [{transform_indices = @transform_0, window_bounds = array<i64: 1, 64, 128>}, {pipeline_mode = #tpu.pipeline_mode<synchronous>, transform_indices = @transform_1, window_bounds = array<i64: 1, 128>}, {pipeline_mode = #tpu.pipeline_mode<synchronous>, transform_indices = @transform_2, window_bounds = array<i64: 1, 128>}, {transform_indices = @transform_3, window_bounds = array<i64: 1, 64, 128>}]} {
    %c0 = arith.constant 0 : index
    %c0_0 = arith.constant 0 : index
    %c0_1 = arith.constant 0 : index
    %0 = vector.load %arg1[%c0, %c0_0, %c0_1] : memref<1x64x128xbf16, #tpu.memory_space<vmem>>, vector<1x64x128xbf16>
    %1 = vector.shape_cast %0 : vector<1x64x128xbf16> to vector<64x128xbf16>
    %2 = arith.extf %1 : vector<64x128xbf16> to vector<64x128xf32>
    %c0_2 = arith.constant 0 : index
    %c0_3 = arith.constant 0 : index
    %3 = vector.load %arg2[%c0_2, %c0_3] : memref<1x128xf32, #tpu.memory_space<vmem>>, vector<1x128xf32>
    %4 = vector.broadcast %3 : vector<1x128xf32> to vector<64x128xf32>
    %5 = arith.mulf %2, %4 : vector<64x128xf32>
    %c0_4 = arith.constant 0 : index
    %c0_5 = arith.constant 0 : index
    %6 = vector.load %arg3[%c0_4, %c0_5] : memref<1x128xf32, #tpu.memory_space<vmem>>, vector<1x128xf32>
    %7 = vector.broadcast %6 : vector<1x128xf32> to vector<64x128xf32>
    %8 = arith.addf %5, %7 : vector<64x128xf32>
    %cst = arith.constant 0.000000e+00 : f32
    %9 = vector.broadcast %cst : f32 to vector<64x128xf32>
    %10 = arith.maximumf %8, %9 : vector<64x128xf32>
    %c0_6 = arith.constant 0 : index
    %c0_7 = arith.constant 0 : index
    %c0_8 = arith.constant 0 : index
    %11 = vector.load %arg4[%c0_6, %c0_7, %c0_8] : memref<1x64x128xf32, #tpu.memory_space<vmem>>, vector<1x64x128xf32>
    %12 = vector.shape_cast %11 : vector<1x64x128xf32> to vector<64x128xf32>
    %13 = vector.shape_cast %10 : vector<64x128xf32> to vector<1x64x128xf32>
    tpu.vector_store %arg4[%c0_6, %c0_7, %c0_8], %13 {strides = array<i32>} : memref<1x64x128xf32, #tpu.memory_space<vmem>>, vector<1x64x128xf32>,
    return
  }
  func.func @transform_0(%arg0: i32) -> (i32, i32, i32) {
    %c0_i32 = arith.constant 0 : i32
    %c0_i32_0 = arith.constant 0 : i32
    %c0_i32_1 = arith.constant 0 : i32
    return %arg0, %c0_i32, %c0_i32_0 : i32, i32, i32
  }
  func.func @transform_1(%arg0: i32) -> (i32, i32) {
    %c0_i32 = arith.constant 0 : i32
    %c0_i32_0 = arith.constant 0 : i32
    %c0_i32_1 = arith.constant 0 : i32
    return %c0_i32, %c0_i32_0 : i32, i32
  }
  func.func @transform_2(%arg0: i32) -> (i32, i32) {
    %c0_i32 = arith.constant 0 : i32
    %c0_i32_0 = arith.constant 0 : i32
    %c0_i32_1 = arith.constant 0 : i32
    return %c0_i32, %c0_i32_0 : i32, i32
  }
  func.func @transform_3(%arg0: i32) -> (i32, i32, i32) {
    %c0_i32 = arith.constant 0 : i32
    %c0_i32_0 = arith.constant 0 : i32
    %c0_i32_1 = arith.constant 0 : i32
    return %arg0, %c0_i32, %c0_i32_0 : i32, i32, i32
  }
}

</mosaic_0001>

<bundles_post_ra>
// kernel: down_forward.5
= control target key start
LH: loop header
LB: loop body
LE: loop exit
PB: predicated region body
PF: predicated region fallthrough
CT: control target
= control target key end

     0   :  { %s358_s12 = smov 0   ;;  %s385_s0 = inlined_call_operand.vmem [shape: bf16[2,64,128], index: 0, kind: input, shape index: {}]   ;;  %s386_s1 = inlined_call_operand.vmem [shape: f32[1,128], index: 1, kind: input, shape index: {}]   ;;  %s387_s2 = inlined_call_operand.vmem [shape: f32[1,128], index: 2, kind: input, shape index: {}]   ;;  %s388_s3 = inlined_call_operand.vmem [shape: f32[2,64,128], index: 3, kind: output, shape index: {}]  }
   0x1 LB: > { %s288_s13 = sadd.s32 4294967295, %s336_s12   ;;  %p292_p0 = scmp.ge.s32.totalorder %s336_s12, 1  ;;  %s336_s12 = sphi %s358_s12, %s13_s12  }
   0x2   : > { %p137_p1 = scmp.lt.s32.totalorder %s336_s12, 3 }
   0x4   : > { %p138_p2 = pnand %p292_p0, %p137_p1 }
   0x5   : > { %p161_p3 = scmp.lt.s32.totalorder (!%p138_p2), %s288_s13, 1  ;;  %v297_v0 = vld [vmem:[%s386_s1] ss:$0 sm:$0xff] (!%p138_p2) }
   0x6   : > { %141 = sbr.rel (%p138_p2) target bundleno = 29 (0x1d), region = 32  ;;  %v298_v9 = vld [vmem:[%s387_s2] ss:$0 sm:$0xff] (!%p138_p2) }
   0xd   : > { %s390_s13 = smov (!%p161_p3, %s288_s13), 1 }
   0xe   : > { %s301_s14 = sshll.u32 %s390_s13, 5  ;;  %s302_s22 = sshll.u32 %s390_s13, 6 }
   0xf   : > { %s165_s17 = scalar_lea.vmem %s385_s0, %s301_s14  ;;  %s170_s25 = scalar_lea.vmem %s388_s3, %s302_s22 }
  0x10   : > { %v304_v1 = vld [vmem:[%s165_s17] sm:$0xff]   ;;  %v319_v2 = vld [vmem:[%s165_s17 + $0x8] sm:$0xff]   ;;  %v320_v3 = vld [vmem:[%s165_s17 + $0x10] sm:$0xff]  }
  0x11   : > { %v305_v4 = vunpack.c.l.bf16 %v304_v1  ;;  %v306_v5 = vunpack.c.h.bf16 %v304_v1  ;;  %v309_v6 = vunpack.c.l.bf16 %v319_v2  ;;  %v310_v7 = vunpack.c.h.bf16 %v319_v2  ;;  %v321_v8 = vld [vmem:[%s165_s17 + $0x18] sm:$0xff]  }
  0x12   : > { %v313_v10 = vunpack.c.l.bf16 %v320_v3  ;;  %v314_v11 = vunpack.c.h.bf16 %v320_v3  ;;  %v317_v12 = vunpack.c.l.bf16 %v321_v8  ;;  %v318_v13 = vunpack.c.h.bf16 %v321_v8 }
  0x13   : > { %v194_v14 = vmul.f32 %v305_v4, %v297_v0  ;;  %v195_v15 = vmul.f32 %v306_v5, %v297_v0  ;;  %v196_v16 = vmul.f32 %v309_v6, %v297_v0  ;;  %v197_v17 = vmul.f32 %v310_v7, %v297_v0 }
  0x14   : > { %v198_v18 = vmul.f32 %v313_v10, %v297_v0  ;;  %v199_v19 = vmul.f32 %v314_v11, %v297_v0  ;;  %v200_v20 = vmul.f32 %v317_v12, %v297_v0  ;;  %v201_v21 = vmul.f32 %v318_v13, %v297_v0 }
  0x15   : > { %v209_v22 = vadd.f32 %v298_v9, %v194_v14  ;;  %v210_v23 = vadd.f32 %v298_v9, %v195_v15  ;;  %v211_v24 = vadd.f32 %v298_v9, %v196_v16  ;;  %v212_v25 = vadd.f32 %v298_v9, %v197_v17 }
  0x16   : > { %v213_v26 = vadd.f32 %v298_v9, %v198_v18  ;;  %v214_v27 = vadd.f32 %v298_v9, %v199_v19  ;;  %v215_v28 = vadd.f32 %v298_v9, %v200_v20  ;;  %v216_v29 = vadd.f32 %v298_v9, %v201_v21 }
  0x17   : > { %v217_v30 = vmax.f32 %v209_v22, 0.0  ;;  %v218_v31 = vmax.f32 %v210_v23, 0.0  ;;  %v219_v32 = vmax.f32 %v211_v24, 0.0  ;;  %v220_v33 = vmax.f32 %v212_v25, 0.0 }
  0x18   : > { %v221_v34 = vmax.f32 %v213_v26, 0.0  ;;  %v222_v35 = vmax.f32 %v214_v27, 0.0  ;;  %v223_v36 = vmax.f32 %v215_v28, 0.0  ;;  %v224_v37 = vmax.f32 %v216_v29, 0.0 }
  0x19   : > { %225 = vst [vmem:[%s170_s25] sm:$0xff] %v217_v30  ;;  %226 = vst [vmem:[%s170_s25 + $0x8] sm:$0xff] %v218_v31 }
  0x1a   : > { %227 = vst [vmem:[%s170_s25 + $0x10] sm:$0xff] %v219_v32  ;;  %228 = vst [vmem:[%s170_s25 + $0x18] sm:$0xff] %v220_v33 }
  0x1b   : > { %229 = vst [vmem:[%s170_s25 + $0x20] sm:$0xff] %v221_v34  ;;  %230 = vst [vmem:[%s170_s25 + $0x28] sm:$0xff] %v222_v35 }
  0x1c   : > { %231 = vst [vmem:[%s170_s25 + $0x30] sm:$0xff] %v223_v36  ;;  %232 = vst [vmem:[%s170_s25 + $0x38] sm:$0xff] %v224_v37 }
  0x1d PF: > { %s13_s12 = sadd.s32 1, %s336_s12  }
  0x1e   : > { %p10_p4 = scmp.ge.s32.totalorder %s13_s12, 4  }
  0x20   :  { %12 = sbr.rel (!%p10_p4) target bundleno = 1 (0x1), region = 62 }

// kernel: down_forward.4
= control target key start
LH: loop header
LB: loop body
LE: loop exit
PB: predicated region body
PF: predicated region fallthrough
CT: control target
= control target key end

     0   :  { %s3002_s21 = smov 0   ;;  %s3499_s0 = inlined_call_operand.vmem [shape: bf16[2,64,128], index: 0, kind: input, shape index: {}]   ;;  %s3500_s1 = inlined_call_operand.vmem [shape: f32[1,128], index: 1, kind: input, shape index: {}]   ;;  %s3501_s2 = inlined_call_operand.vmem [shape: f32[1,128], index: 2, kind: input, shape index: {}]   ;;  %s3502_s3 = inlined_call_operand.vmem [shape: bf16[1152,128], index: 3, kind: input, shape index: {}]   ;;  %s3503_s4 = inlined_call_operand.vmem [shape: bf16[2,64,128], index: 4, kind: output, shape index: {0}]   ;;  %s3504_s5 = inlined_call_operand.vmem [shape: f32[2,1,128], index: 5, kind: output, shape index: {1}]   ;;  %s3505_s6 = inlined_call_operand.vmem [shape: f32[2,1,128], index: 6, kind: output, shape index: {2}]  }
   0x1 LB: > { %s2432_s22 = sadd.s32 4294967295, %s2964_s21   ;;  %p2436_p0 = scmp.ge.s32.totalorder %s2964_s21, 1  ;;  %s2964_s21 = sphi %s3002_s21, %s17_s21  }
   0x2   : > { %p217_p1 = scmp.lt.s32.totalorder %s2964_s21, 3 }
   0x4   : > { %p218_p2 = pnand %p2436_p0, %p217_p1 }
   0x5   : > { %v2874_v0 = vld [vmem:[%s3502_s3 + $0xc0] sm:$0xff] (!%p218_p2)   ;;  %v2876_v2 = vld [vmem:[%s3502_s3 + $0xc8] sm:$0xff] (!%p218_p2)   ;;  %v2966_v3 = vmov (!%p218_p2), 0   ;;  %v2880_v7 = vld [vmem:[%s3502_s3 + $0xd0] sm:$0xff] (!%p218_p2)   ;;  %p253_p3 = scmp.lt.s32.totalorder (!%p218_p2), %s2432_s22, 1  ;;  %vm449_vm0 = vcmask (!%p218_p2), 1043456  }
   0x6   : > { %221 = sbr.rel (%p218_p2) target bundleno = 395 (0x18b), region = 36  ;;  %v2875_v1 = vld [vmem:[%s3502_s3 + $0x80] sm:$0xff] (!%p218_p2)   ;;  %2693 = vmatprep.subr.bf16.mxu1 (!%p218_p2), %v2874_v0  ;;  %350 = vst [vmem:[#allocation2 + $0x8] sm:$0xf] (!%p218_p2), %v2966_v3  ;;  %352 = vst [vmem:[#allocation2 + $0x10] sm:$0xf] (!%p218_p2), %v2966_v3 }
   0x7   : > { %348 = vst [vmem:[#allocation2] sm:$0xf] (!%p218_p2), %v2966_v3  ;;  %349 = vst [vmem:[#allocation2 + $0x4] sm:$0x1] (!%p218_p2), %v2966_v3  ;;  %2694 = vmatpush3.bf16.msra.mxu1 (!%p218_p2), %v2875_v1  ;;  %v2877_v4 = vld [vmem:[%s3502_s3 + $0x88] sm:$0xff] (!%p218_p2)   ;;  %v2878_v5 = vld [vmem:[%s3502_s3 + $0x40] sm:$0xff] (!%p218_p2)  }
   0x8   : > { %351 = vst [vmem:[#allocation2 + $0xc] sm:$0x1] (!%p218_p2), %v2966_v3  ;;  %353 = vst [vmem:[#allocation2 + $0x14] sm:$0x1] (!%p218_p2), %v2966_v3  ;;  %2695 = vmatprep.subr.bf16.mxu1 (!%p218_p2), %v2876_v2  ;;  %v2879_v6 = vld [vmem:[%s3502_s3] sm:$0xff] (!%p218_p2)   ;;  %2653 = vmatprep.subr.bf16.mxu0 (!%p218_p2), %v2878_v5  ;;  %v2881_v8 = vld [vmem:[%s3502_s3 + $0x90] sm:$0xff] (!%p218_p2)  }
   0x9   : > { %354 = vst [vmem:[#allocation2 + $0x18] sm:$0xf] (!%p218_p2), %v2966_v3  ;;  %355 = vst [vmem:[#allocation2 + $0x1c] sm:$0x1] (!%p218_p2), %v2966_v3  ;;  %2654 = vmatpush3.bf16.msra.mxu0 (!%p218_p2), %v2879_v6  ;;  %v2882_v9 = vld [vmem:[%s3502_s3 + $0x48] sm:$0xff] (!%p218_p2)   ;;  %v2884_v11 = vld [vmem:[%s3502_s3 + $0xd8] sm:$0xff] (!%p218_p2)  }
   0xa   : > { %356 = vst [vmem:[#allocation2 + $0x20] sm:$0xf] (!%p218_p2), %v2966_v3  ;;  %357 = vst [vmem:[#allocation2 + $0x24] sm:$0x1] (!%p218_p2), %v2966_v3  ;;  %v2883_v10 = vld [vmem:[%s3502_s3 + $0x8] sm:$0xff] (!%p218_p2)   ;;  %2655 = vmatprep.subr.bf16.mxu0 (!%p218_p2), %v2882_v9  ;;  %v2885_v12 = vld [vmem:[%s3502_s3 + $0x98] sm:$0xff] (!%p218_p2)  }
   0xb   : > { %358 = vst [vmem:[#allocation2 + $0x28] sm:$0xf] (!%p218_p2), %v2966_v3  ;;  %359 = vst [vmem:[#allocation2 + $0x2c] sm:$0x1] (!%p218_p2), %v2966_v3  ;;  %2696 = vmatpush3.bf16.msra.mxu1 (!%p218_p2), %v2877_v4  ;;  %v2886_v13 = vld [vmem:[%s3502_s3 + $0x50] sm:$0xff] (!%p218_p2)   ;;  %v2888_v15 = vld [vmem:[%s3502_s3 + $0xe0] sm:$0xff] (!%p218_p2)  }
   0xc   : > { %360 = vst [vmem:[#allocation2 + $0x30] sm:$0xf] (!%p218_p2), %v2966_v3  ;;  %361 = vst [vmem:[#allocation2 + $0x34] sm:$0x1] (!%p218_p2), %v2966_v3  ;;  %2697 = vmatprep.subr.bf16.mxu1 (!%p218_p2), %v2880_v7  ;;  %v2887_v14 = vld [vmem:[%s3502_s3 + $0x10] sm:$0xff] (!%p218_p2)   ;;  %v2889_v16 = vld [vmem:[%s3502_s3 + $0xa0] sm:$0xff] (!%p218_p2)  }
   0xd   : > { %362 = vst [vmem:[#allocation2 + $0x38] sm:$0xf] %v2966_v3  ;;  %363 = vst [vmem:[#allocation2 + $0x3c] sm:$0x1] %v2966_v3  ;;  %2656 = vmatpush3.bf16.msra.mxu0 %v2883_v10  ;;  %v2890_v17 = vld [vmem:[%s3502_s3 + $0x58] sm:$0xff]   ;;  %v2892_v19 = vld [vmem:[%s3502_s3 + $0xe8] sm:$0xff]  }
   0xe   : > { %364 = vst [vmem:[#allocation2 + $0x40] sm:$0xf] %v2966_v3  ;;  %365 = vst [vmem:[#allocation2 + $0x44] sm:$0x1] %v2966_v3  ;;  %2657 = vmatprep.subr.bf16.mxu0 %v2886_v13  ;;  %v2891_v18 = vld [vmem:[%s3502_s3 + $0x18] sm:$0xff]   ;;  %v2893_v20 = vld [vmem:[%s3502_s3 + $0xa8] sm:$0xff]  }
   0xf   : > { %366 = vst [vmem:[#allocation2 + $0x48] sm:$0xf] %v2966_v3  ;;  %367 = vst [vmem:[#allocation2 + $0x4c] sm:$0x1] %v2966_v3  ;;  %2698 = vmatpush3.bf16.msra.mxu1 %v2881_v8  ;;  %v2894_v21 = vld [vmem:[%s3502_s3 + $0x60] sm:$0xff]   ;;  %s3515_s22 = smov (!%p253_p3, %s2432_s22), 1 }
  0x10   : > { %2699 = vmatprep.subr.bf16.mxu1 %v2884_v11  ;;  %v2895_v22 = vld [vmem:[%s3502_s3 + $0x20] sm:$0xff]   ;;  %v2896_v23 = vld [vmem:[%s3502_s3 + $0xf0] sm:$0xff]   ;;  %v2898_v25 = vld [vmem:[%s3502_s3 + $0x68] sm:$0xff]   ;;  %s2593_s29 = sshll.u32 %s3515_s22, 5  ;;  %vm455_vm1 = vcmask 1040384   ;;  %vm722_vm6 = vcmask 1042432   ;;  %s265_s7 = scalar_lea.vmem %s3504_s5, %s3515_s22 }
  0x11   : > { %2658 = vmatpush3.bf16.msra.mxu0 %v2887_v14  ;;  %v2897_v24 = vld [vmem:[%s3502_s3 + $0xb0] sm:$0xff]   ;;  %v2899_v26 = vld [vmem:[%s3502_s3 + $0x28] sm:$0xff]   ;;  %v2900_v27 = vld [vmem:[%s3502_s3 + $0xf8] sm:$0xff]   ;;  %s3106_s14 = scalar_lea.vmem %s3499_s0, %s2593_s29  ;;  %vm450_vm2 = vsmask.f32 7938  ;;  %vm723_vm7 = vcmask 1046532   ;;  %s262_s28 = scalar_lea.vmem %s3503_s4, %s2593_s29 }
  0x12   : > { %2659 = vmatprep.subr.bf16.mxu0 %v2890_v17  ;;  %v2901_v28 = vld [vmem:[%s3502_s3 + $0xb8] sm:$0xff]   ;;  %v2902_v29 = vld [vmem:[%s3502_s3 + $0x70] sm:$0xff]   ;;  %v2612_v31 = vld [vmem:[%s3106_s14] sm:$0xff]   ;;  %vm456_vm3 = vsmask.f32 256  ;;  %s268_s10 = scalar_lea.vmem %s3505_s6, %s3515_s22 }
  0x13   : > { %2700 = vmatpush3.bf16.msra.mxu1 %v2885_v12  ;;  %v2903_v30 = vld [vmem:[%s3502_s3 + $0x30] sm:$0xff]   ;;  %v3118_v32 = vld [vmem:[%s3500_s1] ss:$0 sm:$0xff]  ;;  %v2613_v33 = vunpack.c.l.bf16 %v2612_v31  ;;  %v2614_v34 = vunpack.c.h.bf16 %v2612_v31  ;;  %v2907_v41 = vld [vmem:[%s3502_s3 + $0x78] sm:$0xff]   ;;  %vm555_vm8 = vsmask.f32 3328 }
  0x14   : > { %2701 = vmatprep.subr.bf16.mxu1 %v2888_v15  ;;  %v3123_v35 = vld [vmem:[%s3501_s2] ss:$0 sm:$0xff]  ;;  %v2908_v44 = vld [vmem:[%s3502_s3 + $0x38] sm:$0xff]   ;;  %v452_v52 = vld [vmem:[#allocation2 + $0x8] sm:$0xf] }
  0x15   : > { %2660 = vmatpush3.bf16.msra.mxu0 %v2891_v18  ;;  %v293_v36 = vmul.f32 %v2613_v33, %v3118_v32  ;;  %v294_v37 = vmul.f32 %v2614_v34, %v3118_v32  ;;  %v2905_v38 = vld [vmem:[%s3502_s3 + $0x1c0] sm:$0xff]   ;;  %v461_v53 = vld [vmem:[#allocation2 + $0x10] sm:$0xf]  ;;  %vm3142_vm4 = vmand %vm449_vm0, %vm450_vm2  ;;  %vm556_vm10 = vsmask.f32 7440 }
  0x16   : > { %2661 = vmatprep.subr.bf16.mxu0 %v2894_v21  ;;  %v539_v47 = vld [vmem:[#allocation2] sm:$0xf]  ;;  %v2647_v58 = vld [vmem:[%s3106_s14 + $0x8] sm:$0xff]   ;;  %vm3148_vm5 = vmand %vm455_vm1, %vm456_vm3 }
  0x17   : > { %2702 = vmatpush3.bf16.msra.mxu1 %v2889_v16  ;;  %v308_v39 = vadd.f32 %v3123_v35, %v293_v36  ;;  %v309_v40 = vadd.f32 %v3123_v35, %v294_v37  ;;  %v2911_v54 = vld [vmem:[%s3502_s3 + $0x140] sm:$0xff]   ;;  %v458_v60 = vld [vmem:[#allocation2 + $0xc] sm:$0x1]  ;;  %v559_v62 = vshrl.u32 %v539_v47, 16  ;;  %v2617_v63 = vunpack.c.l.bf16 %v2647_v58  ;;  %v464_v8 = vld [vmem:[#allocation2 + $0x14] sm:$0x1] }
  0x18   : > { %2703 = vmatprep.subr.bf16.mxu1 %v2892_v19  ;;  %v690_v61 = vld [vmem:[#allocation2] sm:$0xe]  ;;  %v540_v4 = vld [vmem:[#allocation2 + $0x4] sm:$0x1]  ;;  %v562_v5 = vshll.u32 %v539_v47, 16  ;;  %v2618_v6 = vunpack.c.h.bf16 %v2647_v58  ;;  %vm3165_vm9 = vmor %vm722_vm6, %vm723_vm7 }
  0x19   : > { %2662 = vmatpush3.bf16.msra.mxu0 %v2895_v22  ;;  %v316_v42 = vmax.f32 %v308_v39, 0.0  ;;  %v317_v43 = vmax.f32 %v309_v40, 0.0  ;;  %v295_v7 = vmul.f32 %v2617_v63, %v3118_v32  ;;  %v691_v12 = vld [vmem:[#allocation2 + $0x4] sm:$0x1]  ;;  %v2459_v14 = vrot.slane %v690_v61, 9  ;;  %vm3183_vm11 = vmor %vm555_vm8, %vm556_vm10 }
  0x1a   : > { %2663 = vmatprep.subr.bf16.mxu0 %v2898_v25  ;;  %v296_v15 = vmul.f32 %v2618_v6, %v3118_v32  ;;  %v561_v17 = vrot.slane %v559_v62, 4  ;;  %v568_v18 = vshll.u32 %v540_v4, 16  ;;  %v564_v19 = vrot.slane %v562_v5, 5  ;;  %v467_v47 = vld [vmem:[#allocation2 + $0x18] sm:$0xf]  ;;  %v2909_v62 = vld [vmem:[%s3502_s3 + $0x1c8] sm:$0xff]  }
  0x1b   : > { %2704 = vmatpush3.bf16.msra.mxu1 %v2893_v20  ;;  %v2595_v45 = vpack.c.bf16 %v316_v42, %v316_v42  ;;  %v2596_v46 = vpack.c.bf16 %v317_v43, %v317_v43  ;;  %v310_v16 = vadd.f32 %v3123_v35, %v295_v7  ;;  %v727_v22 = vrot.slane %v691_v12, 5 }
  0x1c   : > { %2705 = vmatprep.subr.bf16.mxu1 %v2896_v23  ;;  %v311_v20 = vadd.f32 %v3123_v35, %v296_v15 }
  0x1d   : > { %2664 = vmatpush3.bf16.msra.mxu0 %v2899_v26  ;;  %v369_v48 = vshrl.u32 %v2595_v45, 16  ;;  %v372_v49 = vshll.u32 %v2595_v45, 16  ;;  %v377_v50 = vshrl.u32 %v2596_v46, 16  ;;  %v380_v51 = vshll.u32 %v2596_v46, 16 }
  0x1e   : > { %2665 = vmatprep.subr.bf16.mxu0 %v2902_v29  ;;  %v318_v21 = vmax.f32 %v310_v16, 0.0  ;;  %v319_v23 = vmax.f32 %v311_v20, 0.0  ;;  %v3169_v26 = vrot.slane %v568_v18, 5  ;;  %v728_v39 = vsel %vm3165_vm9, %v2459_v14, %v727_v22  ;;  %v2915_v18 = vld [vmem:[%s3502_s3 + $0x1d0] sm:$0xff]   ;;  %v2914_v20 = vld [vmem:[%s3502_s3 + $0x100] sm:$0xff]  }
  0x1f   : > { %2706 = vmatpush3.bf16.msra.mxu1 %v2897_v24  ;;  %v371_v55 = vrot.slane %v369_v48, 7  ;;  %v379_v56 = vrot.slane %v377_v50, 7 }
  0x20   : > { %2707 = vmatprep.subr.bf16.mxu1 %v2900_v27  ;;  %v2597_v24 = vpack.c.bf16 %v318_v21, %v318_v21  ;;  %v2648_v27 = vld [vmem:[%s3106_s14 + $0x10] sm:$0xff]   ;;  %v2598_v34 = vpack.c.bf16 %v319_v23, %v319_v23 }
  0x21   : > { %2666 = vmatpush3.bf16.msra.mxu0 %v2903_v30  ;;  %v374_v0 = vor.u32 %v372_v49, %v371_v55  ;;  %v375_v1 = vrot.slane %v371_v55, 4  ;;  %v382_v2 = vor.u32 %v380_v51, %v379_v56  ;;  %v383_v3 = vrot.slane %v379_v56, 4 }
  0x22   : > { %2667 = vmatprep.subr.bf16.mxu0 %v2907_v41  ;;  %v385_v29 = vshrl.u32 %v2597_v24, 16  ;;  %v388_v30 = vshll.u32 %v2597_v24, 16  ;;  %v2621_v31 = vunpack.c.l.bf16 %v2648_v27  ;;  %v2622_v36 = vunpack.c.h.bf16 %v2648_v27 }
  0x23   : > { %2708 = vmatpush3.bf16.msra.mxu1 %v2901_v28  ;;  %v453_v9 = vsel %vm3142_vm4, %v374_v0, %v452_v52  ;;  %v462_v10 = vsel %vm3142_vm4, %v382_v2, %v461_v53  ;;  %v459_v11 = vsel %vm3148_vm5, %v375_v1, %v458_v60  ;;  %v465_v13 = vsel %vm3148_vm5, %v383_v3, %v464_v8  ;;  %v2906_v53 = vld [vmem:[%s3502_s3 + $0x180] sm:$0xff]   ;;  %v470_v60 = vld [vmem:[#allocation2 + $0x1c] sm:$0x1] }
  0x24   : > { %2773 = vmatprep.subr.bf16.mxu1 %v2905_v38  ;;  %454 = vst [vmem:[#allocation2 + $0x8] sm:$0xf] %v453_v9  ;;  %463 = vst [vmem:[#allocation2 + $0x10] sm:$0xf] %v462_v10  ;;  %v565_v28 = vor.u32 %v564_v19, %v561_v17  ;;  %v297_v41 = vmul.f32 %v2621_v31, %v3118_v32  ;;  %v387_v50 = vrot.slane %v385_v29, 7  ;;  %v393_v58 = vshrl.u32 %v2598_v34, 16 }
  0x25   : > { %2668 = vmatpush3.bf16.msra.mxu0 %v2908_v44  ;;  %460 = vst [vmem:[#allocation2 + $0xc] sm:$0x1] %v459_v11  ;;  %466 = vst [vmem:[#allocation2 + $0x14] sm:$0x1] %v465_v13  ;;  %v298_v51 = vmul.f32 %v2622_v36, %v3118_v32  ;;  %v473_v1 = vld [vmem:[#allocation2 + $0x20] sm:$0xf] }
  0x26   : > { %2733 = vmatprep.subr.bf16.mxu0 %v2911_v54  ;;  %v566_v48 = vrot.slane %v565_v28, 4  ;;  %v390_v63 = vor.u32 %v388_v30, %v387_v50  ;;  %v391_v0 = vrot.slane %v387_v50, 4  ;;  %v312_v3 = vadd.f32 %v3123_v35, %v297_v41  ;;  %v2910_v9 = vld [vmem:[%s3502_s3 + $0x188] sm:$0xff]   ;;  %v2916_v29 = vld [vmem:[%s3502_s3 + $0x190] sm:$0xff]  }
  0x27   : > { %v395_v6 = vrot.slane %v393_v58, 7  ;;  %v396_v7 = vshll.u32 %v2598_v34, 16  ;;  %v313_v24 = vadd.f32 %v3123_v35, %v298_v51  ;;  %v2917_v30 = vld [vmem:[%s3502_s3 + $0x148] sm:$0xff]   ;;  %v2921_v50 = vld [vmem:[%s3502_s3 + $0x150] sm:$0xff]  }
  0x28   : > { %v571_v10 = vsel %vm3183_vm11, %v566_v48, %v3169_v26  ;;  %v468_v11 = vsel %vm3142_vm4, %v390_v63, %v467_v47  ;;  %v471_v12 = vsel %vm3148_vm5, %v391_v0, %v470_v60  ;;  %v476_v26 = vld [vmem:[#allocation2 + $0x24] sm:$0x1]  ;;  %v2918_v41 = vld [vmem:[%s3502_s3 + $0x108] sm:$0xff]  }
  0x29   : > { %v398_v16 = vor.u32 %v396_v7, %v395_v6  ;;  %v399_v17 = vrot.slane %v395_v6, 4  ;;  %469 = vst [vmem:[#allocation2 + $0x18] sm:$0xf] %v468_v11  ;;  %472 = vst [vmem:[#allocation2 + $0x1c] sm:$0x1] %v471_v12  ;;  %v2925_v60 = vld [vmem:[%s3502_s3 + $0x1e0] sm:$0xff]  }
  0x2a   : > { %v482_v11 = vld [vmem:[#allocation2 + $0x2c] sm:$0x1] }
  0x2b   : > { %v2904_v33 = vld [vmem:[#allocation2 + $0x8] ss:$8 sps:$4 sm:$0xff]   ;;  %v474_v28 = vsel %vm3142_vm4, %v398_v16, %v473_v1  ;;  %v2926_v16 = vld [vmem:[%s3502_s3 + $0x1a0] sm:$0xff]  }
  0x2c   : > { %v692_v37 = vld [vmem:[#allocation2 + $0x8] sm:$0xe]  ;;  %v693_v38 = vld [vmem:[#allocation2 + $0xc] sm:$0x1]  ;;  %2023 = vmatprep.mubr.bf16.mxu1 %v2904_v33  ;;  %v543_v2 = vld [vmem:[#allocation2 + $0x10] sm:$0xf] }
  0x2d   : > { %v541_v40 = vld [vmem:[#allocation2 + $0x8] sm:$0xf]  ;;  %v2460_v42 = vrot.slane %v692_v37, 9  ;;  %v731_v43 = vrot.slane %v693_v38, 5  ;;  %v542_v44 = vld [vmem:[#allocation2 + $0xc] sm:$0x1]  ;;  %v477_v37 = vsel %vm3148_vm5, %v399_v17, %v476_v26 }
  0x2e   : > { %v573_v45 = vshrl.u32 %v541_v40, 16  ;;  %v576_v46 = vshll.u32 %v541_v40, 16  ;;  %v582_v49 = vshll.u32 %v542_v44, 16  ;;  %v694_v8 = vld [vmem:[#allocation2 + $0x10] sm:$0xe]  ;;  %v587_v13 = vshrl.u32 %v543_v2, 16 }
  0x2f   : > { %v732_v52 = vsel %vm3165_vm9, %v2460_v42, %v731_v43  ;;  %v2912_v15 = vld [vmem:[#allocation2] ss:$8 sps:$4 sm:$0xff]   ;;  %v590_v19 = vshll.u32 %v543_v2, 16  ;;  %v695_v21 = vld [vmem:[#allocation2 + $0x14] sm:$0x1]  ;;  %v2461_v22 = vrot.slane %v694_v8, 9 }
  0x30   : > { %v575_v55 = vrot.slane %v573_v45, 4  ;;  %v578_v56 = vrot.slane %v576_v46, 5  ;;  %v2467_v61 = vcombine.low %v728_v39, %v732_v52  ;;  %v584_v5 = vrot.slane %v582_v49, 5  ;;  %475 = vst [vmem:[#allocation2 + $0x20] sm:$0xf] %v474_v28  ;;  %v2919_v42 = vld [vmem:[%s3502_s3 + $0x1d8] sm:$0xff]  }
  0x31   : > { %v589_v23 = vrot.slane %v587_v13, 4  ;;  %v592_v31 = vrot.slane %v590_v19, 5  ;;  %v320_v33 = vmax.f32 %v312_v3, 0.0  ;;  %v544_v36 = vld [vmem:[#allocation2 + $0x14] sm:$0x1]  ;;  %v735_v38 = vrot.slane %v695_v21, 5 }
  0x32   : > { %v579_v4 = vor.u32 %v578_v56, %v575_v55  ;;  %2024 = vmatmul.mubr.bf16.vlgmr.msra.gmra.mrb[0].mxu1 %v2467_v61  ;;  %v321_v39 = vmax.f32 %v313_v24, 0.0  ;;  %478 = vst [vmem:[#allocation2 + $0x24] sm:$0x1] %v477_v37  ;;  %v2920_v43 = vld [vmem:[%s3502_s3 + $0x198] sm:$0xff]   ;;  %v596_v45 = vshll.u32 %v544_v36, 16 }
  0x33   : > { %2774 = vmatpush3.bf16.msra.mxu1 %v2906_v53  ;;  %v2599_v40 = vpack.c.bf16 %v320_v33, %v320_v33  ;;  %v593_v44 = vor.u32 %v592_v31, %v589_v23  ;;  %v696_v48 = vld [vmem:[#allocation2 + $0x18] sm:$0xe]  ;;  %v697_v49 = vld [vmem:[#allocation2 + $0x1c] sm:$0x1]  ;;  %v736_v51 = vsel %vm3165_vm9, %v2461_v22, %v735_v38  ;;  %v479_v1 = vld [vmem:[#allocation2 + $0x28] sm:$0xf] }
  0x34   : > { %v580_v14 = vrot.slane %v579_v4, 4  ;;  %2775 = vmatprep.subr.bf16.mxu1 %v2909_v62  ;;  %v2462_v52 = vrot.slane %v696_v48, 9  ;;  %v739_v53 = vrot.slane %v697_v49, 5  ;;  %v545_v55 = vld [vmem:[#allocation2 + $0x18] sm:$0xf]  ;;  %v2600_v58 = vpack.c.bf16 %v321_v39, %v321_v39  ;;  %v2930_v39 = vld [vmem:[%s3502_s3 + $0x1a8] sm:$0xff]  }
  0x35   : > { %v401_v46 = vshrl.u32 %v2599_v40, 16  ;;  %v404_v47 = vshll.u32 %v2599_v40, 16  ;;  %v546_v56 = vld [vmem:[#allocation2 + $0x1c] sm:$0x1]  ;;  %v601_v61 = vshrl.u32 %v545_v55, 16  ;;  %v604_v62 = vshll.u32 %v545_v55, 16 }
  0x36   : > { %v585_v27 = vsel %vm3183_vm11, %v580_v14, %v584_v5  ;;  %v610_v63 = vshll.u32 %v546_v56, 16  ;;  %v740_v3 = vsel %vm3165_vm9, %v2462_v52, %v739_v53  ;;  %v594_v4 = vrot.slane %v593_v44, 4  ;;  %v2927_v17 = vld [vmem:[%s3502_s3 + $0x158] sm:$0xff]   ;;  %v2931_v44 = vld [vmem:[%s3502_s3 + $0x160] sm:$0xff]   ;;  %v488_v56 = vld [vmem:[#allocation2 + $0x34] sm:$0x1] }
  0x37   : > { %v2455_v34 = vcombine.low %v571_v10, %v585_v27  ;;  %2776 = vmatpush3.bf16.msra.mxu1 %v2910_v9  ;;  %v403_v0 = vrot.slane %v401_v46, 7  ;;  %v2913_v2 = vld [vmem:[#allocation2 + $0x18] ss:$8 sps:$4 sm:$0xff]   ;;  %v598_v5 = vrot.slane %v596_v45, 5  ;;  %v2468_v6 = vcombine.low %v736_v51, %v740_v3  ;;  %v2924_v10 = vld [vmem:[%s3502_s3 + $0x110] sm:$0xff]  }
  0x38   : > { %2777 = vmatprep.subr.bf16.mxu1 %v2915_v18  ;;  %v603_v7 = vrot.slane %v601_v61, 4  ;;  %v606_v8 = vrot.slane %v604_v62, 5  ;;  %v612_v9 = vrot.slane %v610_v63, 5  ;;  %2031 = vmatprep.mubr.bf16.mxu1 %v2913_v2  ;;  %v409_v14 = vshrl.u32 %v2600_v58, 16  ;;  %v2929_v18 = vld [vmem:[%s3502_s3 + $0x1e8] sm:$0xff]   ;;  %v2649_v27 = vld [vmem:[%s3106_s14 + $0x18] sm:$0xff]  }
  0x39   : > { %1958 = vmatprep.mubr.bf16.mxu0 %v2455_v34  ;;  %v406_v12 = vor.u32 %v404_v47, %v403_v0  ;;  %v407_v13 = vrot.slane %v403_v0, 4  ;;  %v698_v21 = vld [vmem:[#allocation2 + $0x20] sm:$0xe]  ;;  %v599_v28 = vsel %vm3183_vm11, %v594_v4, %v598_v5  ;;  %v699_v31 = vld [vmem:[#allocation2 + $0x24] sm:$0x1]  ;;  %v2928_v33 = vld [vmem:[%s3502_s3 + $0x118] sm:$0xff]   ;;  %v2625_v40 = vunpack.c.l.bf16 %v2649_v27 }
  0x3a   : > { %1959 = vmatmul.mubr.bf16.vlgmr.msra.gmra.mrb[0].mxu0 %v2912_v15  ;;  %v412_v15 = vshll.u32 %v2600_v58, 16  ;;  %2032 = vmatmul.mubr.bf16.gmra.mrb[4].mxu1 %v2468_v6  ;;  %v607_v19 = vor.u32 %v606_v8, %v603_v7  ;;  %v411_v22 = vrot.slane %v409_v14, 7  ;;  %v547_v26 = vld [vmem:[#allocation2 + $0x20] sm:$0xf]  ;;  %v2626_v45 = vunpack.c.h.bf16 %v2649_v27  ;;  %v548_v49 = vld [vmem:[#allocation2 + $0x24] sm:$0x1] }
  0x3b   : > { %2734 = vmatpush3.bf16.msra.mxu0 %v2914_v20  ;;  %2778 = vmatpush3.bf16.msra.mxu1 %v2916_v29  ;;  %v485_v20 = vld [vmem:[#allocation2 + $0x30] sm:$0xf]  ;;  %v480_v23 = vsel %vm3142_vm4, %v406_v12, %v479_v1  ;;  %v483_v24 = vsel %vm3148_vm5, %v407_v13, %v482_v11  ;;  %v615_v34 = vshrl.u32 %v547_v26, 16  ;;  %v618_v36 = vshll.u32 %v547_v26, 16  ;;  %v2934_v55 = vld [vmem:[%s3502_s3 + $0x120] sm:$0xff]   ;;  %v2937_v14 = vld [vmem:[%s3502_s3 + $0x168] sm:$0xff]  }
  0x3c   : > { %2735 = vmatprep.subr.bf16.mxu0 %v2917_v30  ;;  %2779 = vmatprep.subr.bf16.mxu1 %v2919_v42  ;;  %v608_v29 = vrot.slane %v607_v19, 4  ;;  %v2922_v30 = vld [vmem:[#allocation2 + $0x10] ss:$8 sps:$4 sm:$0xff]   ;;  %481 = vst [vmem:[#allocation2 + $0x28] sm:$0xf] %v480_v23  ;;  %v414_v37 = vor.u32 %v412_v15, %v411_v22  ;;  %v415_v38 = vrot.slane %v411_v22, 4  ;;  %v300_v53 = vmul.f32 %v2626_v45, %v3118_v32 }
  0x3d   : > { %484 = vst [vmem:[#allocation2 + $0x2c] sm:$0x1] %v483_v24  ;;  %v617_v42 = vrot.slane %v615_v34, 4  ;;  %v2463_v48 = vrot.slane %v698_v21, 9  ;;  %v2935_v51 = vld [vmem:[%s3502_s3 + $0x1f0] sm:$0xff]   ;;  %v743_v52 = vrot.slane %v699_v31, 5 }
  0x3e   : > { %v486_v47 = vsel %vm3142_vm4, %v414_v37, %v485_v20  ;;  %v624_v62 = vshll.u32 %v548_v49, 16  ;;  %v315_v63 = vadd.f32 %v3123_v35, %v300_v53  ;;  %v2938_v21 = vld [vmem:[%s3502_s3 + $0x128] sm:$0xff]   ;;  %v491_v31 = vld [vmem:[#allocation2 + $0x38] sm:$0xf]  ;;  %v2943_v49 = vld [vmem:[%s3502_s3 + $0x130] sm:$0xff]  }
  0x3f   : > { %2736 = vmatpush3.bf16.msra.mxu0 %v2918_v41  ;;  %2780 = vmatpush3.bf16.msra.mxu1 %v2920_v43  ;;  %v613_v41 = vsel %vm3183_vm11, %v608_v29, %v612_v9  ;;  %v620_v43 = vrot.slane %v618_v36, 5  ;;  %487 = vst [vmem:[#allocation2 + $0x30] sm:$0xf] %v486_v47  ;;  %v744_v2 = vsel %vm3165_vm9, %v2463_v48, %v743_v52  ;;  %v2940_v36 = vld [vmem:[%s3502_s3 + $0x1b8] sm:$0xff]  }
  0x40   : > { %2737 = vmatprep.subr.bf16.mxu0 %v2921_v50  ;;  %2781 = vmatprep.subr.bf16.mxu1 %v2925_v60  ;;  %v2456_v46 = vcombine.low %v599_v28, %v613_v41  ;;  %v299_v50 = vmul.f32 %v2625_v40, %v3118_v32  ;;  %v489_v60 = vsel %vm3148_vm5, %v415_v38, %v488_v56  ;;  %v2936_v32 = vld [vmem:[%s3502_s3 + $0x1b0] sm:$0xff]   ;;  %v626_v12 = vrot.slane %v624_v62, 5  ;;  %v2939_v28 = vld [vmem:[%s3502_s3 + $0x1f8] sm:$0xff]   ;;  %v497_v41 = vld [vmem:[#allocation2 + $0x40] sm:$0xf] }
  0x41   : > { %v621_v61 = vor.u32 %v620_v43, %v617_v42  ;;  %490 = vst [vmem:[#allocation2 + $0x34] sm:$0x1] %v489_v60  ;;  %v323_v13 = vmax.f32 %v315_v63, 0.0  ;;  %v2941_v43 = vld [vmem:[%s3502_s3 + $0x170] sm:$0xff]  }
  0x42   : > { %1966 = vmatprep.mubr.bf16.mxu0 %v2456_v46  ;;  %v314_v58 = vadd.f32 %v3123_v35, %v299_v50  ;;  %v1082_v63 = vld [vmem:[#allocation2 + $0x10] sm:$0xf] }
  0x43   : > { %2738 = vmatpush3.bf16.msra.mxu0 %v2924_v10  ;;  %2782 = vmatpush3.bf16.msra.mxu1 %v2926_v16  ;;  %v700_v0 = vld [vmem:[#allocation2 + $0x28] sm:$0xe]  ;;  %v622_v11 = vrot.slane %v621_v61, 4  ;;  %v2602_v20 = vpack.c.bf16 %v323_v13, %v323_v13 }
  0x44   : > { %2739 = vmatprep.subr.bf16.mxu0 %v2927_v17  ;;  %2783 = vmatprep.subr.bf16.mxu1 %v2929_v18  ;;  %v701_v1 = vld [vmem:[#allocation2 + $0x2c] sm:$0x1]  ;;  %v2464_v3 = vrot.slane %v700_v0, 9  ;;  %v549_v5 = vld [vmem:[#allocation2 + $0x28] sm:$0xf]  ;;  %v322_v35 = vmax.f32 %v314_v58, 0.0 }
  0x45   : > { %1967 = vmatmul.mubr.bf16.gmra.mrb[4].mxu0 %v2922_v30  ;;  %v747_v4 = vrot.slane %v701_v1, 5  ;;  %v550_v6 = vld [vmem:[#allocation2 + $0x2c] sm:$0x1]  ;;  %v629_v7 = vshrl.u32 %v549_v5, 16  ;;  %v632_v8 = vshll.u32 %v549_v5, 16  ;;  %v425_v29 = vshrl.u32 %v2602_v20, 16 }
  0x46   : > { %v638_v9 = vshll.u32 %v550_v6, 16  ;;  %v2923_v15 = vld [vmem:[#allocation2 + $0x28] ss:$8 sps:$4 sm:$0xff]   ;;  %v2601_v19 = vpack.c.bf16 %v322_v35, %v322_v35  ;;  %v428_v30 = vshll.u32 %v2602_v20, 16  ;;  %v627_v37 = vsel %vm3183_vm11, %v622_v11, %v626_v12 }
  0x47   : > { %2740 = vmatpush3.bf16.msra.mxu0 %v2928_v33  ;;  %2784 = vmatpush3.bf16.msra.mxu1 %v2930_v39  ;;  %v748_v10 = vsel %vm3165_vm9, %v2464_v3, %v747_v4  ;;  %v631_v17 = vrot.slane %v629_v7, 4  ;;  %v634_v18 = vrot.slane %v632_v8, 5  ;;  %v3296_v27 = vld [vmem:[#allocation2 + $0x30] sm:$0xe]  ;;  %v494_v33 = vld [vmem:[#allocation2 + $0x3c] sm:$0x1] }
  0x48   : > { %2741 = vmatprep.subr.bf16.mxu0 %v2931_v44  ;;  %2785 = vmatprep.subr.bf16.mxu1 %v2935_v51  ;;  %v2469_v16 = vcombine.low %v744_v2, %v748_v10  ;;  %v640_v23 = vrot.slane %v638_v9, 5  ;;  %v417_v24 = vshrl.u32 %v2601_v19, 16  ;;  %v420_v26 = vshll.u32 %v2601_v19, 16  ;;  %v3301_v34 = vld [vmem:[#allocation2 + $0x34] sm:$0x1] }
  0x49   : > { %2039 = vmatprep.mubr.bf16.mxu1 %v2923_v15  ;;  %v635_v22 = vor.u32 %v634_v18, %v631_v17  ;;  %v2932_v39 = vld [vmem:[#allocation2 + $0x20] ss:$8 sps:$4 sm:$0xff]   ;;  %v3308_v42 = vrot.slane %v425_v29, 7  ;;  %v551_v47 = vld [vmem:[#allocation2 + $0x30] sm:$0xf]  ;;  %v2465_v52 = vrot.slane %v3296_v27, 9 }
  0x4a   : > { %2040 = vmatmul.mubr.bf16.gmra.mrb[8].mxu1 %v2469_v16  ;;  %v419_v40 = vrot.slane %v417_v24, 7  ;;  %v552_v48 = vld [vmem:[#allocation2 + $0x34] sm:$0x1]  ;;  %v643_v53 = vshrl.u32 %v551_v47, 16  ;;  %v751_v58 = vrot.slane %v3301_v34, 5  ;;  %v646_v60 = vshll.u32 %v551_v47, 16 }
  0x4b   : > { %2742 = vmatpush3.bf16.msra.mxu0 %v2934_v55  ;;  %2786 = vmatpush3.bf16.msra.mxu1 %v2936_v32  ;;  %v636_v38 = vrot.slane %v635_v22, 4  ;;  %v430_v51 = vor.u32 %v428_v30, %v3308_v42  ;;  %v652_v62 = vshll.u32 %v552_v48, 16  ;;  %v3330_v32 = vld [vmem:[%s3502_s3 + $0x200] sm:$0xff]   ;;  %v1083_v2 = vld [vmem:[#allocation2 + $0x14] sm:$0x1]  ;;  %v1099_v5 = vshrl.u32 %v1082_v63, 16 }
  0x4c   : > { %2743 = vmatprep.subr.bf16.mxu0 %v2937_v14  ;;  %2787 = vmatprep.subr.bf16.mxu1 %v2939_v28  ;;  %v422_v45 = vor.u32 %v420_v26, %v419_v40  ;;  %v423_v46 = vrot.slane %v419_v40, 4  ;;  %v645_v0 = vrot.slane %v643_v53, 4  ;;  %v648_v1 = vrot.slane %v646_v60, 5  ;;  %v1084_v3 = vld [vmem:[#allocation2 + $0x18] sm:$0xf] }
  0x4d   : > { %v641_v44 = vsel %vm3183_vm11, %v636_v38, %v640_v23  ;;  %v498_v61 = vsel %vm3142_vm4, %v430_v51, %v497_v41  ;;  %v1085_v4 = vld [vmem:[#allocation2 + $0x1c] sm:$0x1]  ;;  %v1102_v6 = vshll.u32 %v1082_v63, 16  ;;  %v1108_v7 = vshll.u32 %v1083_v2, 16  ;;  %v962_v47 = vld [vmem:[#allocation2 + $0xc] sm:$0x1] }
  0x4e   : > { %v2457_v50 = vcombine.low %v627_v37, %v641_v44  ;;  %v492_v55 = vsel %vm3142_vm4, %v422_v45, %v491_v31  ;;  %v495_v56 = vsel %vm3148_vm5, %v423_v46, %v494_v33  ;;  %499 = vst [vmem:[#allocation2 + $0x40] sm:$0xf] %v498_v61  ;;  %v1113_v57 = vshrl.u32 %v1084_v3, 16  ;;  %v2946_v16 = vld [vmem:[%s3502_s3 + $0x178] sm:$0xff]   ;;  %v961_v46 = vld [vmem:[#allocation2 + $0x8] sm:$0xe] }
  0x4f   : > { %2744 = vmatpush3.bf16.msra.mxu0 %v2938_v21  ;;  %2788 = vmatpush3.bf16.msra.mxu1 %v2940_v36  ;;  %493 = vst [vmem:[#allocation2 + $0x38] sm:$0xf] %v492_v55  ;;  %496 = vst [vmem:[#allocation2 + $0x3c] sm:$0x1] %v495_v56  ;;  %v1116_v8 = vshll.u32 %v1084_v3, 16  ;;  %v1122_v9 = vshll.u32 %v1085_v4, 16  ;;  %v752_v22 = vsel %vm3165_vm9, %v2465_v52, %v751_v58 }
  0x50   : > { %2745 = vmatprep.subr.bf16.mxu0 %v2941_v43  ;;  %1974 = vmatprep.mubr.bf16.mxu0 %v2457_v50  ;;  %v3333_v35 = vrot.slane %v652_v62, 5  ;;  %v1101_v10 = vrot.slane %v1099_v5, 4  ;;  %v1104_v11 = vrot.slane %v1102_v6, 5  ;;  %v1115_v12 = vrot.slane %v1113_v57, 4  ;;  %v2947_v34 = vld [vmem:[%s3502_s3 + $0x138] sm:$0xff]  }
  0x51   : > { %1975 = vmatmul.mubr.bf16.gmra.mrb[8].mxu0 %v2932_v39  ;;  %2849 = vmatprep.subr.bf16.mxu1 %v3330_v32  ;;  %v1110_v13 = vrot.slane %v1108_v7, 5  ;;  %v1118_v14 = vrot.slane %v1116_v8, 5  ;;  %v1124_v15 = vrot.slane %v1122_v9, 5  ;;  %v649_v26 = vor.u32 %v648_v1, %v645_v0  ;;  %v963_v50 = vld [vmem:[#allocation2 + $0x10] sm:$0xe] }
  0x52   : > { %v1105_v19 = vor.u32 %v1104_v11, %v1101_v10  ;;  %v964_v51 = vld [vmem:[#allocation2 + $0x14] sm:$0x1]  ;;  %v2479_v52 = vrot.slane %v961_v46, 9  ;;  %v995_v53 = vrot.slane %v962_v47, 5  ;;  %v2944_v55 = vld [vmem:[#allocation2 + $0x10] ss:$8 sps:$4 sm:$0xff]  }
  0x53   : > { %2746 = vmatpush3.bf16.msra.mxu0 %v2943_v49  ;;  %v1119_v20 = vor.u32 %v1118_v14, %v1115_v12  ;;  %v650_v39 = vrot.slane %v649_v26, 4  ;;  %v2480_v56 = vrot.slane %v963_v50, 9  ;;  %v999_v58 = vrot.slane %v964_v51, 5  ;;  %v813_v60 = vld [vmem:[#allocation2 + $0x8] sm:$0xf] }
  0x54   : > { %2747 = vmatprep.subr.bf16.mxu0 %v2946_v16  ;;  %v1106_v37 = vrot.slane %v1105_v19, 4  ;;  %v814_v61 = vld [vmem:[#allocation2 + $0xc] sm:$0x1]  ;;  %v996_v1 = vsel %vm3165_vm9, %v2479_v52, %v995_v53  ;;  %v815_v2 = vld [vmem:[#allocation2 + $0x10] sm:$0xf]  ;;  %v830_v4 = vshrl.u32 %v813_v60, 16 }
  0x55   : > { %v1120_v38 = vrot.slane %v1119_v20, 4  ;;  %v655_v62 = vsel %vm3183_vm11, %v650_v39, %v3333_v35  ;;  %v816_v3 = vld [vmem:[#allocation2 + $0x14] sm:$0x1]  ;;  %v1000_v5 = vsel %vm3165_vm9, %v2480_v56, %v999_v58  ;;  %v833_v6 = vshll.u32 %v813_v60, 16  ;;  %v1086_v8 = vld [vmem:[#allocation2 + $0x20] sm:$0xf] }
  0x56   : > { %v704_v17 = vld [vmem:[#allocation2 + $0x38] sm:$0xe]  ;;  %v705_v18 = vld [vmem:[#allocation2 + $0x3c] sm:$0x1]  ;;  %v1111_v44 = vsel %vm3183_vm11, %v1106_v37, %v1110_v13  ;;  %v839_v7 = vshll.u32 %v814_v61, 16  ;;  %v844_v57 = vshrl.u32 %v815_v2, 16  ;;  %v2487_v35 = vcombine.low %v996_v1, %v1000_v5 }
  0x57   : > { %v2933_v21 = vld [vmem:[#allocation2 + $0x38] ss:$8 sps:$4 sm:$0xff]   ;;  %v2466_v23 = vrot.slane %v704_v17, 9  ;;  %v755_v24 = vrot.slane %v705_v18, 5  ;;  %v554_v28 = vld [vmem:[#allocation2 + $0x3c] sm:$0x1]  ;;  %2748 = vmatpush3.bf16.msra.mxu0 %v2947_v34  ;;  %v1125_v45 = vsel %vm3183_vm11, %v1120_v38, %v1124_v15 }
  0x58   : > { %v553_v27 = vld [vmem:[#allocation2 + $0x38] sm:$0xf]  ;;  %2047 = vmatprep.mubr.bf16.mxu1 %v2933_v21  ;;  %v666_v33 = vshll.u32 %v554_v28, 16  ;;  %2825 = vmatprep.subr.bf16.mxu0 %v3330_v32  ;;  %v2495_v49 = vcombine.low %v1111_v44, %v1125_v45  ;;  %v832_v10 = vrot.slane %v830_v4, 4  ;;  %v847_v11 = vshll.u32 %v815_v2, 16  ;;  %v3362_v15 = vld [vmem:[%s3502_s3 + $0x208] sm:$0xff]  }
  0x59   : > { %v756_v29 = vsel %vm3165_vm9, %v2466_v23, %v755_v24  ;;  %v657_v30 = vshrl.u32 %v553_v27, 16  ;;  %v660_v31 = vshll.u32 %v553_v27, 16  ;;  %v2942_v0 = vld [vmem:[#allocation2 + $0x30] ss:$8 sps:$4 sm:$0xff]   ;;  %v1087_v12 = vld [vmem:[#allocation2 + $0x24] sm:$0x1] }
  0x5a   : > { %v2470_v36 = vcombine.low %v752_v22, %v756_v29  ;;  %v668_v43 = vrot.slane %v666_v33, 5  ;;  %v1088_v13 = vld [vmem:[#allocation2 + $0x28] sm:$0xf]  ;;  %v835_v16 = vrot.slane %v833_v6, 5  ;;  %v841_v17 = vrot.slane %v839_v7, 5  ;;  %v3368_v34 = vld [vmem:[%s3502_s3 + $0x210] sm:$0xff]  }
  0x5b   : > { %v659_v40 = vrot.slane %v657_v30, 4  ;;  %v662_v41 = vrot.slane %v660_v31, 5  ;;  %v846_v18 = vrot.slane %v844_v57, 4  ;;  %v1089_v19 = vld [vmem:[#allocation2 + $0x2c] sm:$0x1]  ;;  %v849_v20 = vrot.slane %v847_v11, 5 }
  0x5c   : > { %2048 = vmatmul.mubr.bf16.gmra.mrb[12].mxu1 %v2470_v36  ;;  %v853_v21 = vshll.u32 %v816_v3, 16  ;;  %v1127_v22 = vshrl.u32 %v1086_v8, 16  ;;  %v1130_v23 = vshll.u32 %v1086_v8, 16  ;;  %v836_v24 = vor.u32 %v835_v16, %v832_v10  ;;  %v965_v46 = vld [vmem:[#allocation2 + $0x18] sm:$0xe] }
  0x5d   : > { %v663_v48 = vor.u32 %v662_v41, %v659_v40  ;;  %2153 = vmatprep.mubr.bf16.mxu1 %v2495_v49  ;;  %v1136_v26 = vshll.u32 %v1087_v12, 16  ;;  %v1141_v27 = vshrl.u32 %v1088_v13, 16  ;;  %v1144_v28 = vshll.u32 %v1088_v13, 16  ;;  %v966_v47 = vld [vmem:[#allocation2 + $0x1c] sm:$0x1] }
  0x5e   : > { %v850_v29 = vor.u32 %v849_v20, %v846_v18  ;;  %v855_v30 = vrot.slane %v853_v21, 5  ;;  %v1129_v31 = vrot.slane %v1127_v22, 4  ;;  %v1132_v33 = vrot.slane %v1130_v23, 5  ;;  %v967_v51 = vld [vmem:[#allocation2 + $0x20] sm:$0xe]  ;;  %v3380_v58 = vld [vmem:[%s3502_s3 + $0x218] sm:$0xff]  }
  0x5f   : > { %v664_v63 = vrot.slane %v663_v48, 4  ;;  %v837_v36 = vrot.slane %v836_v24, 4  ;;  %v1138_v37 = vrot.slane %v1136_v26, 5  ;;  %v1143_v38 = vrot.slane %v1141_v27, 4  ;;  %v968_v52 = vld [vmem:[#allocation2 + $0x24] sm:$0x1] }
  0x60   : > { %v1146_v39 = vrot.slane %v1144_v28, 5  ;;  %v851_v40 = vrot.slane %v850_v29, 4  ;;  %v1133_v41 = vor.u32 %v1132_v33, %v1129_v31  ;;  %v2949_v56 = vld [vmem:[#allocation2 + $0x20] ss:$8 sps:$4 sm:$0xff]   ;;  %v2481_v60 = vrot.slane %v965_v46, 9 }
  0x61   : > { %v669_v9 = vsel %vm3183_vm11, %v664_v63, %v668_v43  ;;  %v1150_v43 = vshll.u32 %v1089_v19, 16  ;;  %v842_v44 = vsel %vm3183_vm11, %v837_v36, %v841_v17  ;;  %v1003_v61 = vrot.slane %v966_v47, 5  ;;  %v818_v2 = vld [vmem:[#allocation2 + $0x1c] sm:$0x1]  ;;  %v819_v3 = vld [vmem:[#allocation2 + $0x20] sm:$0xf] }
  0x62   : > { %v2458_v14 = vcombine.low %v655_v62, %v669_v9  ;;  %v1147_v45 = vor.u32 %v1146_v39, %v1143_v38  ;;  %v856_v48 = vsel %vm3183_vm11, %v851_v40, %v855_v30  ;;  %v1134_v49 = vrot.slane %v1133_v41, 4  ;;  %v817_v62 = vld [vmem:[#allocation2 + $0x18] sm:$0xf]  ;;  %v820_v6 = vld [vmem:[#allocation2 + $0x24] sm:$0x1]  ;;  %v3405_v39 = vld [vmem:[%s3502_s3 + $0x228] sm:$0xff]  }
  0x63   : > { %v1152_v50 = vrot.slane %v1150_v43, 5  ;;  %v2475_v53 = vcombine.low %v842_v44, %v856_v48  ;;  %v1007_v1 = vrot.slane %v968_v52, 5  ;;  %v1004_v5 = vsel %vm3165_vm9, %v2481_v60, %v1003_v61  ;;  %v1090_v8 = vld [vmem:[#allocation2 + $0x30] sm:$0xf]  ;;  %v1091_v12 = vld [vmem:[#allocation2 + $0x34] sm:$0x1] }
  0x64   : > { %1982 = vmatprep.mubr.bf16.mxu0 %v2458_v14  ;;  %2154 = vmatmul.mubr.bf16.vlgmr.msra.gmra.mrb[16].mxu1 %v2944_v55  ;;  %v1148_v55 = vrot.slane %v1147_v45, 4  ;;  %v1139_v63 = vsel %vm3183_vm11, %v1134_v49, %v1138_v37  ;;  %v858_v7 = vshrl.u32 %v817_v62, 16  ;;  %v861_v57 = vshll.u32 %v817_v62, 16  ;;  %v1092_v13 = vld [vmem:[#allocation2 + $0x38] sm:$0xf]  ;;  %v3396_v20 = vld [vmem:[%s3502_s3 + $0x220] sm:$0xff]  }
  0x65   : > { %1983 = vmatmul.mubr.bf16.gmra.mrb[12].mxu0 %v2942_v0  ;;  %2857 = vmatpush3.bf16.msra.mxu1 %v3330_v32  ;;  %v2482_v0 = vrot.slane %v967_v51, 9  ;;  %v867_v10 = vshll.u32 %v818_v2, 16  ;;  %v872_v11 = vshrl.u32 %v819_v3, 16  ;;  %v875_v18 = vshll.u32 %v819_v3, 16  ;;  %v1093_v19 = vld [vmem:[#allocation2 + $0x3c] sm:$0x1] }
  0x66   : > { %2850 = vmatprep.subr.bf16.mxu1 %v3362_v15  ;;  %2088 = vmatprep.mubr.bf16.mxu0 %v2487_v35  ;;  %v1153_v4 = vsel %vm3183_vm11, %v1148_v55, %v1152_v50  ;;  %v860_v16 = vrot.slane %v858_v7, 4  ;;  %v863_v17 = vrot.slane %v861_v57, 5  ;;  %v881_v23 = vshll.u32 %v820_v6, 16  ;;  %v969_v50 = vld [vmem:[#allocation2 + $0x28] sm:$0xe] }
  0x67   : > { %v2496_v9 = vcombine.low %v1139_v63, %v1153_v4  ;;  %v1008_v35 = vsel %vm3165_vm9, %v2482_v0, %v1007_v1  ;;  %v869_v21 = vrot.slane %v867_v10, 5  ;;  %v874_v22 = vrot.slane %v872_v11, 4  ;;  %v970_v51 = vld [vmem:[#allocation2 + $0x2c] sm:$0x1]  ;;  %v971_v55 = vld [vmem:[#allocation2 + $0x30] sm:$0xe] }
  0x68   : > { %v2488_v14 = vcombine.low %v1004_v5, %v1008_v35  ;;  %v1155_v24 = vshrl.u32 %v1090_v8, 16  ;;  %v877_v26 = vrot.slane %v875_v18, 5  ;;  %v1158_v27 = vshll.u32 %v1090_v8, 16  ;;  %v2952_v63 = vld [vmem:[#allocation2 + $0x30] ss:$8 sps:$4 sm:$0xff]  }
  0x69   : > { %2858 = vmatpush3.bf16.msra.mxu1 %v3362_v15  ;;  %2161 = vmatprep.mubr.bf16.mxu1 %v2496_v9  ;;  %v1164_v28 = vshll.u32 %v1091_v12, 16  ;;  %v1169_v30 = vshrl.u32 %v1092_v13, 16  ;;  %v1172_v31 = vshll.u32 %v1092_v13, 16  ;;  %v883_v37 = vrot.slane %v881_v23, 5  ;;  %v821_v2 = vld [vmem:[#allocation2 + $0x28] sm:$0xf] }
  0x6a   : > { %2851 = vmatprep.subr.bf16.mxu1 %v3368_v34  ;;  %v1157_v29 = vrot.slane %v1155_v24, 4  ;;  %v878_v36 = vor.u32 %v877_v26, %v874_v22  ;;  %v1160_v38 = vrot.slane %v1158_v27, 5  ;;  %v431_v40 = vrot.slane %v3308_v42, 4  ;;  %v3415_v42 = vld [vmem:[%s3502_s3 + $0x230] sm:$0xff]   ;;  %v822_v5 = vld [vmem:[#allocation2 + $0x2c] sm:$0x1] }
  0x6b   : > { %v1171_v41 = vrot.slane %v1169_v30, 4  ;;  %v1174_v43 = vrot.slane %v1172_v31, 5  ;;  %v1178_v44 = vshll.u32 %v1093_v19, 16  ;;  %v1166_v47 = vrot.slane %v1164_v28, 5  ;;  %v823_v6 = vld [vmem:[#allocation2 + $0x30] sm:$0xf] }
  0x6c   : > { %2162 = vmatmul.mubr.bf16.gmra.mrb[20].mxu1 %v2949_v56  ;;  %v879_v45 = vrot.slane %v878_v36, 4  ;;  %v1161_v46 = vor.u32 %v1160_v38, %v1157_v29  ;;  %v972_v56 = vld [vmem:[#allocation2 + $0x34] sm:$0x1]  ;;  %v2483_v60 = vrot.slane %v969_v50, 9  ;;  %v1011_v0 = vrot.slane %v970_v51, 5 }
  0x6d   : > { %2089 = vmatmul.mubr.bf16.vlgmr.msra.gmra.mrb[16].mxu0 %v2475_v53  ;;  %2859 = vmatpush3.bf16.msra.mxu1 %v3368_v34  ;;  %v1175_v48 = vor.u32 %v1174_v43, %v1171_v41  ;;  %v1180_v49 = vrot.slane %v1178_v44, 5  ;;  %v2484_v1 = vrot.slane %v971_v55, 9  ;;  %v1015_v4 = vrot.slane %v972_v56, 5  ;;  %v824_v8 = vld [vmem:[#allocation2 + $0x34] sm:$0x1] }
  0x6e   : > { %2826 = vmatpush3.bf16.msra.mxu0 %v3330_v32  ;;  %2852 = vmatprep.subr.bf16.mxu1 %v3380_v58  ;;  %v864_v32 = vor.u32 %v863_v17, %v860_v16  ;;  %v884_v52 = vsel %vm3183_vm11, %v879_v45, %v883_v37  ;;  %v1162_v53 = vrot.slane %v1161_v46, 4  ;;  %v1012_v57 = vsel %vm3165_vm9, %v2483_v60, %v1011_v0  ;;  %v500_v10 = vld [vmem:[#allocation2 + $0x44] sm:$0x1]  ;;  %v1094_v16 = vld [vmem:[#allocation2 + $0x40] sm:$0xf] }
  0x6f   : > { %2827 = vmatprep.subr.bf16.mxu0 %v3362_v15  ;;  %2096 = vmatprep.mubr.bf16.mxu0 %v2488_v14  ;;  %v1176_v62 = vrot.slane %v1175_v48, 4  ;;  %v889_v9 = vshll.u32 %v821_v2, 16  ;;  %v895_v35 = vshll.u32 %v822_v5, 16  ;;  %v1016_v12 = vsel %vm3165_vm9, %v2484_v1, %v1015_v4  ;;  %v1096_v17 = vld [vmem:[#allocation2 + $0x48] sm:$0xf] }
  0x70   : > { %v865_v33 = vrot.slane %v864_v32, 4  ;;  %v1167_v3 = vsel %vm3183_vm11, %v1162_v53, %v1166_v47  ;;  %v900_v14 = vshrl.u32 %v823_v6, 16  ;;  %v2489_v18 = vcombine.low %v1012_v57, %v1016_v12  ;;  %v1097_v23 = vld [vmem:[#allocation2 + $0x4c] sm:$0x1]  ;;  %v973_v47 = vld [vmem:[#allocation2 + $0x38] sm:$0xe] }
  0x71   : > { %2860 = vmatpush3.bf16.msra.mxu1 %v3380_v58  ;;  %v1181_v7 = vsel %vm3183_vm11, %v1176_v62, %v1180_v49  ;;  %v891_v19 = vrot.slane %v889_v9, 5  ;;  %v903_v22 = vshll.u32 %v823_v6, 16  ;;  %v909_v32 = vshll.u32 %v824_v8, 16  ;;  %v975_v50 = vld [vmem:[#allocation2 + $0x40] sm:$0xe] }
  0x72   : > { %2828 = vmatpush3.bf16.msra.mxu0 %v3362_v15  ;;  %2853 = vmatprep.subr.bf16.mxu1 %v3396_v20  ;;  %v870_v15 = vsel %vm3183_vm11, %v865_v33, %v869_v21  ;;  %v2497_v11 = vcombine.low %v1167_v3, %v1181_v7  ;;  %v897_v21 = vrot.slane %v895_v35, 5  ;;  %v902_v24 = vrot.slane %v900_v14, 4  ;;  %v825_v60 = vld [vmem:[#allocation2 + $0x38] sm:$0xf]  ;;  %v826_v4 = vld [vmem:[#allocation2 + $0x3c] sm:$0x1] }
  0x73   : > { %2829 = vmatprep.subr.bf16.mxu0 %v3368_v34  ;;  %v2476_v61 = vcombine.low %v870_v15, %v884_v52  ;;  %v501_v26 = vsel %vm3148_vm5, %v431_v40, %v500_v10  ;;  %v1183_v27 = vshrl.u32 %v1094_v16, 16  ;;  %v905_v29 = vrot.slane %v903_v22, 5  ;;  %v827_v5 = vld [vmem:[#allocation2 + $0x40] sm:$0xf] }
  0x74   : > { %2169 = vmatprep.mubr.bf16.mxu1 %v2497_v11  ;;  %502 = vst [vmem:[#allocation2 + $0x44] sm:$0x1] %v501_v26  ;;  %v1186_v30 = vshll.u32 %v1094_v16, 16  ;;  %v1197_v31 = vshrl.u32 %v1096_v17, 16  ;;  %v911_v33 = vrot.slane %v909_v32, 5  ;;  %v1200_v37 = vshll.u32 %v1096_v17, 16 }
  0x75   : > { %2861 = vmatpush3.bf16.msra.mxu1 %v3396_v20  ;;  %2097 = vmatmul.mubr.bf16.gmra.mrb[20].mxu0 %v2476_v61  ;;  %v1185_v36 = vrot.slane %v1183_v27, 4  ;;  %v1206_v38 = vshll.u32 %v1097_v23, 16  ;;  %v906_v43 = vor.u32 %v905_v29, %v902_v24  ;;  %v2485_v51 = vrot.slane %v973_v47, 9  ;;  %v2955_v35 = vld [vmem:[#allocation2 + $0x40] ss:$8 sps:$4 sm:$0xff]  }
  0x76   : > { %2830 = vmatpush3.bf16.msra.mxu0 %v3368_v34  ;;  %2854 = vmatprep.subr.bf16.mxu1 %v3405_v39  ;;  %v886_v34 = vshrl.u32 %v821_v2, 16  ;;  %v1188_v59 = vrot.slane %v1186_v30, 5  ;;  %v1199_v40 = vrot.slane %v1197_v31, 4  ;;  %v1202_v44 = vrot.slane %v1200_v37, 5  ;;  %v1240_v24 = vld [vmem:[#allocation2 + $0x38] sm:$0xe] }
  0x77   : > { %2831 = vmatprep.subr.bf16.mxu0 %v3380_v58  ;;  %2170 = vmatmul.mubr.bf16.gmra.mrb[24].mxu1 %v2952_v63  ;;  %v907_v45 = vrot.slane %v906_v43, 4  ;;  %v1208_v49 = vrot.slane %v1206_v38, 5  ;;  %v2486_v56 = vrot.slane %v975_v50, 9  ;;  %v914_v1 = vshrl.u32 %v825_v60, 16  ;;  %v1241_v32 = vld [vmem:[#allocation2 + $0x3c] sm:$0x1] }
  0x78   : > { %v888_v13 = vrot.slane %v886_v34, 4  ;;  %2104 = vmatprep.mubr.bf16.mxu0 %v2489_v18  ;;  %v1189_v46 = vor.u32 %v1188_v59, %v1185_v36  ;;  %v1203_v48 = vor.u32 %v1202_v44, %v1199_v40  ;;  %v917_v57 = vshll.u32 %v825_v60, 16  ;;  %v1242_v29 = vld [vmem:[#allocation2 + $0x40] sm:$0xe]  ;;  %v1244_v38 = vld [vmem:[#allocation2 + $0x48] sm:$0xe] }
  0x79   : > { %2862 = vmatpush3.bf16.msra.mxu1 %v3405_v39  ;;  %v912_v52 = vsel %vm3183_vm11, %v907_v45, %v911_v33  ;;  %v916_v7 = vrot.slane %v914_v1, 4  ;;  %v923_v8 = vshll.u32 %v826_v4, 16  ;;  %v928_v11 = vshrl.u32 %v827_v5, 16  ;;  %v1245_v43 = vld [vmem:[#allocation2 + $0x4c] sm:$0x1] }
  0x7a   : > { %2832 = vmatpush3.bf16.msra.mxu0 %v3380_v58  ;;  %2855 = vmatprep.subr.bf16.mxu1 %v3415_v42  ;;  %v3437_v58 = vld [vmem:[%s3502_s3 + $0x238] sm:$0xff]   ;;  %v892_v28 = vor.u32 %v891_v19, %v888_v13  ;;  %v1190_v53 = vrot.slane %v1189_v46, 4  ;;  %v1204_v63 = vrot.slane %v1203_v48, 4  ;;  %v931_v12 = vshll.u32 %v827_v5, 16  ;;  %v1238_v13 = vld [vmem:[#allocation2 + $0x30] sm:$0xe] }
  0x7b   : > { %2833 = vmatprep.subr.bf16.mxu0 %v3396_v20  ;;  %v1095_v62 = vld [vmem:[#allocation2 + $0x44] sm:$0x1]  ;;  %v919_v16 = vrot.slane %v917_v57, 5  ;;  %v925_v17 = vrot.slane %v923_v8, 5  ;;  %v1239_v19 = vld [vmem:[#allocation2 + $0x34] sm:$0x1] }
  0x7c   : > { %v893_v41 = vrot.slane %v892_v28, 4  ;;  %v976_v0 = vld [vmem:[#allocation2 + $0x44] sm:$0x1]  ;;  %v1209_v6 = vsel %vm3183_vm11, %v1204_v63, %v1208_v49  ;;  %v930_v22 = vrot.slane %v928_v11, 4  ;;  %v933_v23 = vrot.slane %v931_v12, 5 }
  0x7d   : > { %2863 = vmatpush3.bf16.msra.mxu1 %v3415_v42  ;;  %v1023_v3 = vrot.slane %v976_v0, 5  ;;  %v828_v34 = vld [vmem:[#allocation2 + $0x44] sm:$0x1]  ;;  %v920_v27 = vor.u32 %v919_v16, %v916_v7  ;;  %v1280_v33 = vrot.slane %v1239_v19, 5  ;;  %v2504_v36 = vrot.slane %v1240_v24, 9 }
  0x7e   : > { %2834 = vmatpush3.bf16.msra.mxu0 %v3396_v20  ;;  %2856 = vmatprep.subr.bf16.mxu1 %v3437_v58  ;;  %v898_v15 = vsel %vm3183_vm11, %v893_v41, %v897_v21  ;;  %v974_v20 = vld [vmem:[#allocation2 + $0x3c] sm:$0x1]  ;;  %v937_v18 = vshll.u32 %v828_v34, 16  ;;  %v1243_v30 = vld [vmem:[#allocation2 + $0x44] sm:$0x1]  ;;  %v934_v31 = vor.u32 %v933_v23, %v930_v22  ;;  %v1284_v37 = vrot.slane %v1241_v32, 5 }
  0x7f   : > { %2835 = vmatprep.subr.bf16.mxu0 %v3405_v39  ;;  %v1019_v55 = vrot.slane %v974_v20, 5  ;;  %v2477_v61 = vcombine.low %v898_v15, %v912_v52  ;;  %v1024_v10 = vsel %vm3165_vm9, %v2486_v56, %v1023_v3  ;;  %v921_v41 = vrot.slane %v920_v27, 4  ;;  %v1230_v48 = vld [vmem:[#allocation2 + $0x10] sm:$0xe]  ;;  %v1231_v49 = vld [vmem:[#allocation2 + $0x14] sm:$0x1] }
  0x80   : > { %v939_v28 = vrot.slane %v937_v18, 5  ;;  %v2505_v59 = vrot.slane %v1242_v29, 9  ;;  %v1288_v40 = vrot.slane %v1243_v30, 5  ;;  %v2506_v44 = vrot.slane %v1244_v38, 9  ;;  %v1233_v52 = vld [vmem:[#allocation2 + $0x1c] sm:$0x1] }
  0x81   : > { %2864 = vmatpush3.bf16.msra.mxu1 %v3437_v58  ;;  %v1020_v2 = vsel %vm3165_vm9, %v2485_v51, %v1019_v55  ;;  %2105 = vmatmul.mubr.bf16.gmra.mrb[24].mxu0 %v2477_v61  ;;  %v935_v15 = vrot.slane %v934_v31, 4  ;;  %v1285_v46 = vsel %vm3165_vm9, %v2504_v36, %v1284_v37  ;;  %v1292_v47 = vrot.slane %v1245_v43, 5  ;;  %v1232_v51 = vld [vmem:[#allocation2 + $0x18] sm:$0xe]  ;;  %v1235_v63 = vld [vmem:[#allocation2 + $0x24] sm:$0x1] }
  0x82   : > { %2836 = vmatpush3.bf16.msra.mxu0 %v3405_v39  ;;  %v1192_v39 = vshll.u32 %v1095_v62, 16  ;;  %v2490_v14 = vcombine.low %v1020_v2, %v1024_v10  ;;  %v1289_v50 = vsel %vm3165_vm9, %v2505_v59, %v1288_v40  ;;  %v1264_v60 = vrot.slane %v1231_v49, 5  ;;  %v1234_v62 = vld [vmem:[#allocation2 + $0x20] sm:$0xe]  ;;  %v1236_v2 = vld [vmem:[#allocation2 + $0x28] sm:$0xe] }
  0x83   : > { %2837 = vmatprep.subr.bf16.mxu0 %v3415_v42  ;;  %v940_v55 = vsel %vm3183_vm11, %v935_v15, %v939_v28  ;;  %v1293_v56 = vsel %vm3165_vm9, %v2506_v44, %v1292_v47  ;;  %v2500_v61 = vrot.slane %v1232_v51, 9  ;;  %v1237_v3 = vld [vmem:[#allocation2 + $0x2c] sm:$0x1]  ;;  %v2501_v4 = vrot.slane %v1234_v62, 9 }
  0x84   : > { %v1194_v9 = vrot.slane %v1192_v39, 5  ;;  %2112 = vmatprep.mubr.bf16.mxu0 %v2490_v14  ;;  %v2510_v1 = vcombine.low %v1289_v50, %v1293_v56  ;;  %v1268_v39 = vrot.slane %v1233_v52, 5  ;;  %v2502_v54 = vrot.slane %v1236_v2, 9 }
  0x85   : > { %v1276_v34 = vrot.slane %v1237_v3, 5 }
  0x86   : > { %2838 = vmatpush3.bf16.msra.mxu0 %v3415_v42  ;;  %v1195_v21 = vsel %vm3183_vm11, %v1190_v53, %v1194_v9  ;;  %v2503_v42 = vrot.slane %v1238_v13, 9  ;;  %v2499_v53 = vrot.slane %v1230_v48, 9  ;;  %v1269_v7 = vsel %vm3165_vm9, %v2500_v61, %v1268_v39 }
  0x87   : > { %2839 = vmatprep.subr.bf16.mxu0 %v3437_v58  ;;  %v2498_v26 = vcombine.low %v1195_v21, %v1209_v6  ;;  %v1272_v6 = vrot.slane %v1235_v63, 5  ;;  %v1277_v9 = vsel %vm3165_vm9, %v2502_v54, %v1276_v34 }
  0x88   : > { %v1281_v45 = vsel %vm3165_vm9, %v2503_v42, %v1280_v33  ;;  %v1265_v5 = vsel %vm3165_vm9, %v2499_v53, %v1264_v60 }
  0x89   : > { %2177 = vmatprep.mubr.bf16.mxu1 %v2498_v26  ;;  %v2509_v20 = vcombine.low %v1281_v45, %v1285_v46  ;;  %v2507_v57 = vcombine.low %v1265_v5, %v1269_v7  ;;  %v1273_v8 = vsel %vm3165_vm9, %v2501_v4, %v1272_v6 }
  0x8a   : > { %2840 = vmatpush3.bf16.msra.mxu0 %v3437_v58  ;;  %2178 = vmatmul.mubr.bf16.gmra.mrb[28].mxu1 %v2955_v35  ;;  %v926_v58 = vsel %vm3183_vm11, %v921_v41, %v925_v17  ;;  %v2508_v35 = vcombine.low %v1273_v8, %v1277_v9 }
  0x8b   : > { %v2478_v0 = vcombine.low %v926_v58, %v940_v55  ;;  %2845 = vmatprep.mubr.bf16.mxu1 %v2509_v20 }
  0x8d   : > { %2113 = vmatmul.mubr.bf16.gmra.mrb[28].mxu0 %v2478_v0 }
  0x8e   : > { %2841 = vmatprep.mubr.bf16.mxu0 %v2507_v57 }
  0x92   : > { %2846 = vmatmul.mubr.bf16.vlgmr.msra.gmra.mrb[32].mxu1 %v2510_v1 }
  0x95   : > { %2842 = vmatmul.mubr.bf16.vlgmr.msra.gmra.mrb[32].mxu0 %v2508_v35 }
 0x105   : > { %v2709_v10 = vpop.f32.mrb[0].mxu1 }
 0x106   : > { %v2710_v11 = vpop.f32.mrb[1].mxu1 }
 0x107   : > { %v2711_v12 = vadd.f32 %v2710_v11, %v2709_v10  ;;  %v2712_v13 = vpop.f32.mrb[2].mxu1 }
 0x108   : > { %v2713_v14 = vpop.f32.mrb[3].mxu1 }
 0x109   : > { %v2714_v16 = vadd.f32 %v2713_v14, %v2712_v13 }
 0x10d   : > { %v2669_v17 = vpop.f32.mrb[0].mxu0  ;;  %v2715_v25 = vpop.f32.mrb[4].mxu1 }
 0x10e   : > { %v2670_v18 = vpop.f32.mrb[1].mxu0  ;;  %v2716_v26 = vpop.f32.mrb[5].mxu1 }
 0x10f   : > { %v2671_v19 = vadd.f32 %v2670_v18, %v2669_v17  ;;  %v2672_v21 = vpop.f32.mrb[2].mxu0  ;;  %v2717_v27 = vadd.f32 %v2716_v26, %v2715_v25  ;;  %v2718_v28 = vpop.f32.mrb[6].mxu1 }
 0x110   : > { %v2673_v22 = vpop.f32.mrb[3].mxu0  ;;  %v2719_v42 = vpop.f32.mrb[7].mxu1 }
 0x111   : > { %v2026_v23 = vadd.f32 %v2711_v12, %v2671_v19  ;;  %v2674_v24 = vadd.f32 %v2673_v22, %v2672_v21  ;;  %v2720_v29 = vadd.f32 %v2719_v42, %v2718_v28 }
 0x113   : > { %v2029_v32 = vadd.f32 %v2714_v16, %v2674_v24 }
 0x118   : > { %v2675_v30 = vpop.f32.mrb[4].mxu0 }
 0x119   : > { %v2676_v31 = vpop.f32.mrb[5].mxu0 }
 0x11a   : > { %v2677_v33 = vadd.f32 %v2676_v31, %v2675_v30  ;;  %v2678_v36 = vpop.f32.mrb[6].mxu0 }
 0x11b   : > { %v2679_v37 = vpop.f32.mrb[7].mxu0 }
 0x11c   : > { %v2034_v38 = vadd.f32 %v2717_v27, %v2677_v33  ;;  %v2680_v41 = vadd.f32 %v2679_v37, %v2678_v36 }
 0x11d   : > { %v2721_v59 = vpop.f32.mrb[8].mxu1 }
 0x11e   : > { %v2037_v43 = vadd.f32 %v2720_v29, %v2680_v41  ;;  %v2722_v40 = vpop.f32.mrb[9].mxu1 }
 0x11f   : > { %v2723_v44 = vadd.f32 %v2722_v40, %v2721_v59  ;;  %v2724_v15 = vpop.f32.mrb[10].mxu1 }
 0x120   : > { %v2725_v45 = vpop.f32.mrb[11].mxu1 }
 0x121   : > { %v2726_v46 = vadd.f32 %v2725_v45, %v2724_v15 }
 0x124   : > { %v2681_v47 = vpop.f32.mrb[8].mxu0 }
 0x125   : > { %v2682_v48 = vpop.f32.mrb[9].mxu0 }
 0x126   : > { %v2683_v49 = vadd.f32 %v2682_v48, %v2681_v47  ;;  %v2684_v58 = vpop.f32.mrb[10].mxu0 }
 0x127   : > { %v2685_v20 = vpop.f32.mrb[11].mxu0 }
 0x128   : > { %v2042_v50 = vadd.f32 %v2723_v44, %v2683_v49  ;;  %v2686_v51 = vadd.f32 %v2685_v20, %v2684_v58 }
 0x12a   : > { %v2045_v52 = vadd.f32 %v2726_v46, %v2686_v51 }
 0x12f   : > { %v2727_v53 = vpop.f32.mrb[12].mxu1 }
 0x130   : > { %v2728_v55 = vpop.f32.mrb[13].mxu1 }
 0x131   : > { %v2729_v56 = vadd.f32 %v2728_v55, %v2727_v53  ;;  %v2730_v60 = vpop.f32.mrb[14].mxu1 }
 0x132   : > { %v2731_v61 = vpop.f32.mrb[15].mxu1 }
 0x133   : > { %v2732_v62 = vadd.f32 %v2731_v61, %v2730_v60 }
 0x137   : > { %v2789_v63 = vpop.f32.mrb[16].mxu1 }
 0x138   : > { %v2687_v0 = vpop.f32.mrb[12].mxu0  ;;  %v2790_v1 = vpop.f32.mrb[17].mxu1 }
 0x139   : > { %v2688_v39 = vpop.f32.mrb[13].mxu0  ;;  %v2791_v2 = vadd.f32 %v2790_v1, %v2789_v63  ;;  %v2792_v3 = vpop.f32.mrb[18].mxu1 }
 0x13a   : > { %v2689_v4 = vadd.f32 %v2688_v39, %v2687_v0  ;;  %v2690_v5 = vpop.f32.mrb[14].mxu0  ;;  %v2793_v6 = vpop.f32.mrb[19].mxu1 }
 0x13b   : > { %v2691_v54 = vpop.f32.mrb[15].mxu0  ;;  %v2794_v34 = vadd.f32 %v2793_v6, %v2792_v3 }
 0x13c   : > { %v2050_v7 = vadd.f32 %v2729_v56, %v2689_v4  ;;  %v2692_v57 = vadd.f32 %v2691_v54, %v2690_v5 }
 0x13e   : > { %v2053_v8 = vadd.f32 %v2732_v62, %v2692_v57 }
 0x13f   : > { %v2795_v13 = vpop.f32.mrb[20].mxu1 }
 0x140   : > { %v2749_v9 = vpop.f32.mrb[16].mxu0  ;;  %v2796_v17 = vpop.f32.mrb[21].mxu1 }
 0x141   : > { %v2750_v35 = vpop.f32.mrb[17].mxu0  ;;  %v2797_v18 = vadd.f32 %v2796_v17, %v2795_v13  ;;  %v2798_v19 = vpop.f32.mrb[22].mxu1 }
 0x142   : > { %v2751_v10 = vadd.f32 %v2750_v35, %v2749_v9  ;;  %v2752_v11 = vpop.f32.mrb[18].mxu0  ;;  %v2799_v22 = vpop.f32.mrb[23].mxu1 }
 0x143   : > { %v2753_v12 = vpop.f32.mrb[19].mxu0  ;;  %v2800_v25 = vadd.f32 %v2799_v22, %v2798_v19 }
 0x144   : > { %v2091_v14 = vadd.f32 %v2751_v10, %v2026_v23  ;;  %v2754_v16 = vadd.f32 %v2753_v12, %v2752_v11 }
 0x146   : > { %v2094_v21 = vadd.f32 %v2754_v16, %v2029_v32  ;;  %v2156_v24 = vadd.f32 %v2791_v2, %v2091_v14 }
 0x148   : > { %v2159_v26 = vadd.f32 %v2794_v34, %v2094_v21  ;;  %v2755_v27 = vpop.f32.mrb[20].mxu0 }
 0x149   : > { %v2756_v28 = vpop.f32.mrb[21].mxu0 }
 0x14a   : > { %v2757_v42 = vadd.f32 %v2756_v28, %v2755_v27  ;;  %v2758_v29 = vpop.f32.mrb[22].mxu0  ;;  %v2801_v36 = vpop.f32.mrb[24].mxu1 }
 0x14b   : > { %v2759_v30 = vpop.f32.mrb[23].mxu0  ;;  %v2802_v37 = vpop.f32.mrb[25].mxu1 }
 0x14c   : > { %v2099_v31 = vadd.f32 %v2757_v42, %v2034_v38  ;;  %v2760_v33 = vadd.f32 %v2759_v30, %v2758_v29  ;;  %v2803_v23 = vadd.f32 %v2802_v37, %v2801_v36  ;;  %v2804_v59 = vpop.f32.mrb[26].mxu1 }
 0x14d   : > { %v2805_v44 = vpop.f32.mrb[27].mxu1 }
 0x14e   : > { %v2102_v41 = vadd.f32 %v2760_v33, %v2037_v43  ;;  %v2164_v40 = vadd.f32 %v2797_v18, %v2099_v31  ;;  %v2806_v15 = vadd.f32 %v2805_v44, %v2804_v59 }
 0x150   : > { %v2167_v32 = vadd.f32 %v2800_v25, %v2102_v41 }
 0x154   : > { %v2761_v45 = vpop.f32.mrb[24].mxu0 }
 0x155   : > { %v2762_v46 = vpop.f32.mrb[25].mxu0 }
 0x156   : > { %v2763_v47 = vadd.f32 %v2762_v46, %v2761_v45  ;;  %v2764_v48 = vpop.f32.mrb[26].mxu0 }
 0x157   : > { %v2765_v49 = vpop.f32.mrb[27].mxu0 }
 0x158   : > { %v2107_v58 = vadd.f32 %v2763_v47, %v2042_v50  ;;  %v2766_v20 = vadd.f32 %v2765_v49, %v2764_v48 }
 0x15a   : > { %v2110_v51 = vadd.f32 %v2766_v20, %v2045_v52  ;;  %v2172_v53 = vadd.f32 %v2803_v23, %v2107_v58 }
 0x15c   : > { %v2175_v56 = vadd.f32 %v2806_v15, %v2110_v51 }
 0x15d   : > { %v2807_v38 = vpop.f32.mrb[28].mxu1 }
 0x15e   : > { %v2808_v55 = vpop.f32.mrb[29].mxu1 }
 0x15f   : > { %v2809_v60 = vadd.f32 %v2808_v55, %v2807_v38  ;;  %v2810_v43 = vpop.f32.mrb[30].mxu1 }
 0x160   : > { %v2811_v61 = vpop.f32.mrb[31].mxu1  ;;  %v2767_v63 = vpop.f32.mrb[28].mxu0 }
 0x161   : > { %v2812_v62 = vadd.f32 %v2811_v61, %v2810_v43  ;;  %v2768_v0 = vpop.f32.mrb[29].mxu0 }
 0x162   : > { %v2769_v1 = vadd.f32 %v2768_v0, %v2767_v63  ;;  %v2770_v39 = vpop.f32.mrb[30].mxu0 }
 0x163   : > { %v2771_v3 = vpop.f32.mrb[31].mxu0 }
 0x164   : > { %v2115_v4 = vadd.f32 %v2769_v1, %v2050_v7  ;;  %v2772_v50 = vadd.f32 %v2771_v3, %v2770_v39 }
 0x165   : > { %v2847_v2 = vpop.f32.mrb[32].mxu1 }
 0x166   : > { %v2236_v5 = vpop.f32.mrb[33].mxu1  ;;  %v2180_v54 = vadd.f32 %v2809_v60, %v2115_v4  ;;  %v2118_v34 = vadd.f32 %v2772_v50, %v2053_v8 }
 0x167   : > { %v2237_v6 = vadd.f32 %v2236_v5, %v2172_v53  ;;  %v2848_v52 = vpop.f32.mrb[34].mxu1 }
 0x168   : > { %v2239_v57 = vpop.f32.mrb[35].mxu1  ;;  %v2245_v35 = vadd.f32 %v2847_v2, %v2180_v54  ;;  %v2183_v10 = vadd.f32 %v2812_v62, %v2118_v34  ;;  %v2843_v11 = vpop.f32.mrb[32].mxu0 }
 0x169   : > { %v2240_v9 = vadd.f32 %v2239_v57, %v2175_v56  ;;  %v2229_v13 = vadd.f32 %v2843_v11, %v2164_v40  ;;  %v2220_v14 = vpop.f32.mrb[33].mxu0  ;;  %v2309_v37 = vmul.f32 %v2237_v6, %v2237_v6 }
 0x16a   : > { %v2248_v7 = vadd.f32 %v2848_v52, %v2183_v10  ;;  %v2221_v16 = vadd.f32 %v2220_v14, %v2156_v24  ;;  %v2844_v17 = vpop.f32.mrb[34].mxu0  ;;  %v2311_v44 = vmul.f32 %v2245_v35, %v2245_v35 }
 0x16b   : > { %v2640_v12 = vpack.c.bf16 %v2240_v9, %v2237_v6  ;;  %v2232_v18 = vadd.f32 %v2844_v17, %v2167_v32  ;;  %v2223_v19 = vpop.f32.mrb[35].mxu0  ;;  %v2307_v29 = vmul.f32 %v2229_v13, %v2229_v13  ;;  %v2310_v59 = vmul.f32 %v2240_v9, %v2240_v9 }
 0x16c   : > { %v2645_v8 = vpack.c.bf16 %v2248_v7, %v2245_v35  ;;  %v2224_v21 = vadd.f32 %v2223_v19, %v2159_v26  ;;  %v2305_v25 = vmul.f32 %v2221_v16, %v2221_v16  ;;  %v2312_v45 = vmul.f32 %v2248_v7, %v2248_v7 }
 0x16d   : > { %2651 = vst [vmem:[%s262_s28 + $0x10] sm:$0xff] %v2640_v12   ;;  %v2635_v22 = vpack.c.bf16 %v2232_v18, %v2229_v13  ;;  %v2308_v33 = vmul.f32 %v2232_v18, %v2232_v18 }
 0x16e   : > { %2652 = vst [vmem:[%s262_s28 + $0x18] sm:$0xff] %v2645_v8   ;;  %v2630_v27 = vpack.c.bf16 %v2224_v21, %v2221_v16  ;;  %v2291_v28 = vadd.f32 %v2224_v21, %v2221_v16  ;;  %v2306_v42 = vmul.f32 %v2224_v21, %v2224_v21 }
 0x16f   : > { %2650 = vst [vmem:[%s262_s28 + $0x8] sm:$0xff] %v2635_v22  }
 0x170   : > { %2631 = vst [vmem:[%s262_s28] sm:$0xff] %v2630_v27   ;;  %v2292_v30 = vadd.f32 %v2291_v28, %v2229_v13  ;;  %v2313_v31 = vadd.f32 %v2306_v42, %v2305_v25 }
 0x172   : > { %v2293_v36 = vadd.f32 %v2292_v30, %v2232_v18  ;;  %v2314_v24 = vadd.f32 %v2313_v31, %v2307_v29 }
 0x174   : > { %v2294_v41 = vadd.f32 %v2293_v36, %v2237_v6  ;;  %v2315_v23 = vadd.f32 %v2314_v24, %v2308_v33 }
 0x176   : > { %v2295_v40 = vadd.f32 %v2294_v41, %v2240_v9  ;;  %v2316_v26 = vadd.f32 %v2315_v23, %v2309_v37 }
 0x178   : > { %v2296_v15 = vadd.f32 %v2295_v40, %v2245_v35  ;;  %v2317_v32 = vadd.f32 %v2316_v26, %v2310_v59 }
 0x17a   : > { %v2297_v46 = vadd.f32 %v2296_v15, %v2248_v7  ;;  %v2318_v47 = vadd.f32 %v2317_v32, %v2311_v44 }
 0x17c   : > { %v2298_v48 = vrot.slane %v2297_v46, 4  ;;  %v2319_v49 = vadd.f32 %v2318_v47, %v2312_v45 }
 0x17e   : > { %v2299_v58 = vadd.f32 %v2298_v48, %v2297_v46  ;;  %v2320_v20 = vrot.slane %v2319_v49, 4 }
 0x180   : > { %v2300_v51 = vrot.slane %v2299_v58, 2  ;;  %v2321_v53 = vadd.f32 %v2320_v20, %v2319_v49 }
 0x182   : > { %v2301_v38 = vadd.f32 %v2300_v51, %v2299_v58  ;;  %v2322_v55 = vrot.slane %v2321_v53, 2 }
 0x184   : > { %v2302_v56 = vrot.slane %v2301_v38, 1  ;;  %v2323_v60 = vadd.f32 %v2322_v55, %v2321_v53 }
 0x186   : > { %v2303_v43 = vadd.f32 %v2302_v56, %v2301_v38  ;;  %v2324_v61 = vrot.slane %v2323_v60, 1 }
 0x188   : > { %2304 = vst [vmem:[%s265_s7] sm:$0x1] %v2303_v43  ;;  %v2325_v62 = vadd.f32 %v2324_v61, %v2323_v60 }
 0x18a   : > { %2326 = vst [vmem:[%s268_s10] sm:$0x1] %v2325_v62 }
 0x18b PF: > { %s17_s21 = sadd.s32 1, %s2964_s21  }
 0x18c   : > { %p14_p4 = scmp.ge.s32.totalorder %s17_s21, 4  }
 0x18e   :  { %16 = sbr.rel (!%p14_p4) target bundleno = 1 (0x1), region = 92 }

// kernel: down_forward.3
= control target key start
LH: loop header
LB: loop body
LE: loop exit
PB: predicated region body
PF: predicated region fallthrough
CT: control target
= control target key end

     0   :  { %s4054_s15 = smov 0   ;;  %s4963_s0 = inlined_call_operand.vmem [shape: bf16[16,2,8,2,128], index: 0, kind: input, shape index: {}]   ;;  %s4964_s1 = inlined_call_operand.vmem [shape: bf16[1152,128], index: 1, kind: input, shape index: {}]   ;;  %s4965_s2 = inlined_call_operand.vmem [shape: bf16[2,64,128], index: 2, kind: output, shape index: {0}]   ;;  %s4966_s3 = inlined_call_operand.vmem [shape: f32[2,1,128], index: 3, kind: output, shape index: {1}]   ;;  %s4967_s4 = inlined_call_operand.vmem [shape: f32[2,1,128], index: 4, kind: output, shape index: {2}]  }
   0x1 LB: > { %s4060_s16 = sadd.s32 4294967295, %s4026_s15   ;;  %p3328_p0 = scmp.ge.s32.totalorder %s4026_s15, 1  ;;  %s4026_s15 = sphi %s4054_s15, %s15_s15  }
   0x2   : > { %p168_p1 = scmp.lt.s32.totalorder %s4026_s15, 3 }
   0x4   : > { %p169_p2 = pnand %p3328_p0, %p168_p1 }
   0x5   : > { %v3936_v0 = vld [vmem:[%s4964_s1 + $0xc0] sm:$0xff] (!%p169_p2)   ;;  %v3938_v2 = vld [vmem:[%s4964_s1 + $0xc8] sm:$0xff] (!%p169_p2)   ;;  %v4028_v4 = vmov (!%p169_p2), 0   ;;  %v3942_v7 = vld [vmem:[%s4964_s1 + $0xd0] sm:$0xff] (!%p169_p2)   ;;  %s3329_s21 = sshll.u32 (!%p169_p2), %s4060_s16, 3  ;;  %vm1200_vm0 = vcmask (!%p169_p2), 1042434  }
   0x6   : > { %172 = sbr.rel (%p169_p2) target bundleno = 499 (0x1f3), region = 28  ;;  %v3937_v1 = vld [vmem:[%s4964_s1 + $0x80] sm:$0xff] (!%p169_p2)   ;;  %3755 = vmatprep.subr.bf16.mxu1 (!%p169_p2), %v3936_v0  ;;  %v3939_v3 = vld [vmem:[%s4964_s1 + $0x88] sm:$0xff] (!%p169_p2)   ;;  %860 = vst [vmem:[#allocation2 + $0x8] sm:$0xf] (!%p169_p2), %v4028_v4  ;;  %v3943_v8 = vld [vmem:[%s4964_s1 + $0x90] sm:$0xff] (!%p169_p2)  }
   0x7   : > { %3756 = vmatpush3.bf16.msra.mxu1 (!%p169_p2), %v3937_v1  ;;  %862 = vst [vmem:[#allocation2 + $0x10] sm:$0xf] (!%p169_p2), %v4028_v4  ;;  %858 = vst [vmem:[#allocation2] sm:$0xf] (!%p169_p2), %v4028_v4  ;;  %v3940_v5 = vld [vmem:[%s4964_s1 + $0x40] sm:$0xff] (!%p169_p2)   ;;  %v3944_v9 = vld [vmem:[%s4964_s1 + $0x48] sm:$0xff] (!%p169_p2)  }
   0x8   : > { %859 = vst [vmem:[#allocation2 + $0x4] sm:$0x1] (!%p169_p2), %v4028_v4  ;;  %861 = vst [vmem:[#allocation2 + $0xc] sm:$0x1] (!%p169_p2), %v4028_v4  ;;  %3757 = vmatprep.subr.bf16.mxu1 (!%p169_p2), %v3938_v2  ;;  %v3941_v6 = vld [vmem:[%s4964_s1] sm:$0xff] (!%p169_p2)   ;;  %3715 = vmatprep.subr.bf16.mxu0 (!%p169_p2), %v3940_v5  ;;  %v3945_v10 = vld [vmem:[%s4964_s1 + $0x8] sm:$0xff] (!%p169_p2)  }
   0x9   : > { %863 = vst [vmem:[#allocation2 + $0x14] sm:$0x1] (!%p169_p2), %v4028_v4  ;;  %864 = vst [vmem:[#allocation2 + $0x18] sm:$0xf] (!%p169_p2), %v4028_v4  ;;  %3716 = vmatpush3.bf16.msra.mxu0 (!%p169_p2), %v3941_v6  ;;  %v3946_v11 = vld [vmem:[%s4964_s1 + $0xd8] sm:$0xff] (!%p169_p2)   ;;  %v3948_v13 = vld [vmem:[%s4964_s1 + $0x50] sm:$0xff] (!%p169_p2)  }
   0xa   : > { %865 = vst [vmem:[#allocation2 + $0x1c] sm:$0x1] (!%p169_p2), %v4028_v4  ;;  %866 = vst [vmem:[#allocation2 + $0x20] sm:$0xf] (!%p169_p2), %v4028_v4  ;;  %3717 = vmatprep.subr.bf16.mxu0 (!%p169_p2), %v3944_v9  ;;  %v3947_v12 = vld [vmem:[%s4964_s1 + $0x98] sm:$0xff] (!%p169_p2)   ;;  %v3949_v14 = vld [vmem:[%s4964_s1 + $0x10] sm:$0xff] (!%p169_p2)  }
   0xb   : > { %867 = vst [vmem:[#allocation2 + $0x24] sm:$0x1] (!%p169_p2), %v4028_v4  ;;  %868 = vst [vmem:[#allocation2 + $0x28] sm:$0xf] (!%p169_p2), %v4028_v4  ;;  %3758 = vmatpush3.bf16.msra.mxu1 (!%p169_p2), %v3939_v3  ;;  %v3950_v15 = vld [vmem:[%s4964_s1 + $0xe0] sm:$0xff] (!%p169_p2)   ;;  %v3952_v17 = vld [vmem:[%s4964_s1 + $0x58] sm:$0xff] (!%p169_p2)  }
   0xc   : > { %869 = vst [vmem:[#allocation2 + $0x2c] sm:$0x1] (!%p169_p2), %v4028_v4  ;;  %870 = vst [vmem:[#allocation2 + $0x30] sm:$0xf] (!%p169_p2), %v4028_v4  ;;  %3759 = vmatprep.subr.bf16.mxu1 (!%p169_p2), %v3942_v7  ;;  %v3951_v16 = vld [vmem:[%s4964_s1 + $0xa0] sm:$0xff] (!%p169_p2)   ;;  %p201_p3 = scmp.lt.s32.totalorder (!%p169_p2), %s3329_s21, 15 }
   0xd   : > { %871 = vst [vmem:[#allocation2 + $0x34] sm:$0x1] %v4028_v4  ;;  %872 = vst [vmem:[#allocation2 + $0x38] sm:$0xf] %v4028_v4  ;;  %3718 = vmatpush3.bf16.msra.mxu0 %v3945_v10  ;;  %v3953_v18 = vld [vmem:[%s4964_s1 + $0x18] sm:$0xff]   ;;  %v3954_v19 = vld [vmem:[%s4964_s1 + $0xe8] sm:$0xff]  }
   0xe   : > { %873 = vst [vmem:[#allocation2 + $0x3c] sm:$0x1] %v4028_v4  ;;  %874 = vst [vmem:[#allocation2 + $0x40] sm:$0xf] %v4028_v4  ;;  %3719 = vmatprep.subr.bf16.mxu0 %v3948_v13  ;;  %v3955_v20 = vld [vmem:[%s4964_s1 + $0xa8] sm:$0xff]   ;;  %v3956_v21 = vld [vmem:[%s4964_s1 + $0x60] sm:$0xff]  }
   0xf   : > { %875 = vst [vmem:[#allocation2 + $0x44] sm:$0x1] %v4028_v4  ;;  %876 = vst [vmem:[#allocation2 + $0x48] sm:$0xf] %v4028_v4  ;;  %3760 = vmatpush3.bf16.msra.mxu1 %v3943_v8  ;;  %s4977_s21 = smov (!%p201_p3, %s3329_s21), 15  ;;  %v3957_v22 = vld [vmem:[%s4964_s1 + $0x20] sm:$0xff]  }
  0x10   : > { %877 = vst [vmem:[#allocation2 + $0x4c] sm:$0x1] %v4028_v4  ;;  %3761 = vmatprep.subr.bf16.mxu1 %v3946_v11  ;;  %v3958_v23 = vld [vmem:[%s4964_s1 + $0xf0] sm:$0xff]   ;;  %v3960_v25 = vld [vmem:[%s4964_s1 + $0x68] sm:$0xff]   ;;  %s3330_s20 = sshll.u32 %s4977_s21, 4  ;;  %v3962_v27 = vld [vmem:[%s4964_s1 + $0xf8] sm:$0xff]  }
  0x11   : > { %3720 = vmatpush3.bf16.msra.mxu0 %v3949_v14  ;;  %v3959_v24 = vld [vmem:[%s4964_s1 + $0xb0] sm:$0xff]   ;;  %v3961_v26 = vld [vmem:[%s4964_s1 + $0x28] sm:$0xff]   ;;  %v3963_v28 = vld [vmem:[%s4964_s1 + $0xb8] sm:$0xff]   ;;  %s4152_s30 = scalar_lea.vmem %s4963_s0, %s3330_s20  ;;  %vm1203_vm1 = vcmask 1043459   ;;  %vm1206_vm2 = vcmask 1044484   ;;  %vm1209_vm3 = vcmask 1045509  }
  0x12   : > { %3721 = vmatprep.subr.bf16.mxu0 %v3952_v17  ;;  %v3964_v29 = vld [vmem:[%s4964_s1 + $0x70] sm:$0xff]   ;;  %v218_v31 = vld [vmem:[%s4152_s30] sm:$0x1]  ;;  %v219_v32 = vld [vmem:[%s4152_s30 + $0x1] sm:$0x1]  ;;  %vm1212_vm4 = vcmask 1046534  }
  0x13   : > { %3762 = vmatpush3.bf16.msra.mxu1 %v3947_v12  ;;  %v3965_v30 = vld [vmem:[%s4964_s1 + $0x30] sm:$0xff]   ;;  %v220_v33 = vld [vmem:[%s4152_s30 + $0x2] sm:$0x1]  ;;  %v221_v34 = vld [vmem:[%s4152_s30 + $0x3] sm:$0x1]  ;;  %v346_v37 = vunpack.c.l.bf16 %v218_v31  ;;  %v347_v41 = vunpack.c.l.bf16 %v219_v32  ;;  %vm1614_vm5 = vcmask 1042432  }
  0x14   : > { %3763 = vmatprep.subr.bf16.mxu1 %v3950_v15  ;;  %v222_v35 = vld [vmem:[%s4152_s30 + $0x4] sm:$0x1]  ;;  %v223_v36 = vld [vmem:[%s4152_s30 + $0x5] sm:$0x1]  ;;  %v224_v38 = vld [vmem:[%s4152_s30 + $0x6] sm:$0x1]  ;;  %v348_v42 = vunpack.c.l.bf16 %v220_v33  ;;  %v349_v43 = vunpack.c.l.bf16 %v221_v34 }
  0x15   : > { %3722 = vmatpush3.bf16.msra.mxu0 %v3953_v18  ;;  %v226_v39 = vld [vmem:[%s4152_s30 + $0x8] sm:$0x1]  ;;  %v227_v40 = vld [vmem:[%s4152_s30 + $0x9] sm:$0x1]  ;;  %v228_v44 = vld [vmem:[%s4152_s30 + $0xa] sm:$0x1]  ;;  %v350_v47 = vunpack.c.l.bf16 %v222_v35  ;;  %v351_v48 = vunpack.c.l.bf16 %v223_v36  ;;  %v352_v54 = vunpack.c.l.bf16 %v224_v38 }
  0x16   : > { %3723 = vmatprep.subr.bf16.mxu0 %v3956_v21  ;;  %v229_v45 = vld [vmem:[%s4152_s30 + $0xb] sm:$0x1]  ;;  %v230_v46 = vld [vmem:[%s4152_s30 + $0xc] sm:$0x1]  ;;  %v354_v49 = vunpack.c.l.bf16 %v226_v39  ;;  %v355_v50 = vunpack.c.l.bf16 %v227_v40  ;;  %v231_v51 = vld [vmem:[%s4152_s30 + $0xd] sm:$0x1]  ;;  %v356_v55 = vunpack.c.l.bf16 %v228_v44 }
  0x17   : > { %3764 = vmatpush3.bf16.msra.mxu1 %v3951_v16  ;;  %v232_v52 = vld [vmem:[%s4152_s30 + $0xe] sm:$0x1]  ;;  %v234_v53 = vld [vmem:[%s4152_s30 + $0x10] sm:$0x1]  ;;  %v357_v56 = vunpack.c.l.bf16 %v229_v45  ;;  %v358_v57 = vunpack.c.l.bf16 %v230_v46  ;;  %v235_v58 = vld [vmem:[%s4152_s30 + $0x11] sm:$0x1]  ;;  %v359_v61 = vunpack.c.l.bf16 %v231_v51 }
  0x18   : > { %3765 = vmatprep.subr.bf16.mxu1 %v3954_v19  ;;  %v236_v59 = vld [vmem:[%s4152_s30 + $0x12] sm:$0x1]  ;;  %v237_v60 = vld [vmem:[%s4152_s30 + $0x13] sm:$0x1]  ;;  %v360_v62 = vunpack.c.l.bf16 %v232_v52  ;;  %v362_v63 = vunpack.c.l.bf16 %v234_v53  ;;  %v474_v0 = vmax.f32 %v346_v37, %v354_v49  ;;  %v238_v1 = vld [vmem:[%s4152_s30 + $0x14] sm:$0x1]  ;;  %v363_v4 = vunpack.c.l.bf16 %v235_v58 }
  0x19   : > { %3724 = vmatpush3.bf16.msra.mxu0 %v3957_v22  ;;  %v239_v2 = vld [vmem:[%s4152_s30 + $0x15] sm:$0x1]  ;;  %v240_v3 = vld [vmem:[%s4152_s30 + $0x16] sm:$0x1]  ;;  %v364_v5 = vunpack.c.l.bf16 %v236_v59  ;;  %v365_v6 = vunpack.c.l.bf16 %v237_v60  ;;  %v475_v7 = vmax.f32 %v347_v41, %v355_v50  ;;  %v242_v8 = vld [vmem:[%s4152_s30 + $0x18] sm:$0x1]  ;;  %v366_v11 = vunpack.c.l.bf16 %v238_v1 }
  0x1a   : > { %3725 = vmatprep.subr.bf16.mxu0 %v3960_v25  ;;  %v243_v9 = vld [vmem:[%s4152_s30 + $0x19] sm:$0x1]  ;;  %v244_v10 = vld [vmem:[%s4152_s30 + $0x1a] sm:$0x1]  ;;  %v367_v12 = vunpack.c.l.bf16 %v239_v2  ;;  %v368_v13 = vunpack.c.l.bf16 %v240_v3  ;;  %v476_v14 = vmax.f32 %v348_v42, %v356_v55  ;;  %v245_v15 = vld [vmem:[%s4152_s30 + $0x1b] sm:$0x1]  ;;  %v370_v18 = vunpack.c.l.bf16 %v242_v8 }
  0x1b   : > { %3766 = vmatpush3.bf16.msra.mxu1 %v3955_v20  ;;  %v246_v16 = vld [vmem:[%s4152_s30 + $0x1c] sm:$0x1]  ;;  %v247_v17 = vld [vmem:[%s4152_s30 + $0x1d] sm:$0x1]  ;;  %v371_v19 = vunpack.c.l.bf16 %v243_v9  ;;  %v372_v20 = vunpack.c.l.bf16 %v244_v10  ;;  %v477_v21 = vmax.f32 %v349_v43, %v357_v56  ;;  %v248_v22 = vld [vmem:[%s4152_s30 + $0x1e] sm:$0x1] }
  0x1c   : > { %3767 = vmatprep.subr.bf16.mxu1 %v3958_v23  ;;  %v373_v23 = vunpack.c.l.bf16 %v245_v15  ;;  %v375_v25 = vunpack.c.l.bf16 %v247_v17  ;;  %v3333_v37 = vrot.slane %v474_v0, 9  ;;  %v3334_v38 = vrot.slane %v475_v7, 9  ;;  %v3967_v43 = vld [vmem:[%s4964_s1 + $0x1c0] sm:$0xff]   ;;  %v3969_v56 = vld [vmem:[%s4964_s1 + $0x78] sm:$0xff]   ;;  %p206_p4 = scmp.lt.s32.totalorder %s4060_s16, 1 }
  0x1d   : > { %3726 = vmatpush3.bf16.msra.mxu0 %v3961_v26  ;;  %v478_v26 = vmax.f32 %v350_v47, %v358_v57  ;;  %v483_v31 = vmax.f32 %v363_v4, %v371_v19  ;;  %v484_v32 = vmax.f32 %v364_v5, %v372_v20  ;;  %v3335_v39 = vrot.slane %v476_v14, 9 }
  0x1e   : > { %3727 = vmatprep.subr.bf16.mxu0 %v3964_v29  ;;  %v480_v29 = vmax.f32 %v352_v54, %v360_v62  ;;  %v485_v33 = vmax.f32 %v365_v6, %v373_v23  ;;  %v487_v35 = vmax.f32 %v367_v12, %v375_v25  ;;  %v3336_v40 = vrot.slane %v477_v21, 9  ;;  %s4979_s16 = smov (!%p206_p4, %s4060_s16), 1 }
  0x1f   : > { %3768 = vmatpush3.bf16.msra.mxu1 %v3959_v24  ;;  %v374_v24 = vunpack.c.l.bf16 %v246_v16  ;;  %v3337_v41 = vrot.slane %v478_v26, 9  ;;  %v3342_v46 = vrot.slane %v483_v31, 9  ;;  %v3343_v47 = vrot.slane %v484_v32, 9  ;;  %s3611_s25 = sshll.u32 %s4979_s16, 5  ;;  %s213_s5 = scalar_lea.vmem %s4966_s3, %s4979_s16 }
  0x20   : > { %3769 = vmatprep.subr.bf16.mxu1 %v3962_v27  ;;  %v376_v27 = vunpack.c.l.bf16 %v248_v22  ;;  %v3339_v44 = vrot.slane %v480_v29, 9  ;;  %v3346_v50 = vrot.slane %v487_v35, 9  ;;  %v794_v52 = vmax.f32 %v474_v0, %v3333_v37  ;;  %s210_s28 = scalar_lea.vmem %s4965_s2, %s3611_s25  ;;  %s216_s8 = scalar_lea.vmem %s4967_s4, %s4979_s16 }
  0x21   : > { %3728 = vmatpush3.bf16.msra.mxu0 %v3965_v30  ;;  %v482_v30 = vmax.f32 %v362_v63, %v370_v18  ;;  %v486_v34 = vmax.f32 %v366_v11, %v374_v24  ;;  %v795_v53 = vmax.f32 %v475_v7, %v3334_v38  ;;  %v796_v54 = vmax.f32 %v476_v14, %v3335_v39  ;;  %v3973_v14 = vld [vmem:[%s4964_s1 + $0x140] sm:$0xff]  }
  0x22   : > { %v488_v36 = vmax.f32 %v368_v13, %v376_v27  ;;  %v797_v55 = vmax.f32 %v477_v21, %v3336_v40  ;;  %v798_v57 = vmax.f32 %v478_v26, %v3337_v41  ;;  %v800_v59 = vmax.f32 %v480_v29, %v3339_v44  ;;  %3729 = vmatprep.subr.bf16.mxu0 %v3969_v56 }
  0x23   : > { %3770 = vmatpush3.bf16.msra.mxu1 %v3963_v28  ;;  %v479_v28 = vmax.f32 %v351_v48, %v359_v61  ;;  %v3341_v45 = vrot.slane %v482_v30, 9  ;;  %v3344_v48 = vrot.slane %v485_v33, 9  ;;  %v3345_v49 = vrot.slane %v486_v34, 9  ;;  %v3970_v61 = vld [vmem:[%s4964_s1 + $0x38] sm:$0xff]  }
  0x24   : > { %v3347_v51 = vrot.slane %v488_v36, 9  ;;  %3835 = vmatprep.subr.bf16.mxu1 %v3967_v43  ;;  %v803_v62 = vmax.f32 %v483_v31, %v3342_v46  ;;  %v804_v63 = vmax.f32 %v484_v32, %v3343_v47  ;;  %v807_v2 = vmax.f32 %v487_v35, %v3346_v50  ;;  %v225_v43 = vld [vmem:[%s4152_s30 + $0x7] sm:$0x1] }
  0x25   : > { %v3338_v42 = vrot.slane %v479_v28, 9  ;;  %v802_v60 = vmax.f32 %v482_v30, %v3341_v45  ;;  %v805_v1 = vmax.f32 %v485_v33, %v3344_v48  ;;  %v806_v0 = vmax.f32 %v486_v34, %v3345_v49  ;;  %3730 = vmatpush3.bf16.msra.mxu0 %v3970_v61  ;;  %v233_v48 = vld [vmem:[%s4152_s30 + $0xf] sm:$0x1] }
  0x26   : > { %v808_v3 = vmax.f32 %v488_v36, %v3347_v51  ;;  %v3612_v4 = vpack.c.bf16 %v794_v52, %v794_v52  ;;  %v3613_v5 = vpack.c.bf16 %v795_v53, %v795_v53  ;;  %v3614_v6 = vpack.c.bf16 %v796_v54, %v796_v54  ;;  %3795 = vmatprep.subr.bf16.mxu0 %v3973_v14  ;;  %v1582_v53 = vld [vmem:[#allocation2] sm:$0xe]  ;;  %v1583_v54 = vld [vmem:[#allocation2 + $0x4] sm:$0x1] }
  0x27   : > { %v799_v58 = vmax.f32 %v479_v28, %v3338_v42  ;;  %v3615_v7 = vpack.c.bf16 %v797_v55, %v797_v55  ;;  %v3616_v8 = vpack.c.bf16 %v798_v57, %v798_v57  ;;  %v3618_v10 = vpack.c.bf16 %v800_v59, %v800_v59  ;;  %v1344_v57 = vld [vmem:[#allocation2 + $0x8] sm:$0xf]  ;;  %v1431_v59 = vld [vmem:[#allocation2] sm:$0xf]  ;;  %v4237_v14 = vld [vmem:[%s4152_s30 + $0x24] sm:$0x1] }
  0x28   : > { %v3620_v11 = vpack.c.bf16 %v802_v60, %v802_v60  ;;  %v3621_v12 = vpack.c.bf16 %v803_v62, %v803_v62  ;;  %v3622_v13 = vpack.c.bf16 %v804_v63, %v804_v63  ;;  %vm1615_vm6 = vcmask 1046532  }
  0x29   : > { %v3617_v9 = vpack.c.bf16 %v799_v58, %v799_v58  ;;  %v3623_v15 = vpack.c.bf16 %v805_v1, %v805_v1  ;;  %v3624_v16 = vpack.c.bf16 %v806_v0, %v806_v0  ;;  %v3625_v17 = vpack.c.bf16 %v807_v2, %v807_v2  ;;  %vm4212_vm12 = vmor %vm1614_vm5, %vm1615_vm6  ;;  %v1432_v1 = vld [vmem:[#allocation2 + $0x4] sm:$0x1]  ;;  %v4217_v0 = vld [vmem:[%s4152_s30 + $0x20] sm:$0x1] }
  0x2a   : > { %v3626_v18 = vpack.c.bf16 %v808_v3, %v808_v3  ;;  %vm1215_vm7 = vcmask 1047559   ;;  %vm1341_vm8 = vcmask 1043456   ;;  %v1134_v19 = vunpack.c.l.b16 %v3612_v4 }
  0x2b   : > { %v1135_v20 = vunpack.c.l.b16 %v3613_v5  ;;  %v1136_v21 = vunpack.c.l.b16 %v3614_v6  ;;  %v1137_v22 = vunpack.c.l.b16 %v3615_v7  ;;  %v1138_v23 = vunpack.c.l.b16 %v3616_v8  ;;  %v1353_v5 = vld [vmem:[#allocation2 + $0x10] sm:$0xf]  ;;  %v4227_v8 = vld [vmem:[%s4152_s30 + $0x21] sm:$0x1] }
  0x2c   : > { %v1139_v24 = vunpack.c.l.b16 %v3617_v9  ;;  %v1140_v25 = vunpack.c.l.b16 %v3618_v10  ;;  %v1142_v26 = vunpack.c.l.b16 %v3620_v11  ;;  %v1143_v27 = vunpack.c.l.b16 %v3621_v12  ;;  %v4230_v9 = vld [vmem:[%s4152_s30 + $0x22] sm:$0x1] }
  0x2d   : > { %v1144_v28 = vunpack.c.l.b16 %v3622_v13  ;;  %v1145_v29 = vunpack.c.l.b16 %v3623_v15  ;;  %v1146_v30 = vunpack.c.l.b16 %v3624_v16  ;;  %v1147_v31 = vunpack.c.l.b16 %v3625_v17  ;;  %v4234_v13 = vld [vmem:[%s4152_s30 + $0x23] sm:$0x1]  ;;  %v4240_v15 = vld [vmem:[%s4152_s30 + $0x25] sm:$0x1] }
  0x2e   : > { %v1148_v32 = vunpack.c.l.b16 %v3626_v18  ;;  %v1198_v33 = vrot.slane %v1134_v19, 7  ;;  %v1199_v34 = vrot.slane %v1135_v20, 6  ;;  %v1202_v35 = vrot.slane %v1136_v21, 5  ;;  %v4248_v19 = vld [vmem:[%s4152_s30 + $0x26] sm:$0x1] }
  0x2f   : > { %v1205_v36 = vrot.slane %v1137_v22, 4  ;;  %v1208_v37 = vrot.slane %v1138_v23, 3  ;;  %v1211_v38 = vrot.slane %v1139_v24, 2  ;;  %v1214_v40 = vrot.slane %v1140_v25, 1  ;;  %v4251_v20 = vld [vmem:[%s4152_s30 + $0x28] sm:$0x1] }
  0x30   : > { %v1201_v39 = vsel %vm1200_vm0, %v1199_v34, %v1198_v33  ;;  %v1217_v41 = vrot.slane %v1142_v26, 7  ;;  %v1218_v42 = vrot.slane %v1143_v27, 6  ;;  %vm1347_vm9 = vcmask 1040384   ;;  %v4256_v25 = vld [vmem:[%s4152_s30 + $0x29] sm:$0x1] }
  0x31   : > { %v1204_v44 = vsel %vm1203_vm1, %v1202_v35, %v1201_v39  ;;  %v1220_v45 = vrot.slane %v1144_v28, 5  ;;  %v1222_v46 = vrot.slane %v1145_v29, 4  ;;  %v1224_v47 = vrot.slane %v1146_v30, 3  ;;  %v4259_v26 = vld [vmem:[%s4152_s30 + $0x2a] sm:$0x1] }
  0x32   : > { %v1207_v49 = vsel %vm1206_vm2, %v1205_v36, %v1204_v44  ;;  %v1219_v50 = vsel %vm1200_vm0, %v1218_v42, %v1217_v41  ;;  %v1226_v51 = vrot.slane %v1147_v31, 2  ;;  %v1228_v52 = vrot.slane %v1148_v32, 1  ;;  %v4262_v27 = vld [vmem:[%s4152_s30 + $0x2b] sm:$0x1]  ;;  %v4265_v28 = vld [vmem:[%s4152_s30 + $0x2c] sm:$0x1] }
  0x33   : > { %v1210_v55 = vsel %vm1209_vm3, %v1208_v37, %v1207_v49  ;;  %v1221_v56 = vsel %vm1203_vm1, %v1220_v45, %v1219_v50  ;;  %vm1342_vm10 = vsmask.f32 7938  ;;  %v353_v58 = vunpack.c.l.bf16 %v225_v43  ;;  %v1350_v29 = vld [vmem:[#allocation2 + $0xc] sm:$0x1]  ;;  %v4268_v32 = vld [vmem:[%s4152_s30 + $0x2d] sm:$0x1] }
  0x34   : > { %v1213_v60 = vsel %vm1212_vm4, %v1211_v38, %v1210_v55  ;;  %v1223_v61 = vsel %vm1206_vm2, %v1222_v46, %v1221_v56  ;;  %v361_v62 = vunpack.c.l.bf16 %v233_v48  ;;  %vm1348_vm11 = vsmask.f32 256  ;;  %vm4222_vm13 = vmand %vm1341_vm8, %vm1342_vm10  ;;  %v4271_v33 = vld [vmem:[%s4152_s30 + $0x2e] sm:$0x1]  ;;  %v4278_v39 = vld [vmem:[%s4152_s30 + $0x30] sm:$0x1] }
  0x35   : > { %v1216_v2 = vsel %vm1215_vm7, %v1214_v40, %v1213_v60  ;;  %v1225_v3 = vsel %vm1209_vm3, %v1224_v47, %v1223_v61  ;;  %v3477_v6 = vrot.slane %v1582_v53, 9  ;;  %v1619_v7 = vrot.slane %v1583_v54, 5  ;;  %v4281_v40 = vld [vmem:[%s4152_s30 + $0x31] sm:$0x1]  ;;  %v4284_v41 = vld [vmem:[%s4152_s30 + $0x32] sm:$0x1]  ;;  %vm4292_vm5 = vmand %vm1347_vm9, %vm1348_vm11 }
  0x36   : > { %v1227_v10 = vsel %vm1212_vm4, %v1226_v51, %v1225_v3  ;;  %v1308_v11 = vpack.c.b16 %v1216_v2, %v1216_v2  ;;  %v481_v12 = vmax.f32 %v353_v58, %v361_v62  ;;  %vm1447_vm14 = vsmask.f32 3328  ;;  %v4287_v42 = vld [vmem:[%s4152_s30 + $0x33] sm:$0x1]  ;;  %v4299_v46 = vld [vmem:[%s4152_s30 + $0x34] sm:$0x1] }
  0x37   : > { %v1229_v16 = vsel %vm1215_vm7, %v1228_v52, %v1227_v10  ;;  %v4245_v17 = vsel %vm4212_vm12, %v3477_v6, %v1619_v7  ;;  %vm1448_vm15 = vsmask.f32 7440  ;;  %v1451_v18 = vshrl.u32 %v1431_v59, 16  ;;  %v4302_v47 = vld [vmem:[%s4152_s30 + $0x35] sm:$0x1] }
  0x38   : > { %v1310_v21 = vpack.c.b16 %v1229_v16, %v1229_v16  ;;  %v1345_v22 = vsel %vm4222_vm13, %v1308_v11, %v1344_v57  ;;  %v3340_v23 = vrot.slane %v481_v12, 9  ;;  %v1454_v24 = vshll.u32 %v1431_v59, 16  ;;  %v4305_v48 = vld [vmem:[%s4152_s30 + $0x36] sm:$0x1]  ;;  %vm4312_vm6 = vmor %vm1447_vm14, %vm1448_vm15  ;;  %v274_v55 = vld [vmem:[%s4152_s30 + $0x38] sm:$0x1] }
  0x39   : > { %1346 = vst [vmem:[#allocation2 + $0x8] sm:$0xf] %v1345_v22  ;;  %v1453_v30 = vrot.slane %v1451_v18, 4  ;;  %v1460_v31 = vshll.u32 %v1432_v1, 16  ;;  %v378_v34 = vunpack.c.l.bf16 %v4217_v0  ;;  %v379_v35 = vunpack.c.l.bf16 %v4227_v8  ;;  %v275_v58 = vld [vmem:[%s4152_s30 + $0x39] sm:$0x1] }
  0x3a   : > { %v1354_v36 = vsel %vm4222_vm13, %v1310_v21, %v1353_v5  ;;  %v801_v37 = vmax.f32 %v481_v12, %v3340_v23  ;;  %v1456_v38 = vrot.slane %v1454_v24, 5  ;;  %v380_v43 = vunpack.c.l.bf16 %v4230_v9  ;;  %v276_v59 = vld [vmem:[%s4152_s30 + $0x3a] sm:$0x1]  ;;  %v277_v60 = vld [vmem:[%s4152_s30 + $0x3b] sm:$0x1] }
  0x3b   : > { %1355 = vst [vmem:[#allocation2 + $0x10] sm:$0xf] %v1354_v36  ;;  %v4296_v45 = vrot.slane %v1460_v31, 5  ;;  %v381_v49 = vunpack.c.l.bf16 %v4234_v13  ;;  %v382_v50 = vunpack.c.l.bf16 %v4237_v14  ;;  %v383_v51 = vunpack.c.l.bf16 %v4240_v15  ;;  %v278_v61 = vld [vmem:[%s4152_s30 + $0x3c] sm:$0x1] }
  0x3c   : > { %v3676_v52 = vpack.c.bf16 %v801_v37, %v801_v37  ;;  %v1457_v54 = vor.u32 %v1456_v38, %v1453_v30  ;;  %v384_v56 = vunpack.c.l.bf16 %v4248_v19  ;;  %v386_v57 = vunpack.c.l.bf16 %v4251_v20  ;;  %v279_v7 = vld [vmem:[%s4152_s30 + $0x3d] sm:$0x1]  ;;  %v280_v9 = vld [vmem:[%s4152_s30 + $0x3e] sm:$0x1] }
  0x3d   : > { %v387_v62 = vunpack.c.l.bf16 %v4256_v25  ;;  %v388_v1 = vunpack.c.l.bf16 %v4259_v26  ;;  %v389_v2 = vunpack.c.l.bf16 %v4262_v27  ;;  %v390_v3 = vunpack.c.l.bf16 %v4265_v28 }
  0x3e   : > { %v1351_v5 = vsel %vm4292_vm5, %v3676_v52, %v1350_v29  ;;  %v4329_v6 = vrot.slane %v1457_v54, 4  ;;  %v391_v10 = vunpack.c.l.bf16 %v4268_v32  ;;  %v392_v11 = vunpack.c.l.bf16 %v4271_v33 }
  0x3f   : > { %1352 = vst [vmem:[#allocation2 + $0xc] sm:$0x1] %v1351_v5  ;;  %v394_v12 = vunpack.c.l.bf16 %v4278_v39  ;;  %v395_v13 = vunpack.c.l.bf16 %v4281_v40  ;;  %v396_v14 = vunpack.c.l.bf16 %v4284_v41  ;;  %v397_v15 = vunpack.c.l.bf16 %v4287_v42 }
  0x40   : > { %v1584_v16 = vld [vmem:[#allocation2 + $0x8] sm:$0xe]  ;;  %v1463_v19 = vsel %vm4312_vm6, %v4329_v6, %v4296_v45  ;;  %v398_v20 = vunpack.c.l.bf16 %v4299_v46  ;;  %v399_v21 = vunpack.c.l.bf16 %v4302_v47  ;;  %v400_v22 = vunpack.c.l.bf16 %v4305_v48 }
  0x41   : > { %v1433_v18 = vld [vmem:[#allocation2 + $0x8] sm:$0xf]  ;;  %v3478_v23 = vrot.slane %v1584_v16, 9  ;;  %v402_v26 = vunpack.c.l.bf16 %v274_v55  ;;  %v403_v28 = vunpack.c.l.bf16 %v275_v58  ;;  %v404_v29 = vunpack.c.l.bf16 %v276_v59 }
  0x42   : > { %v1465_v24 = vshrl.u32 %v1433_v18, 16  ;;  %v1468_v25 = vshll.u32 %v1433_v18, 16  ;;  %v3966_v27 = vld [vmem:[#allocation2 + $0x8] ss:$8 sps:$4 sm:$0xff]   ;;  %v405_v30 = vunpack.c.l.bf16 %v277_v60  ;;  %v406_v31 = vunpack.c.l.bf16 %v278_v61  ;;  %v3976_v18 = vld [vmem:[%s4964_s1 + $0x100] sm:$0xff]  }
  0x43   : > { %v407_v36 = vunpack.c.l.bf16 %v279_v7  ;;  %v408_v37 = vunpack.c.l.bf16 %v280_v9  ;;  %2915 = vmatprep.mubr.bf16.mxu1 %v3966_v27  ;;  %v490_v38 = vmax.f32 %v378_v34, %v386_v57  ;;  %v491_v39 = vmax.f32 %v379_v35, %v387_v62  ;;  %v4360_v7 = vld [vmem:[%s4152_s30 + $0x17] sm:$0x1] }
  0x44   : > { %v1467_v32 = vrot.slane %v1465_v24, 4  ;;  %v1470_v33 = vrot.slane %v1468_v25, 5  ;;  %v492_v40 = vmax.f32 %v380_v43, %v388_v1  ;;  %v493_v41 = vmax.f32 %v381_v49, %v389_v2  ;;  %v3971_v1 = vld [vmem:[%s4964_s1 + $0x1c8] sm:$0xff]  }
  0x45   : > { %v494_v45 = vmax.f32 %v382_v50, %v390_v3  ;;  %v495_v46 = vmax.f32 %v383_v51, %v391_v10  ;;  %v496_v47 = vmax.f32 %v384_v56, %v392_v11  ;;  %v498_v54 = vmax.f32 %v394_v12, %v402_v26  ;;  %v3968_v50 = vld [vmem:[%s4964_s1 + $0x180] sm:$0xff]  }
  0x46   : > { %v1471_v42 = vor.u32 %v1470_v33, %v1467_v32  ;;  %v1585_v48 = vld [vmem:[#allocation2 + $0xc] sm:$0x1]  ;;  %v499_v55 = vmax.f32 %v395_v13, %v403_v28  ;;  %v500_v58 = vmax.f32 %v396_v14, %v404_v29  ;;  %v501_v59 = vmax.f32 %v397_v15, %v405_v30  ;;  %v3974_v10 = vld [vmem:[#allocation2] ss:$8 sps:$4 sm:$0xff]   ;;  %v3977_v28 = vld [vmem:[%s4964_s1 + $0x1d0] sm:$0xff]  }
  0x47   : > { %v1434_v52 = vld [vmem:[#allocation2 + $0xc] sm:$0x1]  ;;  %v1623_v60 = vrot.slane %v1585_v48, 5  ;;  %v502_v0 = vmax.f32 %v398_v20, %v406_v31  ;;  %v503_v34 = vmax.f32 %v399_v21, %v407_v36  ;;  %v504_v8 = vmax.f32 %v400_v22, %v408_v37  ;;  %v3983_v48 = vld [vmem:[%s4964_s1 + $0x150] sm:$0xff]  }
  0x48   : > { %v1472_v61 = vrot.slane %v1471_v42, 4  ;;  %v1474_v5 = vshll.u32 %v1434_v52, 16  ;;  %v3349_v35 = vrot.slane %v490_v38, 9  ;;  %v3350_v43 = vrot.slane %v491_v39, 9  ;;  %v3972_v20 = vld [vmem:[%s4964_s1 + $0x188] sm:$0xff]  }
  0x49   : > { %v1624_v49 = vsel %vm4212_vm12, %v3478_v23, %v1623_v60  ;;  %v3351_v56 = vrot.slane %v492_v40, 9  ;;  %v3352_v57 = vrot.slane %v493_v41, 9  ;;  %v3353_v2 = vrot.slane %v494_v45, 9  ;;  %v3979_v33 = vld [vmem:[%s4964_s1 + $0x148] sm:$0xff]  }
  0x4a   : > { %v1476_v51 = vrot.slane %v1474_v5, 5  ;;  %v3485_v62 = vcombine.low %v4245_v17, %v1624_v49  ;;  %v3354_v3 = vrot.slane %v495_v46, 9  ;;  %v3355_v6 = vrot.slane %v496_v47, 9  ;;  %v3982_v49 = vld [vmem:[%s4964_s1 + $0x198] sm:$0xff]  }
  0x4b   : > { %v3357_v11 = vrot.slane %v498_v54, 9  ;;  %v3358_v12 = vrot.slane %v499_v55, 9  ;;  %v3359_v13 = vrot.slane %v500_v58, 9  ;;  %v3360_v15 = vrot.slane %v501_v59, 9 }
  0x4c   : > { %v1477_v9 = vsel %vm4312_vm6, %v1472_v61, %v1476_v51  ;;  %2916 = vmatmul.mubr.bf16.vlgmr.msra.gmra.mrb[0].mxu1 %v3485_v62  ;;  %v3361_v17 = vrot.slane %v502_v0, 9  ;;  %v3362_v16 = vrot.slane %v503_v34, 9  ;;  %v3363_v21 = vrot.slane %v504_v8, 9 }
  0x4d   : > { %v3473_v14 = vcombine.low %v1463_v19, %v1477_v9  ;;  %3836 = vmatpush3.bf16.msra.mxu1 %v3968_v50  ;;  %v810_v22 = vmax.f32 %v490_v38, %v3349_v35  ;;  %v811_v23 = vmax.f32 %v491_v39, %v3350_v43  ;;  %v812_v24 = vmax.f32 %v492_v40, %v3351_v56  ;;  %v3980_v40 = vld [vmem:[%s4964_s1 + $0x108] sm:$0xff]   ;;  %v3986_v50 = vld [vmem:[%s4964_s1 + $0x110] sm:$0xff]  }
  0x4e   : > { %3837 = vmatprep.subr.bf16.mxu1 %v3971_v1  ;;  %v813_v25 = vmax.f32 %v493_v41, %v3352_v57  ;;  %v814_v19 = vmax.f32 %v494_v45, %v3353_v2  ;;  %v815_v26 = vmax.f32 %v495_v46, %v3354_v3  ;;  %v369_v27 = vunpack.c.l.bf16 %v4360_v7  ;;  %v3989_v1 = vld [vmem:[%s4964_s1 + $0x158] sm:$0xff]  }
  0x4f   : > { %2850 = vmatprep.mubr.bf16.mxu0 %v3473_v14  ;;  %v816_v29 = vmax.f32 %v496_v47, %v3355_v6  ;;  %v818_v30 = vmax.f32 %v498_v54, %v3357_v11  ;;  %v819_v31 = vmax.f32 %v499_v55, %v3358_v12  ;;  %v820_v32 = vmax.f32 %v500_v58, %v3359_v13  ;;  %v3978_v47 = vld [vmem:[%s4964_s1 + $0x190] sm:$0xff]  }
  0x50   : > { %2851 = vmatmul.mubr.bf16.vlgmr.msra.gmra.mrb[0].mxu0 %v3974_v10  ;;  %v821_v36 = vmax.f32 %v501_v59, %v3360_v15  ;;  %v822_v37 = vmax.f32 %v502_v0, %v3361_v17  ;;  %v823_v38 = vmax.f32 %v503_v34, %v3362_v16  ;;  %v824_v39 = vmax.f32 %v504_v8, %v3363_v21  ;;  %v3981_v59 = vld [vmem:[%s4964_s1 + $0x1d8] sm:$0xff]   ;;  %v3987_v10 = vld [vmem:[%s4964_s1 + $0x1e0] sm:$0xff]  }
  0x51   : > { %3796 = vmatpush3.bf16.msra.mxu0 %v3976_v18  ;;  %3838 = vmatpush3.bf16.msra.mxu1 %v3972_v20  ;;  %v3628_v41 = vpack.c.bf16 %v810_v22, %v810_v22  ;;  %v3629_v42 = vpack.c.bf16 %v811_v23, %v811_v23  ;;  %v3630_v45 = vpack.c.bf16 %v812_v24, %v812_v24  ;;  %v249_v15 = vld [vmem:[%s4152_s30 + $0x1f] sm:$0x1]  ;;  %v257_v17 = vld [vmem:[%s4152_s30 + $0x27] sm:$0x1]  ;;  %v265_v24 = vld [vmem:[%s4152_s30 + $0x2f] sm:$0x1] }
  0x52   : > { %v3631_v46 = vpack.c.bf16 %v813_v25, %v813_v25  ;;  %v3632_v52 = vpack.c.bf16 %v814_v19, %v814_v19  ;;  %v3633_v54 = vpack.c.bf16 %v815_v26, %v815_v26  ;;  %v3634_v55 = vpack.c.bf16 %v816_v29, %v816_v29  ;;  %3839 = vmatprep.subr.bf16.mxu1 %v3977_v28  ;;  %v3988_v16 = vld [vmem:[%s4964_s1 + $0x1a0] sm:$0xff]   ;;  %v3990_v18 = vld [vmem:[%s4964_s1 + $0x118] sm:$0xff]   ;;  %v4416_v25 = vld [vmem:[#allocation2 + $0x10] sm:$0xe] }
  0x53   : > { %v3636_v58 = vpack.c.bf16 %v818_v30, %v818_v30  ;;  %v3637_v60 = vpack.c.bf16 %v819_v31, %v819_v31  ;;  %v3638_v61 = vpack.c.bf16 %v820_v32, %v820_v32  ;;  %v3639_v5 = vpack.c.bf16 %v821_v36, %v821_v36  ;;  %3797 = vmatprep.subr.bf16.mxu0 %v3979_v33  ;;  %v1435_v30 = vld [vmem:[#allocation2 + $0x10] sm:$0xf] }
  0x54   : > { %v3640_v0 = vpack.c.bf16 %v822_v37, %v822_v37  ;;  %v3641_v34 = vpack.c.bf16 %v823_v38, %v823_v38  ;;  %v3642_v8 = vpack.c.bf16 %v824_v39, %v824_v39  ;;  %v1150_v35 = vunpack.c.l.b16 %v3628_v41  ;;  %v3991_v37 = vld [vmem:[%s4964_s1 + $0x1e8] sm:$0xff]  }
  0x55   : > { %v1151_v43 = vunpack.c.l.b16 %v3629_v42  ;;  %3798 = vmatpush3.bf16.msra.mxu0 %v3980_v40  ;;  %v1152_v51 = vunpack.c.l.b16 %v3630_v45  ;;  %v1153_v56 = vunpack.c.l.b16 %v3631_v46  ;;  %v1154_v57 = vunpack.c.l.b16 %v3632_v52  ;;  %3840 = vmatpush3.bf16.msra.mxu1 %v3978_v47  ;;  %v3992_v42 = vld [vmem:[%s4964_s1 + $0x1a8] sm:$0xff]   ;;  %v3993_v45 = vld [vmem:[%s4964_s1 + $0x160] sm:$0xff]  }
  0x56   : > { %v1155_v62 = vunpack.c.l.b16 %v3633_v54  ;;  %3799 = vmatprep.subr.bf16.mxu0 %v3983_v48  ;;  %v4398_v2 = vunpack.c.l.b16 %v3634_v55  ;;  %v1158_v3 = vunpack.c.l.b16 %v3636_v58  ;;  %v1159_v6 = vunpack.c.l.b16 %v3637_v60  ;;  %3841 = vmatprep.subr.bf16.mxu1 %v3981_v59  ;;  %v4435_v54 = vld [vmem:[%s4152_s30 + $0x40] sm:$0x1]  ;;  %v1359_v59 = vld [vmem:[#allocation2 + $0x18] sm:$0xf] }
  0x57   : > { %v1160_v9 = vunpack.c.l.b16 %v3638_v61  ;;  %v1161_v11 = vunpack.c.l.b16 %v3639_v5  ;;  %v1162_v12 = vunpack.c.l.b16 %v3640_v0  ;;  %v4403_v13 = vunpack.c.l.b16 %v3641_v34  ;;  %v4441_v5 = vld [vmem:[%s4152_s30 + $0x41] sm:$0x1] }
  0x58   : > { %v4405_v14 = vunpack.c.l.b16 %v3642_v8  ;;  %v1230_v20 = vrot.slane %v1150_v35, 7  ;;  %v1231_v21 = vrot.slane %v1151_v43, 6  ;;  %v1233_v22 = vrot.slane %v1152_v51, 5  ;;  %v3996_v0 = vld [vmem:[%s4964_s1 + $0x120] sm:$0xff]   ;;  %v3997_v51 = vld [vmem:[%s4964_s1 + $0x1f0] sm:$0xff]  }
  0x59   : > { %v1235_v23 = vrot.slane %v1153_v56, 4  ;;  %3800 = vmatpush3.bf16.msra.mxu0 %v3986_v50  ;;  %v1237_v19 = vrot.slane %v1154_v57, 3  ;;  %v1239_v26 = vrot.slane %v1155_v62, 2  ;;  %v1241_v28 = vrot.slane %v4398_v2, 1  ;;  %3842 = vmatpush3.bf16.msra.mxu1 %v3982_v49  ;;  %v4451_v49 = vld [vmem:[%s4152_s30 + $0x42] sm:$0x1] }
  0x5a   : > { %v1243_v29 = vrot.slane %v1158_v3, 7  ;;  %3801 = vmatprep.subr.bf16.mxu0 %v3989_v1  ;;  %v1232_v31 = vsel %vm1200_vm0, %v1231_v21, %v1230_v20  ;;  %v1244_v32 = vrot.slane %v1159_v6, 6  ;;  %v1246_v33 = vrot.slane %v1160_v9, 5  ;;  %3843 = vmatprep.subr.bf16.mxu1 %v3987_v10  ;;  %v4454_v50 = vld [vmem:[%s4152_s30 + $0x43] sm:$0x1]  ;;  %v3998_v20 = vld [vmem:[%s4964_s1 + $0x1b0] sm:$0xff]  }
  0x5b   : > { %v1248_v36 = vrot.slane %v1161_v11, 4  ;;  %v1234_v38 = vsel %vm1203_vm1, %v1233_v22, %v1232_v31  ;;  %v1250_v39 = vrot.slane %v1162_v12, 3  ;;  %v1252_v40 = vrot.slane %v4403_v13, 2  ;;  %v1365_v62 = vld [vmem:[#allocation2 + $0x20] sm:$0xf] }
  0x5c   : > { %v1254_v41 = vrot.slane %v4405_v14, 1  ;;  %v1236_v46 = vsel %vm1206_vm2, %v1235_v23, %v1234_v38  ;;  %v1245_v47 = vsel %vm1200_vm0, %v1244_v32, %v1243_v29  ;;  %v377_v48 = vunpack.c.l.bf16 %v249_v15  ;;  %v4462_v1 = vld [vmem:[%s4152_s30 + $0x44] sm:$0x1]  ;;  %v4465_v2 = vld [vmem:[%s4152_s30 + $0x45] sm:$0x1] }
  0x5d   : > { %v385_v52 = vunpack.c.l.bf16 %v257_v17  ;;  %3802 = vmatpush3.bf16.msra.mxu0 %v3990_v18  ;;  %v1238_v55 = vsel %vm1209_vm3, %v1237_v19, %v1236_v46  ;;  %v1247_v58 = vsel %vm1203_vm1, %v1246_v33, %v1245_v47  ;;  %v393_v60 = vunpack.c.l.bf16 %v265_v24  ;;  %3844 = vmatpush3.bf16.msra.mxu1 %v3988_v16  ;;  %v4469_v11 = vld [vmem:[%s4152_s30 + $0x46] sm:$0x1]  ;;  %v4472_v12 = vld [vmem:[%s4152_s30 + $0x48] sm:$0x1]  ;;  %v1356_v15 = vld [vmem:[#allocation2 + $0x14] sm:$0x1] }
  0x5e   : > { %v3479_v61 = vrot.slane %v4416_v25, 9  ;;  %3803 = vmatprep.subr.bf16.mxu0 %v3993_v45  ;;  %v1240_v34 = vsel %vm1212_vm4, %v1239_v26, %v1238_v55  ;;  %v1249_v8 = vsel %vm1206_vm2, %v1248_v36, %v1247_v58  ;;  %v489_v35 = vmax.f32 %v369_v27, %v377_v48  ;;  %3845 = vmatprep.subr.bf16.mxu1 %v3991_v37  ;;  %v4476_v16 = vld [vmem:[%s4152_s30 + $0x49] sm:$0x1]  ;;  %v1362_v24 = vld [vmem:[#allocation2 + $0x1c] sm:$0x1] }
  0x5f   : > { %v1479_v43 = vshrl.u32 %v1435_v30, 16  ;;  %v1242_v56 = vsel %vm1215_vm7, %v1241_v28, %v1240_v34  ;;  %v1251_v57 = vsel %vm1209_vm3, %v1250_v39, %v1249_v8  ;;  %v497_v7 = vmax.f32 %v385_v52, %v393_v60  ;;  %v4485_v19 = vld [vmem:[%s4152_s30 + $0x4a] sm:$0x1]  ;;  %v4488_v26 = vld [vmem:[%s4152_s30 + $0x4b] sm:$0x1] }
  0x60   : > { %v1482_v27 = vshll.u32 %v1435_v30, 16  ;;  %v1253_v3 = vsel %vm1212_vm4, %v1252_v40, %v1251_v57  ;;  %v1312_v6 = vpack.c.b16 %v1242_v56, %v1242_v56  ;;  %v3348_v9 = vrot.slane %v489_v35, 9  ;;  %v4491_v28 = vld [vmem:[%s4152_s30 + $0x4c] sm:$0x1]  ;;  %v4495_v32 = vld [vmem:[%s4152_s30 + $0x4d] sm:$0x1] }
  0x61   : > { %v1481_v10 = vrot.slane %v1479_v43, 4  ;;  %3804 = vmatpush3.bf16.msra.mxu0 %v3996_v0  ;;  %v1255_v13 = vsel %vm1215_vm7, %v1254_v41, %v1253_v3  ;;  %v3356_v14 = vrot.slane %v497_v7, 9  ;;  %v410_v18 = vunpack.c.l.bf16 %v4435_v54  ;;  %3846 = vmatpush3.bf16.msra.mxu1 %v3992_v42  ;;  %v4498_v33 = vld [vmem:[%s4152_s30 + $0x4e] sm:$0x1]  ;;  %v4501_v36 = vld [vmem:[%s4152_s30 + $0x50] sm:$0x1] }
  0x62   : > { %v1484_v17 = vrot.slane %v1482_v27, 5  ;;  %v1314_v21 = vpack.c.b16 %v1255_v13, %v1255_v13  ;;  %v1360_v22 = vsel %vm4222_vm13, %v1312_v6, %v1359_v59  ;;  %v809_v23 = vmax.f32 %v489_v35, %v3348_v9  ;;  %3847 = vmatprep.subr.bf16.mxu1 %v3997_v51  ;;  %v4508_v41 = vld [vmem:[%s4152_s30 + $0x51] sm:$0x1]  ;;  %v4511_v42 = vld [vmem:[%s4152_s30 + $0x52] sm:$0x1]  ;;  %v3999_v0 = vld [vmem:[%s4964_s1 + $0x168] sm:$0xff]  }
  0x63   : > { %v411_v29 = vunpack.c.l.bf16 %v4441_v5  ;;  %1361 = vst [vmem:[#allocation2 + $0x18] sm:$0xf] %v1360_v22  ;;  %v817_v30 = vmax.f32 %v497_v7, %v3356_v14  ;;  %v412_v37 = vunpack.c.l.bf16 %v4451_v49  ;;  %v413_v38 = vunpack.c.l.bf16 %v4454_v50  ;;  %v4514_v45 = vld [vmem:[%s4152_s30 + $0x53] sm:$0x1]  ;;  %v4521_v55 = vld [vmem:[%s4152_s30 + $0x54] sm:$0x1]  ;;  %3805 = vmatprep.subr.bf16.mxu0 %v3999_v0 }
  0x64   : > { %v1485_v31 = vor.u32 %v1484_v17, %v1481_v10  ;;  %v1366_v39 = vsel %vm4222_vm13, %v1314_v21, %v1365_v62  ;;  %v3677_v40 = vpack.c.bf16 %v809_v23, %v809_v23  ;;  %v414_v46 = vunpack.c.l.bf16 %v4462_v1  ;;  %v4524_v58 = vld [vmem:[%s4152_s30 + $0x55] sm:$0x1]  ;;  %v4534_v8 = vld [vmem:[%s4152_s30 + $0x56] sm:$0x1]  ;;  %v306_v35 = vld [vmem:[%s4152_s30 + $0x58] sm:$0x1] }
  0x65   : > { %v415_v47 = vunpack.c.l.bf16 %v4465_v2  ;;  %1367 = vst [vmem:[#allocation2 + $0x20] sm:$0xf] %v1366_v39  ;;  %v3678_v48 = vpack.c.bf16 %v817_v30, %v817_v30  ;;  %v416_v59 = vunpack.c.l.bf16 %v4469_v11  ;;  %v418_v60 = vunpack.c.l.bf16 %v4472_v12  ;;  %3848 = vmatpush3.bf16.msra.mxu1 %v3998_v20  ;;  %v307_v43 = vld [vmem:[%s4152_s30 + $0x59] sm:$0x1]  ;;  %v308_v57 = vld [vmem:[%s4152_s30 + $0x5a] sm:$0x1] }
  0x66   : > { %v4518_v52 = vrot.slane %v1485_v31, 4  ;;  %v1357_v34 = vsel %vm4292_vm5, %v3677_v40, %v1356_v15  ;;  %v419_v49 = vunpack.c.l.bf16 %v4476_v16  ;;  %v420_v50 = vunpack.c.l.bf16 %v4485_v19  ;;  %v309_v62 = vld [vmem:[%s4152_s30 + $0x5b] sm:$0x1]  ;;  %v310_v7 = vld [vmem:[%s4152_s30 + $0x5c] sm:$0x1]  ;;  %v4000_v31 = vld [vmem:[%s4964_s1 + $0x128] sm:$0xff]  }
  0x67   : > { %v421_v51 = vunpack.c.l.bf16 %v4488_v26  ;;  %1358 = vst [vmem:[#allocation2 + $0x14] sm:$0x1] %v1357_v34  ;;  %v1363_v56 = vsel %vm4292_vm5, %v3678_v48, %v1362_v24  ;;  %v422_v27 = vunpack.c.l.bf16 %v4491_v28  ;;  %v423_v1 = vunpack.c.l.bf16 %v4495_v32  ;;  %v311_v3 = vld [vmem:[%s4152_s30 + $0x5d] sm:$0x1]  ;;  %v312_v12 = vld [vmem:[%s4152_s30 + $0x5e] sm:$0x1]  ;;  %3806 = vmatpush3.bf16.msra.mxu0 %v4000_v31 }
  0x68   : > { %v424_v2 = vunpack.c.l.bf16 %v4498_v33  ;;  %1364 = vst [vmem:[#allocation2 + $0x1c] sm:$0x1] %v1363_v56  ;;  %v426_v6 = vunpack.c.l.bf16 %v4501_v36  ;;  %v427_v9 = vunpack.c.l.bf16 %v4508_v41  ;;  %v428_v10 = vunpack.c.l.bf16 %v4511_v42 }
  0x69   : > { %v429_v11 = vunpack.c.l.bf16 %v4514_v45  ;;  %v430_v13 = vunpack.c.l.bf16 %v4521_v55  ;;  %v431_v14 = vunpack.c.l.bf16 %v4524_v58  ;;  %v432_v15 = vunpack.c.l.bf16 %v4534_v8 }
  0x6a   : > { %v434_v17 = vunpack.c.l.bf16 %v306_v35  ;;  %v1588_v16 = vld [vmem:[#allocation2 + $0x18] sm:$0xe]  ;;  %v435_v21 = vunpack.c.l.bf16 %v307_v43  ;;  %v436_v22 = vunpack.c.l.bf16 %v308_v57  ;;  %v437_v23 = vunpack.c.l.bf16 %v309_v62 }
  0x6b   : > { %v1437_v20 = vld [vmem:[#allocation2 + $0x18] sm:$0xf]  ;;  %v438_v24 = vunpack.c.l.bf16 %v310_v7  ;;  %v3480_v19 = vrot.slane %v1588_v16, 9  ;;  %v439_v30 = vunpack.c.l.bf16 %v311_v3  ;;  %v440_v33 = vunpack.c.l.bf16 %v312_v12 }
  0x6c   : > { %v1493_v26 = vshrl.u32 %v1437_v20, 16  ;;  %v1496_v28 = vshll.u32 %v1437_v20, 16  ;;  %v3975_v32 = vld [vmem:[#allocation2 + $0x18] ss:$8 sps:$4 sm:$0xff]   ;;  %v506_v36 = vmax.f32 %v410_v18, %v418_v60  ;;  %v507_v39 = vmax.f32 %v411_v29, %v419_v49 }
  0x6d   : > { %v508_v40 = vmax.f32 %v412_v37, %v420_v50  ;;  %v509_v45 = vmax.f32 %v413_v38, %v421_v51  ;;  %v510_v48 = vmax.f32 %v414_v46, %v422_v27  ;;  %2923 = vmatprep.mubr.bf16.mxu1 %v3975_v32  ;;  %v511_v0 = vmax.f32 %v415_v47, %v423_v1 }
  0x6e   : > { %v1495_v41 = vrot.slane %v1493_v26, 4  ;;  %v1498_v42 = vrot.slane %v1496_v28, 5  ;;  %v1587_v55 = vld [vmem:[#allocation2 + $0x14] sm:$0x1]  ;;  %v512_v34 = vmax.f32 %v416_v59, %v424_v2  ;;  %v514_v8 = vmax.f32 %v426_v6, %v434_v17 }
  0x6f   : > { %v1436_v58 = vld [vmem:[#allocation2 + $0x14] sm:$0x1]  ;;  %v515_v35 = vmax.f32 %v427_v9, %v435_v21  ;;  %v1589_v43 = vld [vmem:[#allocation2 + $0x1c] sm:$0x1]  ;;  %v1627_v56 = vrot.slane %v1587_v55, 5  ;;  %v516_v5 = vmax.f32 %v428_v10, %v436_v22  ;;  %v517_v49 = vmax.f32 %v429_v11, %v437_v23 }
  0x70   : > { %v1438_v54 = vld [vmem:[#allocation2 + $0x1c] sm:$0x1]  ;;  %v1488_v18 = vshll.u32 %v1436_v58, 16  ;;  %v1499_v60 = vor.u32 %v1498_v42, %v1495_v41  ;;  %v1631_v29 = vrot.slane %v1589_v43, 5  ;;  %v518_v50 = vmax.f32 %v430_v13, %v438_v24  ;;  %v4003_v26 = vld [vmem:[%s4964_s1 + $0x170] sm:$0xff]  }
  0x71   : > { %v1502_v37 = vshll.u32 %v1438_v54, 16  ;;  %v1628_v38 = vsel %vm4212_vm12, %v3479_v61, %v1627_v56  ;;  %v519_v59 = vmax.f32 %v431_v14, %v439_v30  ;;  %v520_v62 = vmax.f32 %v432_v15, %v440_v33  ;;  %v3984_v61 = vld [vmem:[#allocation2 + $0x10] ss:$8 sps:$4 sm:$0xff]   ;;  %3807 = vmatprep.subr.bf16.mxu0 %v4003_v26  ;;  %v1856_v4 = vld [vmem:[#allocation2 + $0x14] sm:$0x1] }
  0x72   : > { %v1490_v46 = vrot.slane %v1488_v18, 5  ;;  %v1500_v47 = vrot.slane %v1499_v60, 4  ;;  %v1632_v51 = vsel %vm4212_vm12, %v3480_v19, %v1631_v29  ;;  %v3365_v7 = vrot.slane %v506_v36, 9  ;;  %v4001_v11 = vld [vmem:[%s4964_s1 + $0x1f8] sm:$0xff]  }
  0x73   : > { %v1504_v57 = vrot.slane %v1502_v37, 5  ;;  %v3486_v27 = vcombine.low %v1628_v38, %v1632_v51  ;;  %v3366_v2 = vrot.slane %v507_v39, 9  ;;  %v3367_v3 = vrot.slane %v508_v40, 9  ;;  %3849 = vmatprep.subr.bf16.mxu1 %v4001_v11 }
  0x74   : > { %v1491_v1 = vsel %vm4312_vm6, %v4518_v52, %v1490_v46  ;;  %v3368_v6 = vrot.slane %v509_v45, 9  ;;  %v3369_v9 = vrot.slane %v510_v48, 9  ;;  %v3370_v10 = vrot.slane %v511_v0, 9  ;;  %v4002_v52 = vld [vmem:[%s4964_s1 + $0x1b8] sm:$0xff]  }
  0x75   : > { %v1505_v25 = vsel %vm4312_vm6, %v1500_v47, %v1504_v57  ;;  %2924 = vmatmul.mubr.bf16.gmra.mrb[4].mxu1 %v3486_v27  ;;  %v3371_v13 = vrot.slane %v512_v34, 9  ;;  %v3373_v14 = vrot.slane %v514_v8, 9  ;;  %v3374_v15 = vrot.slane %v515_v35, 9 }
  0x76   : > { %v3474_v12 = vcombine.low %v1491_v1, %v1505_v25  ;;  %v3375_v17 = vrot.slane %v516_v5, 9  ;;  %v3376_v16 = vrot.slane %v517_v49, 9  ;;  %v3377_v20 = vrot.slane %v518_v50, 9  ;;  %3850 = vmatpush3.bf16.msra.mxu1 %v4002_v52  ;;  %v4591_v1 = vld [vmem:[%s4964_s1 + $0x200] sm:$0xff]   ;;  %v297_v52 = vld [vmem:[%s4152_s30 + $0x4f] sm:$0x1] }
  0x77   : > { %v3378_v21 = vrot.slane %v519_v59, 9  ;;  %v3379_v22 = vrot.slane %v520_v62, 9  ;;  %v826_v23 = vmax.f32 %v506_v36, %v3365_v7  ;;  %v827_v24 = vmax.f32 %v507_v39, %v3366_v2  ;;  %3911 = vmatprep.subr.bf16.mxu1 %v4591_v1 }
  0x78   : > { %2858 = vmatprep.mubr.bf16.mxu0 %v3474_v12  ;;  %v828_v19 = vmax.f32 %v508_v40, %v3367_v3  ;;  %v829_v28 = vmax.f32 %v509_v45, %v3368_v6  ;;  %v830_v30 = vmax.f32 %v510_v48, %v3369_v9  ;;  %v831_v31 = vmax.f32 %v511_v0, %v3370_v10  ;;  %v4005_v48 = vld [vmem:[%s4964_s1 + $0x130] sm:$0xff]   ;;  %v281_v9 = vld [vmem:[%s4152_s30 + $0x3f] sm:$0x1] }
  0x79   : > { %2859 = vmatmul.mubr.bf16.gmra.mrb[4].mxu0 %v3984_v61  ;;  %v832_v32 = vmax.f32 %v512_v34, %v3371_v13  ;;  %v834_v33 = vmax.f32 %v514_v8, %v3373_v14  ;;  %v835_v41 = vmax.f32 %v515_v35, %v3374_v15  ;;  %v836_v42 = vmax.f32 %v516_v5, %v3375_v17  ;;  %v273_v6 = vld [vmem:[%s4152_s30 + $0x37] sm:$0x1]  ;;  %v4008_v10 = vld [vmem:[%s4964_s1 + $0x178] sm:$0xff]   ;;  %v289_v15 = vld [vmem:[%s4152_s30 + $0x47] sm:$0x1] }
  0x7a   : > { %v837_v55 = vmax.f32 %v517_v49, %v3376_v16  ;;  %v838_v58 = vmax.f32 %v518_v50, %v3377_v20  ;;  %v839_v43 = vmax.f32 %v519_v59, %v3378_v21  ;;  %v840_v36 = vmax.f32 %v520_v62, %v3379_v22  ;;  %3808 = vmatpush3.bf16.msra.mxu0 %v4005_v48  ;;  %v4009_v17 = vld [vmem:[%s4964_s1 + $0x138] sm:$0xff]  }
  0x7b   : > { %v3644_v39 = vpack.c.bf16 %v826_v23, %v826_v23  ;;  %v3645_v40 = vpack.c.bf16 %v827_v24, %v827_v24  ;;  %v3646_v56 = vpack.c.bf16 %v828_v19, %v828_v19  ;;  %v3647_v54 = vpack.c.bf16 %v829_v28, %v829_v28  ;;  %3809 = vmatprep.subr.bf16.mxu0 %v4008_v10 }
  0x7c   : > { %v3648_v18 = vpack.c.bf16 %v830_v30, %v830_v30  ;;  %v3649_v60 = vpack.c.bf16 %v831_v31, %v831_v31  ;;  %v3650_v29 = vpack.c.bf16 %v832_v32, %v832_v32  ;;  %v3652_v37 = vpack.c.bf16 %v834_v33, %v834_v33  ;;  %v4607_v33 = vld [vmem:[#allocation2 + $0x20] sm:$0xe] }
  0x7d   : > { %v3653_v45 = vpack.c.bf16 %v835_v41, %v835_v41  ;;  %v3654_v0 = vpack.c.bf16 %v836_v42, %v836_v42  ;;  %v3655_v34 = vpack.c.bf16 %v837_v55, %v837_v55  ;;  %v3656_v8 = vpack.c.bf16 %v838_v58, %v838_v58 }
  0x7e   : > { %v3657_v35 = vpack.c.bf16 %v839_v43, %v839_v43  ;;  %v3658_v5 = vpack.c.bf16 %v840_v36, %v840_v36  ;;  %v1166_v49 = vunpack.c.l.b16 %v3644_v39  ;;  %v1167_v50 = vunpack.c.l.b16 %v3645_v40  ;;  %3810 = vmatpush3.bf16.msra.mxu0 %v4009_v17  ;;  %v1439_v43 = vld [vmem:[#allocation2 + $0x20] sm:$0xf]  ;;  %v1371_v40 = vld [vmem:[#allocation2 + $0x28] sm:$0xf]  ;;  %v4663_v17 = vld [vmem:[%s4152_s30 + $0x6e] sm:$0x1] }
  0x7f   : > { %v1168_v38 = vunpack.c.l.b16 %v3646_v56  ;;  %v1169_v46 = vunpack.c.l.b16 %v3647_v54  ;;  %v1170_v47 = vunpack.c.l.b16 %v3648_v18  ;;  %v1171_v59 = vunpack.c.l.b16 %v3649_v60  ;;  %3887 = vmatprep.subr.bf16.mxu0 %v4591_v1  ;;  %v4615_v18 = vld [vmem:[%s4152_s30 + $0x60] sm:$0x1]  ;;  %v4618_v60 = vld [vmem:[%s4152_s30 + $0x61] sm:$0x1] }
  0x80   : > { %v1172_v51 = vunpack.c.l.b16 %v3650_v29  ;;  %v1174_v57 = vunpack.c.l.b16 %v3652_v37  ;;  %v1175_v62 = vunpack.c.l.b16 %v3653_v45  ;;  %v1176_v7 = vunpack.c.l.b16 %v3654_v0  ;;  %v1377_v45 = vld [vmem:[#allocation2 + $0x30] sm:$0xf] }
  0x81   : > { %v1177_v27 = vunpack.c.l.b16 %v3655_v34  ;;  %v1178_v2 = vunpack.c.l.b16 %v3656_v8  ;;  %v1179_v3 = vunpack.c.l.b16 %v3657_v35  ;;  %v1180_v25 = vunpack.c.l.b16 %v3658_v5  ;;  %v4624_v34 = vld [vmem:[%s4152_s30 + $0x62] sm:$0x1]  ;;  %v4627_v8 = vld [vmem:[%s4152_s30 + $0x63] sm:$0x1] }
  0x82   : > { %v1256_v61 = vrot.slane %v1166_v49, 7  ;;  %v1257_v11 = vrot.slane %v1167_v50, 6  ;;  %v1259_v12 = vrot.slane %v1168_v38, 5  ;;  %v1261_v13 = vrot.slane %v1169_v46, 4  ;;  %v4632_v38 = vld [vmem:[%s4152_s30 + $0x64] sm:$0x1] }
  0x83   : > { %v1263_v14 = vrot.slane %v1170_v47, 3  ;;  %v1265_v16 = vrot.slane %v1171_v59, 2  ;;  %v1267_v20 = vrot.slane %v1172_v51, 1  ;;  %v1269_v21 = vrot.slane %v1174_v57, 7  ;;  %v4635_v46 = vld [vmem:[%s4152_s30 + $0x65] sm:$0x1] }
  0x84   : > { %v1270_v22 = vrot.slane %v1175_v62, 6  ;;  %v1258_v23 = vsel %vm1200_vm0, %v1257_v11, %v1256_v61  ;;  %v1272_v24 = vrot.slane %v1176_v7, 5  ;;  %v1274_v19 = vrot.slane %v1177_v27, 4  ;;  %v4639_v62 = vld [vmem:[%s4152_s30 + $0x66] sm:$0x1] }
  0x85   : > { %v1276_v26 = vrot.slane %v1178_v2, 3  ;;  %v1260_v28 = vsel %vm1203_vm1, %v1259_v12, %v1258_v23  ;;  %v1278_v31 = vrot.slane %v1179_v3, 2  ;;  %v1280_v32 = vrot.slane %v1180_v25, 1  ;;  %v4642_v7 = vld [vmem:[%s4152_s30 + $0x68] sm:$0x1] }
  0x86   : > { %v1271_v30 = vsel %vm1200_vm0, %v1270_v22, %v1269_v21  ;;  %v1262_v41 = vsel %vm1206_vm2, %v1261_v13, %v1260_v28  ;;  %v401_v55 = vunpack.c.l.bf16 %v273_v6  ;;  %v409_v58 = vunpack.c.l.bf16 %v281_v9  ;;  %v4645_v27 = vld [vmem:[%s4152_s30 + $0x69] sm:$0x1]  ;;  %v1368_v25 = vld [vmem:[#allocation2 + $0x24] sm:$0x1]  ;;  %v4648_v6 = vld [vmem:[%s4152_s30 + $0x6a] sm:$0x1] }
  0x87   : > { %v1273_v42 = vsel %vm1203_vm1, %v1272_v24, %v1271_v30  ;;  %v1264_v36 = vsel %vm1209_vm3, %v1263_v14, %v1262_v41  ;;  %v417_v56 = vunpack.c.l.bf16 %v289_v15  ;;  %v425_v54 = vunpack.c.l.bf16 %v297_v52  ;;  %v4651_v9 = vld [vmem:[%s4152_s30 + $0x6b] sm:$0x1]  ;;  %v1374_v13 = vld [vmem:[#allocation2 + $0x2c] sm:$0x1]  ;;  %v4660_v52 = vld [vmem:[%s4152_s30 + $0x6d] sm:$0x1] }
  0x88   : > { %v1275_v39 = vsel %vm1206_vm2, %v1274_v19, %v1273_v42  ;;  %v1266_v29 = vsel %vm1212_vm4, %v1265_v16, %v1264_v36  ;;  %v505_v48 = vmax.f32 %v401_v55, %v409_v58  ;;  %v3481_v0 = vrot.slane %v4607_v33, 9  ;;  %v4657_v15 = vld [vmem:[%s4152_s30 + $0x6c] sm:$0x1]  ;;  %v4669_v22 = vld [vmem:[%s4152_s30 + $0x70] sm:$0x1] }
  0x89   : > { %v1277_v37 = vsel %vm1209_vm3, %v1276_v26, %v1275_v39  ;;  %v1268_v35 = vsel %vm1215_vm7, %v1267_v20, %v1266_v29  ;;  %v513_v49 = vmax.f32 %v417_v56, %v425_v54  ;;  %v1507_v50 = vshrl.u32 %v1439_v43, 16  ;;  %v4672_v23 = vld [vmem:[%s4152_s30 + $0x71] sm:$0x1]  ;;  %v4675_v24 = vld [vmem:[%s4152_s30 + $0x72] sm:$0x1] }
  0x8a   : > { %v1279_v5 = vsel %vm1212_vm4, %v1278_v31, %v1277_v37  ;;  %v1316_v59 = vpack.c.b16 %v1268_v35, %v1268_v35  ;;  %v3364_v51 = vrot.slane %v505_v48, 9  ;;  %v1510_v57 = vshll.u32 %v1439_v43, 16  ;;  %v4678_v19 = vld [vmem:[%s4152_s30 + $0x73] sm:$0x1]  ;;  %v4686_v41 = vld [vmem:[%s4152_s30 + $0x75] sm:$0x1] }
  0x8b   : > { %v1281_v47 = vsel %vm1215_vm7, %v1280_v32, %v1279_v5  ;;  %v3372_v3 = vrot.slane %v513_v49, 9  ;;  %v1509_v61 = vrot.slane %v1507_v50, 4  ;;  %v442_v10 = vunpack.c.l.bf16 %v4615_v18  ;;  %v4683_v32 = vld [vmem:[%s4152_s30 + $0x74] sm:$0x1]  ;;  %v4689_v42 = vld [vmem:[%s4152_s30 + $0x76] sm:$0x1] }
  0x8c   : > { %v1318_v2 = vpack.c.b16 %v1281_v47, %v1281_v47  ;;  %v1372_v11 = vsel %vm4222_vm13, %v1316_v59, %v1371_v40  ;;  %v825_v12 = vmax.f32 %v505_v48, %v3364_v51  ;;  %v1512_v14 = vrot.slane %v1510_v57, 5  ;;  %v338_v55 = vld [vmem:[%s4152_s30 + $0x78] sm:$0x1]  ;;  %v339_v39 = vld [vmem:[%s4152_s30 + $0x79] sm:$0x1] }
  0x8d   : > { %v443_v16 = vunpack.c.l.bf16 %v4618_v60  ;;  %1373 = vst [vmem:[#allocation2 + $0x28] sm:$0xf] %v1372_v11  ;;  %v833_v21 = vmax.f32 %v513_v49, %v3372_v3  ;;  %v444_v26 = vunpack.c.l.bf16 %v4624_v34  ;;  %v445_v28 = vunpack.c.l.bf16 %v4627_v8  ;;  %v340_v40 = vld [vmem:[%s4152_s30 + $0x7a] sm:$0x1]  ;;  %v341_v56 = vld [vmem:[%s4152_s30 + $0x7b] sm:$0x1] }
  0x8e   : > { %v1378_v20 = vsel %vm4222_vm13, %v1318_v2, %v1377_v45  ;;  %v3679_v30 = vpack.c.bf16 %v825_v12, %v825_v12  ;;  %v1513_v31 = vor.u32 %v1512_v14, %v1509_v61  ;;  %v446_v58 = vunpack.c.l.bf16 %v4632_v38  ;;  %v342_v48 = vld [vmem:[%s4152_s30 + $0x7c] sm:$0x1]  ;;  %v343_v34 = vld [vmem:[%s4152_s30 + $0x7d] sm:$0x1] }
  0x8f   : > { %1379 = vst [vmem:[#allocation2 + $0x30] sm:$0xf] %v1378_v20  ;;  %v447_v43 = vunpack.c.l.bf16 %v4635_v46  ;;  %v3680_v36 = vpack.c.bf16 %v833_v21, %v833_v21  ;;  %v448_v54 = vunpack.c.l.bf16 %v4639_v62  ;;  %v450_v60 = vunpack.c.l.bf16 %v4642_v7  ;;  %v344_v46 = vld [vmem:[%s4152_s30 + $0x7e] sm:$0x1] }
  0x90   : > { %v451_v29 = vunpack.c.l.bf16 %v4645_v27  ;;  %v1369_v37 = vsel %vm4292_vm5, %v3679_v30, %v1368_v25  ;;  %v4702_v45 = vrot.slane %v1513_v31, 4  ;;  %v452_v8 = vunpack.c.l.bf16 %v4648_v6 }
  0x91   : > { %v453_v35 = vunpack.c.l.bf16 %v4651_v9  ;;  %1370 = vst [vmem:[#allocation2 + $0x24] sm:$0x1] %v1369_v37  ;;  %v1375_v5 = vsel %vm4292_vm5, %v3680_v36, %v1374_v13  ;;  %v454_v49 = vunpack.c.l.bf16 %v4657_v15  ;;  %v455_v50 = vunpack.c.l.bf16 %v4660_v52 }
  0x92   : > { %v456_v38 = vunpack.c.l.bf16 %v4663_v17  ;;  %1376 = vst [vmem:[#allocation2 + $0x2c] sm:$0x1] %v1375_v5  ;;  %v458_v47 = vunpack.c.l.bf16 %v4669_v22  ;;  %v459_v59 = vunpack.c.l.bf16 %v4672_v23  ;;  %v460_v51 = vunpack.c.l.bf16 %v4675_v24 }
  0x93   : > { %v461_v57 = vunpack.c.l.bf16 %v4678_v19  ;;  %v462_v62 = vunpack.c.l.bf16 %v4683_v32  ;;  %v463_v7 = vunpack.c.l.bf16 %v4686_v41  ;;  %v464_v27 = vunpack.c.l.bf16 %v4689_v42 }
  0x94   : > { %v466_v2 = vunpack.c.l.bf16 %v338_v55  ;;  %v1592_v3 = vld [vmem:[#allocation2 + $0x28] sm:$0xe]  ;;  %v467_v61 = vunpack.c.l.bf16 %v339_v39  ;;  %v468_v6 = vunpack.c.l.bf16 %v340_v40  ;;  %v469_v9 = vunpack.c.l.bf16 %v341_v56 }
  0x95   : > { %v1441_v25 = vld [vmem:[#allocation2 + $0x28] sm:$0xf]  ;;  %v470_v11 = vunpack.c.l.bf16 %v342_v48  ;;  %v3482_v13 = vrot.slane %v1592_v3, 9  ;;  %v471_v15 = vunpack.c.l.bf16 %v343_v34  ;;  %v472_v52 = vunpack.c.l.bf16 %v344_v46 }
  0x96   : > { %v3985_v12 = vld [vmem:[#allocation2 + $0x28] ss:$8 sps:$4 sm:$0xff]   ;;  %v1521_v14 = vshrl.u32 %v1441_v25, 16  ;;  %v1524_v17 = vshll.u32 %v1441_v25, 16  ;;  %v522_v20 = vmax.f32 %v442_v10, %v450_v60  ;;  %v523_v21 = vmax.f32 %v443_v16, %v451_v29 }
  0x97   : > { %v524_v22 = vmax.f32 %v444_v26, %v452_v8  ;;  %2931 = vmatprep.mubr.bf16.mxu1 %v3985_v12  ;;  %v525_v24 = vmax.f32 %v445_v28, %v453_v35  ;;  %v526_v19 = vmax.f32 %v446_v58, %v454_v49  ;;  %v527_v30 = vmax.f32 %v447_v43, %v455_v50 }
  0x98   : > { %v1523_v23 = vrot.slane %v1521_v14, 4  ;;  %v1591_v31 = vld [vmem:[#allocation2 + $0x24] sm:$0x1]  ;;  %v1526_v41 = vrot.slane %v1524_v17, 5  ;;  %v528_v42 = vmax.f32 %v448_v54, %v456_v38  ;;  %v530_v55 = vmax.f32 %v458_v47, %v466_v2 }
  0x99   : > { %v1440_v32 = vld [vmem:[#allocation2 + $0x24] sm:$0x1]  ;;  %v531_v36 = vmax.f32 %v459_v59, %v467_v61  ;;  %v1593_v39 = vld [vmem:[#allocation2 + $0x2c] sm:$0x1]  ;;  %v1635_v40 = vrot.slane %v1591_v31, 5  ;;  %v532_v48 = vmax.f32 %v460_v51, %v468_v6  ;;  %v533_v18 = vmax.f32 %v461_v57, %v469_v9 }
  0x9a   : > { %v1442_v56 = vld [vmem:[#allocation2 + $0x2c] sm:$0x1]  ;;  %v1516_v37 = vshll.u32 %v1440_v32, 16  ;;  %v1639_v10 = vrot.slane %v1593_v39, 5  ;;  %v1527_v16 = vor.u32 %v1526_v41, %v1523_v23  ;;  %v534_v60 = vmax.f32 %v462_v62, %v470_v11 }
  0x9b   : > { %v1530_v26 = vshll.u32 %v1442_v56, 16  ;;  %v1636_v28 = vsel %vm4212_vm12, %v3481_v0, %v1635_v40  ;;  %v535_v43 = vmax.f32 %v463_v7, %v471_v15  ;;  %v536_v54 = vmax.f32 %v464_v27, %v472_v52  ;;  %v3994_v0 = vld [vmem:[#allocation2 + $0x20] ss:$8 sps:$4 sm:$0xff]  }
  0x9c   : > { %v1518_v58 = vrot.slane %v1516_v37, 5  ;;  %v1640_v29 = vsel %vm4212_vm12, %v3482_v13, %v1639_v10  ;;  %v1528_v34 = vrot.slane %v1527_v16, 4  ;;  %v3381_v35 = vrot.slane %v522_v20, 9 }
  0x9d   : > { %v1532_v8 = vrot.slane %v1530_v26, 5  ;;  %v3487_v5 = vcombine.low %v1636_v28, %v1640_v29  ;;  %v3382_v50 = vrot.slane %v523_v21, 9  ;;  %v3383_v38 = vrot.slane %v524_v22, 9 }
  0x9e   : > { %v1519_v49 = vsel %vm4312_vm6, %v4702_v45, %v1518_v58  ;;  %v3384_v46 = vrot.slane %v525_v24, 9  ;;  %v3385_v47 = vrot.slane %v526_v19, 9  ;;  %v3386_v59 = vrot.slane %v527_v30, 9 }
  0x9f   : > { %v1533_v33 = vsel %vm4312_vm6, %v1528_v34, %v1532_v8  ;;  %2932 = vmatmul.mubr.bf16.gmra.mrb[8].mxu1 %v3487_v5  ;;  %v3387_v57 = vrot.slane %v528_v42, 9  ;;  %v3389_v62 = vrot.slane %v530_v55, 9  ;;  %v3390_v7 = vrot.slane %v531_v36, 9 }
  0xa0   : > { %v3475_v51 = vcombine.low %v1519_v49, %v1533_v33  ;;  %v3391_v27 = vrot.slane %v532_v48, 9  ;;  %v3392_v2 = vrot.slane %v533_v18, 9  ;;  %v3393_v3 = vrot.slane %v534_v60, 9 }
  0xa1   : > { %v3394_v25 = vrot.slane %v535_v43, 9  ;;  %v3395_v45 = vrot.slane %v536_v54, 9  ;;  %v842_v61 = vmax.f32 %v522_v20, %v3381_v35  ;;  %v843_v6 = vmax.f32 %v523_v21, %v3382_v50  ;;  %v305_v50 = vld [vmem:[%s4152_s30 + $0x57] sm:$0x1] }
  0xa2   : > { %2866 = vmatprep.mubr.bf16.mxu0 %v3475_v51  ;;  %v844_v9 = vmax.f32 %v524_v22, %v3383_v38  ;;  %v845_v11 = vmax.f32 %v525_v24, %v3384_v46  ;;  %v846_v12 = vmax.f32 %v526_v19, %v3385_v47  ;;  %v847_v13 = vmax.f32 %v527_v30, %v3386_v59  ;;  %v313_v47 = vld [vmem:[%s4152_s30 + $0x5f] sm:$0x1] }
  0xa3   : > { %2867 = vmatmul.mubr.bf16.gmra.mrb[8].mxu0 %v3994_v0  ;;  %v848_v14 = vmax.f32 %v528_v42, %v3387_v57  ;;  %v850_v15 = vmax.f32 %v530_v55, %v3389_v62  ;;  %v851_v52 = vmax.f32 %v531_v36, %v3390_v7  ;;  %v852_v17 = vmax.f32 %v532_v48, %v3391_v27  ;;  %v321_v7 = vld [vmem:[%s4152_s30 + $0x67] sm:$0x1] }
  0xa4   : > { %v853_v23 = vmax.f32 %v533_v18, %v3392_v2  ;;  %v854_v31 = vmax.f32 %v534_v60, %v3393_v3  ;;  %v855_v32 = vmax.f32 %v535_v43, %v3394_v25  ;;  %v856_v41 = vmax.f32 %v536_v54, %v3395_v45  ;;  %v329_v45 = vld [vmem:[%s4152_s30 + $0x6f] sm:$0x1] }
  0xa5   : > { %v3660_v39 = vpack.c.bf16 %v842_v61, %v842_v61  ;;  %v3661_v40 = vpack.c.bf16 %v843_v6, %v843_v6  ;;  %v3662_v56 = vpack.c.bf16 %v844_v9, %v844_v9  ;;  %v3663_v37 = vpack.c.bf16 %v845_v11, %v845_v11 }
  0xa6   : > { %v3664_v10 = vpack.c.bf16 %v846_v12, %v846_v12  ;;  %v3665_v20 = vpack.c.bf16 %v847_v13, %v847_v13  ;;  %v3666_v21 = vpack.c.bf16 %v848_v14, %v848_v14  ;;  %v3668_v22 = vpack.c.bf16 %v850_v15, %v850_v15 }
  0xa7   : > { %v3669_v16 = vpack.c.bf16 %v851_v52, %v851_v52  ;;  %v3670_v24 = vpack.c.bf16 %v852_v17, %v852_v17  ;;  %v3671_v19 = vpack.c.bf16 %v853_v23, %v853_v23  ;;  %v3672_v30 = vpack.c.bf16 %v854_v31, %v854_v31  ;;  %v1443_v52 = vld [vmem:[#allocation2 + $0x30] sm:$0xf] }
  0xa8   : > { %v3673_v42 = vpack.c.bf16 %v855_v32, %v855_v32  ;;  %v3674_v55 = vpack.c.bf16 %v856_v41, %v856_v41  ;;  %v1182_v36 = vunpack.c.l.b16 %v3660_v39  ;;  %v1183_v48 = vunpack.c.l.b16 %v3661_v40 }
  0xa9   : > { %v1184_v18 = vunpack.c.l.b16 %v3662_v56  ;;  %v1185_v26 = vunpack.c.l.b16 %v3663_v37  ;;  %v1186_v60 = vunpack.c.l.b16 %v3664_v10  ;;  %v1187_v28 = vunpack.c.l.b16 %v3665_v20  ;;  %v1974_v56 = vld [vmem:[#allocation2 + $0x10] sm:$0xf]  ;;  %v1383_v20 = vld [vmem:[#allocation2 + $0x38] sm:$0xf] }
  0xaa   : > { %v1188_v58 = vunpack.c.l.b16 %v3666_v21  ;;  %v1190_v43 = vunpack.c.l.b16 %v3668_v22  ;;  %v1191_v54 = vunpack.c.l.b16 %v3669_v16  ;;  %v1192_v29 = vunpack.c.l.b16 %v3670_v24  ;;  %v1389_v21 = vld [vmem:[#allocation2 + $0x40] sm:$0xf] }
  0xab   : > { %v1193_v34 = vunpack.c.l.b16 %v3671_v19  ;;  %v1194_v8 = vunpack.c.l.b16 %v3672_v30  ;;  %v1195_v35 = vunpack.c.l.b16 %v3673_v42  ;;  %v1196_v5 = vunpack.c.l.b16 %v3674_v55  ;;  %v1975_v55 = vld [vmem:[#allocation2 + $0x14] sm:$0x1] }
  0xac   : > { %v1282_v49 = vrot.slane %v1182_v36, 7  ;;  %v1283_v38 = vrot.slane %v1183_v48, 6  ;;  %v1285_v33 = vrot.slane %v1184_v18, 5  ;;  %v1287_v0 = vrot.slane %v1185_v26, 4  ;;  %v1976_v36 = vld [vmem:[#allocation2 + $0x18] sm:$0xf] }
  0xad   : > { %v1289_v46 = vrot.slane %v1186_v60, 3  ;;  %v1291_v59 = vrot.slane %v1187_v28, 2  ;;  %v1293_v51 = vrot.slane %v1188_v58, 1  ;;  %v1295_v57 = vrot.slane %v1190_v43, 7  ;;  %v4750_v26 = vld [vmem:[#allocation2 + $0x30] sm:$0xe] }
  0xae   : > { %v1296_v62 = vrot.slane %v1191_v54, 6  ;;  %v1284_v27 = vsel %vm1200_vm0, %v1283_v38, %v1282_v49  ;;  %v1298_v2 = vrot.slane %v1192_v29, 5  ;;  %v1300_v3 = vrot.slane %v1193_v34, 4  ;;  %v1380_v54 = vld [vmem:[#allocation2 + $0x34] sm:$0x1] }
  0xaf   : > { %v1302_v25 = vrot.slane %v1194_v8, 3  ;;  %v1286_v61 = vsel %vm1203_vm1, %v1285_v33, %v1284_v27  ;;  %v1304_v9 = vrot.slane %v1195_v35, 2  ;;  %v1306_v11 = vrot.slane %v1196_v5, 1  ;;  %v1977_v34 = vld [vmem:[#allocation2 + $0x1c] sm:$0x1] }
  0xb0   : > { %v1297_v6 = vsel %vm1200_vm0, %v1296_v62, %v1295_v57  ;;  %v1288_v12 = vsel %vm1206_vm2, %v1287_v0, %v1286_v61  ;;  %v433_v14 = vunpack.c.l.bf16 %v305_v50  ;;  %v441_v15 = vunpack.c.l.bf16 %v313_v47  ;;  %v1386_v49 = vld [vmem:[#allocation2 + $0x3c] sm:$0x1]  ;;  %v1853_v33 = vld [vmem:[#allocation2 + $0x8] sm:$0xe] }
  0xb1   : > { %v1299_v13 = vsel %vm1203_vm1, %v1298_v2, %v1297_v6  ;;  %v1290_v17 = vsel %vm1209_vm3, %v1289_v46, %v1288_v12  ;;  %v449_v31 = vunpack.c.l.bf16 %v321_v7  ;;  %v457_v32 = vunpack.c.l.bf16 %v329_v45  ;;  %v1855_v2 = vld [vmem:[#allocation2 + $0x10] sm:$0xe]  ;;  %v1705_v6 = vld [vmem:[#allocation2 + $0x8] sm:$0xf] }
  0xb2   : > { %v1301_v23 = vsel %vm1206_vm2, %v1300_v3, %v1299_v13  ;;  %v1292_v41 = vsel %vm1212_vm4, %v1291_v59, %v1290_v17  ;;  %v521_v40 = vmax.f32 %v433_v14, %v441_v15  ;;  %v1535_v16 = vshrl.u32 %v1443_v52, 16  ;;  %v337_v15 = vld [vmem:[%s4152_s30 + $0x77] sm:$0x1] }
  0xb3   : > { %v1303_v39 = vsel %vm1209_vm3, %v1302_v25, %v1301_v23  ;;  %v1294_v37 = vsel %vm1215_vm7, %v1293_v51, %v1292_v41  ;;  %v529_v22 = vmax.f32 %v449_v31, %v457_v32  ;;  %v1538_v42 = vshll.u32 %v1443_v52, 16  ;;  %v1854_v51 = vld [vmem:[#allocation2 + $0xc] sm:$0x1]  ;;  %v345_v32 = vld [vmem:[%s4152_s30 + $0x7f] sm:$0x1] }
  0xb4   : > { %v1305_v10 = vsel %vm1212_vm4, %v1304_v9, %v1303_v39  ;;  %v1320_v19 = vpack.c.b16 %v1294_v37, %v1294_v37  ;;  %v3380_v30 = vrot.slane %v521_v40, 9  ;;  %v1537_v60 = vrot.slane %v1535_v16, 4  ;;  %v1706_v9 = vld [vmem:[#allocation2 + $0xc] sm:$0x1]  ;;  %v1707_v39 = vld [vmem:[#allocation2 + $0x10] sm:$0xf] }
  0xb5   : > { %v1307_v24 = vsel %vm1215_vm7, %v1306_v11, %v1305_v10  ;;  %v3388_v18 = vrot.slane %v529_v22, 9  ;;  %v1991_v28 = vshrl.u32 %v1974_v56, 16  ;;  %v1540_v29 = vrot.slane %v1538_v42, 5 }
  0xb6   : > { %v1322_v48 = vpack.c.b16 %v1307_v24, %v1307_v24  ;;  %v1384_v58 = vsel %vm4222_vm13, %v1320_v19, %v1383_v20  ;;  %v841_v43 = vmax.f32 %v521_v40, %v3380_v30  ;;  %v1994_v8 = vshll.u32 %v1974_v56, 16 }
  0xb7   : > { %1385 = vst [vmem:[#allocation2 + $0x38] sm:$0xf] %v1384_v58  ;;  %v849_v5 = vmax.f32 %v529_v22, %v3388_v18  ;;  %v1993_v50 = vrot.slane %v1991_v28, 4  ;;  %v2000_v38 = vshll.u32 %v1975_v55, 16  ;;  %v3483_v46 = vrot.slane %v4750_v26, 9 }
  0xb8   : > { %v1390_v35 = vsel %vm4222_vm13, %v1322_v48, %v1389_v21  ;;  %v3681_v0 = vpack.c.bf16 %v841_v43, %v841_v43  ;;  %v1996_v47 = vrot.slane %v1994_v8, 5  ;;  %v2005_v59 = vshrl.u32 %v1976_v36, 16  ;;  %v1708_v58 = vld [vmem:[#allocation2 + $0x14] sm:$0x1] }
  0xb9   : > { %1391 = vst [vmem:[#allocation2 + $0x40] sm:$0xf] %v1390_v35  ;;  %v3682_v57 = vpack.c.bf16 %v849_v5, %v849_v5  ;;  %v1541_v62 = vor.u32 %v1540_v29, %v1537_v60  ;;  %v2008_v7 = vshll.u32 %v1976_v36, 16  ;;  %v2014_v27 = vshll.u32 %v1977_v34, 16 }
  0xba   : > { %v1381_v3 = vsel %vm4292_vm5, %v3681_v0, %v1380_v54  ;;  %v1997_v25 = vor.u32 %v1996_v47, %v1993_v50  ;;  %v2002_v45 = vrot.slane %v2000_v38, 5  ;;  %v2007_v61 = vrot.slane %v2005_v59, 4 }
  0xbb   : > { %1382 = vst [vmem:[#allocation2 + $0x34] sm:$0x1] %v1381_v3  ;;  %v1387_v11 = vsel %vm4292_vm5, %v3682_v57, %v1386_v49  ;;  %v2010_v12 = vrot.slane %v2008_v7, 5  ;;  %v2016_v13 = vrot.slane %v2014_v27, 5  ;;  %v3497_v14 = vrot.slane %v1853_v33, 9 }
  0xbc   : > { %1388 = vst [vmem:[#allocation2 + $0x3c] sm:$0x1] %v1387_v11  ;;  %v1998_v52 = vrot.slane %v1997_v25, 4  ;;  %v1887_v17 = vrot.slane %v1854_v51, 5  ;;  %v3498_v23 = vrot.slane %v1855_v2, 9  ;;  %v1891_v31 = vrot.slane %v1856_v4, 5 }
  0xbd   : > { %v2011_v41 = vor.u32 %v2010_v12, %v2007_v61  ;;  %v1722_v40 = vshrl.u32 %v1705_v6, 16  ;;  %v1725_v56 = vshll.u32 %v1705_v6, 16  ;;  %v1731_v37 = vshll.u32 %v1706_v9, 16  ;;  %v1978_v57 = vld [vmem:[#allocation2 + $0x20] sm:$0xf] }
  0xbe   : > { %v1596_v10 = vld [vmem:[#allocation2 + $0x38] sm:$0xe]  ;;  %v4765_v21 = vsel %vm4212_vm12, %v3497_v14, %v1887_v17  ;;  %v4769_v22 = vsel %vm4212_vm12, %v3498_v23, %v1891_v31  ;;  %v465_v16 = vunpack.c.l.bf16 %v337_v15  ;;  %v1542_v19 = vrot.slane %v1541_v62, 4  ;;  %v1979_v4 = vld [vmem:[#allocation2 + $0x24] sm:$0x1] }
  0xbf   : > { %v1445_v20 = vld [vmem:[#allocation2 + $0x38] sm:$0xf]  ;;  %v2003_v42 = vsel %vm4312_vm6, %v1998_v52, %v2002_v45  ;;  %v473_v55 = vunpack.c.l.bf16 %v345_v32  ;;  %v3484_v36 = vrot.slane %v1596_v10, 9  ;;  %v2012_v18 = vrot.slane %v2011_v41, 4  ;;  %v1980_v6 = vld [vmem:[#allocation2 + $0x28] sm:$0xf] }
  0xc0   : > { %v3995_v24 = vld [vmem:[#allocation2 + $0x38] ss:$8 sps:$4 sm:$0xff]   ;;  %v1549_v30 = vshrl.u32 %v1445_v20, 16  ;;  %v1552_v48 = vshll.u32 %v1445_v20, 16  ;;  %v3505_v60 = vcombine.low %v4765_v21, %v4769_v22  ;;  %v1724_v43 = vrot.slane %v1722_v40, 4 }
  0xc1   : > { %2939 = vmatprep.mubr.bf16.mxu1 %v3995_v24  ;;  %v1727_v54 = vrot.slane %v1725_v56, 5  ;;  %v4775_v29 = vrot.slane %v1731_v37, 5  ;;  %v2017_v5 = vsel %vm4312_vm6, %v2012_v18, %v2016_v13  ;;  %v1736_v49 = vshrl.u32 %v1707_v39, 16  ;;  %v1857_v14 = vld [vmem:[#allocation2 + $0x18] sm:$0xe] }
  0xc2   : > { %v1551_v28 = vrot.slane %v1549_v30, 4  ;;  %v1595_v34 = vld [vmem:[#allocation2 + $0x34] sm:$0x1]  ;;  %v1554_v35 = vrot.slane %v1552_v48, 5  ;;  %v4779_v50 = vmax.f32 %v465_v16, %v473_v55  ;;  %v3513_v59 = vcombine.low %v2003_v42, %v2017_v5  ;;  %v1981_v17 = vld [vmem:[#allocation2 + $0x2c] sm:$0x1] }
  0xc3   : > { %v1444_v8 = vld [vmem:[#allocation2 + $0x34] sm:$0x1]  ;;  %v1597_v38 = vld [vmem:[#allocation2 + $0x3c] sm:$0x1]  ;;  %v1643_v33 = vrot.slane %v1595_v34, 5  ;;  %v1728_v51 = vor.u32 %v1727_v54, %v1724_v43  ;;  %v1738_v2 = vrot.slane %v1736_v49, 4 }
  0xc4   : > { %v1446_v0 = vld [vmem:[#allocation2 + $0x3c] sm:$0x1]  ;;  %v1544_v47 = vshll.u32 %v1444_v8, 16  ;;  %v1647_v62 = vrot.slane %v1597_v38, 5  ;;  %v1555_v7 = vor.u32 %v1554_v35, %v1551_v28  ;;  %v1739_v61 = vshll.u32 %v1707_v39, 16 }
  0xc5   : > { %v1558_v27 = vshll.u32 %v1446_v0, 16  ;;  %v1644_v3 = vsel %vm4212_vm12, %v3483_v46, %v1643_v33  ;;  %v1729_v45 = vrot.slane %v1728_v51, 4  ;;  %v1745_v13 = vshll.u32 %v1708_v58, 16  ;;  %v1858_v23 = vld [vmem:[#allocation2 + $0x1c] sm:$0x1] }
  0xc6   : > { %v1546_v25 = vrot.slane %v1544_v47, 5  ;;  %v1648_v9 = vsel %vm4212_vm12, %v3484_v36, %v1647_v62  ;;  %v1556_v11 = vrot.slane %v1555_v7, 4  ;;  %v1741_v46 = vrot.slane %v1739_v61, 5  ;;  %v4004_v32 = vld [vmem:[#allocation2 + $0x30] ss:$8 sps:$4 sm:$0xff]   ;;  %v4804_v7 = vld [vmem:[%s4964_s1 + $0x208] sm:$0xff]  }
  0xc7   : > { %v1560_v12 = vrot.slane %v1558_v27, 5  ;;  %v3488_v15 = vcombine.low %v1644_v3, %v1648_v9  ;;  %v1734_v26 = vsel %vm4312_vm6, %v1729_v45, %v4775_v29  ;;  %v1747_v41 = vrot.slane %v1745_v13, 5  ;;  %v1859_v56 = vld [vmem:[#allocation2 + $0x20] sm:$0xe]  ;;  %v1709_v24 = vld [vmem:[#allocation2 + $0x18] sm:$0xf] }
  0xc8   : > { %v1547_v52 = vsel %vm4312_vm6, %v1542_v19, %v1546_v25  ;;  %v2019_v39 = vshrl.u32 %v1978_v57, 16  ;;  %v2022_v40 = vshll.u32 %v1978_v57, 16  ;;  %v1742_v10 = vor.u32 %v1741_v46, %v1738_v2  ;;  %v1860_v36 = vld [vmem:[#allocation2 + $0x24] sm:$0x1]  ;;  %v4006_v48 = vld [vmem:[#allocation2 + $0x10] ss:$8 sps:$4 sm:$0xff]  }
  0xc9   : > { %v1561_v31 = vsel %vm4312_vm6, %v1556_v11, %v1560_v12  ;;  %2940 = vmatmul.mubr.bf16.gmra.mrb[12].mxu1 %v3488_v15  ;;  %v2028_v20 = vshll.u32 %v1979_v4, 16  ;;  %v2033_v16 = vshrl.u32 %v1980_v6, 16  ;;  %v2036_v42 = vshll.u32 %v1980_v6, 16  ;;  %v1710_v35 = vld [vmem:[#allocation2 + $0x1c] sm:$0x1]  ;;  %v4816_v15 = vld [vmem:[%s4964_s1 + $0x210] sm:$0xff]  }
  0xca   : > { %v3476_v37 = vcombine.low %v1547_v52, %v1561_v31  ;;  %3045 = vmatprep.mubr.bf16.mxu1 %v3513_v59  ;;  %v2021_v19 = vrot.slane %v2019_v39, 4  ;;  %v2024_v30 = vrot.slane %v2022_v40, 5  ;;  %v2042_v55 = vshll.u32 %v1981_v17, 16  ;;  %v1711_v33 = vld [vmem:[#allocation2 + $0x20] sm:$0xf] }
  0xcb   : > { %v1743_v18 = vrot.slane %v1742_v10, 4  ;;  %v2030_v28 = vrot.slane %v2028_v20, 5  ;;  %v2035_v58 = vrot.slane %v2033_v16, 4  ;;  %v3499_v43 = vrot.slane %v1857_v14, 9  ;;  %v1712_v62 = vld [vmem:[#allocation2 + $0x24] sm:$0x1] }
  0xcc   : > { %2874 = vmatprep.mubr.bf16.mxu0 %v3476_v37  ;;  %v2025_v54 = vor.u32 %v2024_v30, %v2021_v19  ;;  %v2038_v29 = vrot.slane %v2036_v42, 5  ;;  %v2044_v34 = vrot.slane %v2042_v55, 5  ;;  %v1895_v8 = vrot.slane %v1858_v23, 5  ;;  %v1982_v2 = vld [vmem:[#allocation2 + $0x30] sm:$0xf] }
  0xcd   : > { %2875 = vmatmul.mubr.bf16.gmra.mrb[12].mxu0 %v4004_v32  ;;  %v1748_v5 = vsel %vm4312_vm6, %v1743_v18, %v1747_v41  ;;  %v3500_v49 = vrot.slane %v1859_v56, 9  ;;  %v1899_v38 = vrot.slane %v1860_v36, 5  ;;  %v1750_v0 = vshrl.u32 %v1709_v24, 16  ;;  %v1984_v61 = vld [vmem:[#allocation2 + $0x38] sm:$0xf] }
  0xce   : > { %2980 = vmatprep.mubr.bf16.mxu0 %v3505_v60  ;;  %v3493_v47 = vcombine.low %v1734_v26, %v1748_v5  ;;  %v2026_v59 = vrot.slane %v2025_v54, 4  ;;  %v2039_v51 = vor.u32 %v2038_v29, %v2035_v58  ;;  %v1896_v57 = vsel %vm4212_vm12, %v3499_v43, %v1895_v8  ;;  %v1983_v13 = vld [vmem:[#allocation2 + $0x34] sm:$0x1]  ;;  %v1985_v26 = vld [vmem:[#allocation2 + $0x3c] sm:$0x1] }
  0xcf   : > { %v1900_v21 = vsel %vm4212_vm12, %v3500_v49, %v1899_v38  ;;  %v1752_v22 = vrot.slane %v1750_v0, 4  ;;  %v1753_v60 = vshll.u32 %v1709_v24, 16  ;;  %v1759_v27 = vshll.u32 %v1710_v35, 16  ;;  %v4011_v31 = vld [vmem:[#allocation2 + $0x20] ss:$8 sps:$4 sm:$0xff]  }
  0xd0   : > { %v2031_v4 = vsel %vm4312_vm6, %v2026_v59, %v2030_v28  ;;  %v2040_v3 = vrot.slane %v2039_v51, 4  ;;  %v3506_v25 = vcombine.low %v1896_v57, %v1900_v21  ;;  %v1764_v45 = vshrl.u32 %v1711_v33, 16  ;;  %v1861_v40 = vld [vmem:[#allocation2 + $0x28] sm:$0xe]  ;;  %v1862_v56 = vld [vmem:[#allocation2 + $0x2c] sm:$0x1] }
  0xd1   : > { %3046 = vmatmul.mubr.bf16.vlgmr.msra.gmra.mrb[16].mxu1 %v4006_v48  ;;  %v1755_v6 = vrot.slane %v1753_v60, 5  ;;  %v1761_v9 = vrot.slane %v1759_v27, 5  ;;  %v1767_v11 = vshll.u32 %v1711_v33, 16  ;;  %v1773_v12 = vshll.u32 %v1712_v62, 16  ;;  %v1863_v24 = vld [vmem:[#allocation2 + $0x30] sm:$0xe] }
  0xd2   : > { %3919 = vmatpush3.bf16.msra.mxu1 %v4591_v1  ;;  %v2045_v14 = vsel %vm4312_vm6, %v2040_v3, %v2044_v34  ;;  %v1766_v52 = vrot.slane %v1764_v45, 4  ;;  %v2047_v46 = vshrl.u32 %v1982_v2, 16  ;;  %v2050_v17 = vshll.u32 %v1982_v2, 16  ;;  %v1864_v36 = vld [vmem:[#allocation2 + $0x34] sm:$0x1]  ;;  %v4843_v2 = vld [vmem:[%s4964_s1 + $0x220] sm:$0xff]  }
  0xd3   : > { %3912 = vmatprep.subr.bf16.mxu1 %v4804_v7  ;;  %v3514_v23 = vcombine.low %v2031_v4, %v2045_v14  ;;  %v1756_v32 = vor.u32 %v1755_v6, %v1752_v22  ;;  %v1769_v41 = vrot.slane %v1767_v11, 5  ;;  %v1775_v39 = vrot.slane %v1773_v12, 5  ;;  %v1713_v43 = vld [vmem:[#allocation2 + $0x28] sm:$0xf]  ;;  %v1714_v35 = vld [vmem:[#allocation2 + $0x2c] sm:$0x1] }
  0xd4   : > { %v2049_v37 = vrot.slane %v2047_v46, 4  ;;  %v2052_v10 = vrot.slane %v2050_v17, 5  ;;  %v2056_v20 = vshll.u32 %v1983_v13, 16  ;;  %v2061_v16 = vshrl.u32 %v1984_v61, 16  ;;  %v1715_v59 = vld [vmem:[#allocation2 + $0x30] sm:$0xf] }
  0xd5   : > { %2981 = vmatmul.mubr.bf16.vlgmr.msra.gmra.mrb[16].mxu0 %v3493_v47  ;;  %3053 = vmatprep.mubr.bf16.mxu1 %v3514_v23  ;;  %v1757_v19 = vrot.slane %v1756_v32, 4  ;;  %v1770_v30 = vor.u32 %v1769_v41, %v1766_v52  ;;  %v2064_v42 = vshll.u32 %v1984_v61, 16  ;;  %v2070_v55 = vshll.u32 %v1985_v26, 16  ;;  %v1716_v60 = vld [vmem:[#allocation2 + $0x34] sm:$0x1] }
  0xd6   : > { %3888 = vmatpush3.bf16.msra.mxu0 %v4591_v1  ;;  %3920 = vmatpush3.bf16.msra.mxu1 %v4804_v7  ;;  %v2053_v48 = vor.u32 %v2052_v10, %v2049_v37  ;;  %v2058_v18 = vrot.slane %v2056_v20, 5  ;;  %v2063_v28 = vrot.slane %v2061_v16, 4  ;;  %v3501_v58 = vrot.slane %v1861_v40, 9  ;;  %v4826_v1 = vld [vmem:[%s4964_s1 + $0x218] sm:$0xff]   ;;  %v1986_v45 = vld [vmem:[#allocation2 + $0x40] sm:$0xf] }
  0xd7   : > { %3889 = vmatprep.subr.bf16.mxu0 %v4804_v7  ;;  %3913 = vmatprep.subr.bf16.mxu1 %v4816_v15  ;;  %v1762_v54 = vsel %vm4312_vm6, %v1757_v19, %v1761_v9  ;;  %v1771_v29 = vrot.slane %v1770_v30, 4  ;;  %v2066_v34 = vrot.slane %v2064_v42, 5  ;;  %v2072_v8 = vrot.slane %v2070_v55, 5  ;;  %v4014_v13 = vld [vmem:[#allocation2 + $0x30] ss:$8 sps:$4 sm:$0xff]  }
  0xd8   : > { %2988 = vmatprep.mubr.bf16.mxu0 %v3506_v25  ;;  %v2054_v5 = vrot.slane %v2053_v48, 4  ;;  %v1903_v49 = vrot.slane %v1862_v56, 5  ;;  %v3502_v38 = vrot.slane %v1863_v24, 9  ;;  %v1907_v33 = vrot.slane %v1864_v36, 5  ;;  %v1988_v46 = vld [vmem:[#allocation2 + $0x48] sm:$0xf] }
  0xd9   : > { %3054 = vmatmul.mubr.bf16.gmra.mrb[20].mxu1 %v4011_v31  ;;  %v1776_v0 = vsel %vm4312_vm6, %v1771_v29, %v1775_v39  ;;  %v2067_v47 = vor.u32 %v2066_v34, %v2063_v28  ;;  %v1778_v51 = vshrl.u32 %v1713_v43, 16  ;;  %v1781_v57 = vshll.u32 %v1713_v43, 16  ;;  %v1989_v32 = vld [vmem:[#allocation2 + $0x4c] sm:$0x1]  ;;  %v1392_v37 = vld [vmem:[#allocation2 + $0x44] sm:$0x1] }
  0xda   : > { %3890 = vmatpush3.bf16.msra.mxu0 %v4804_v7  ;;  %3921 = vmatpush3.bf16.msra.mxu1 %v4816_v15  ;;  %v3494_v62 = vcombine.low %v1762_v54, %v1776_v0  ;;  %v2059_v21 = vsel %vm4312_vm6, %v2054_v5, %v2058_v18  ;;  %v1904_v22 = vsel %vm4212_vm12, %v3501_v58, %v1903_v49  ;;  %v1787_v7 = vshll.u32 %v1714_v35, 16  ;;  %v4860_v30 = vld [vmem:[#allocation2 + $0x38] sm:$0xe]  ;;  %v1866_v43 = vld [vmem:[#allocation2 + $0x3c] sm:$0x1]  ;;  %v4873_v29 = vld [vmem:[%s4964_s1 + $0x230] sm:$0xff]  }
  0xdb   : > { %3891 = vmatprep.subr.bf16.mxu0 %v4816_v15  ;;  %3914 = vmatprep.subr.bf16.mxu1 %v4826_v1  ;;  %v2068_v27 = vrot.slane %v2067_v47, 4  ;;  %v1908_v4 = vsel %vm4212_vm12, %v3502_v38, %v1907_v33  ;;  %v1780_v3 = vrot.slane %v1778_v51, 4  ;;  %v1783_v25 = vrot.slane %v1781_v57, 5  ;;  %v1717_v48 = vld [vmem:[#allocation2 + $0x38] sm:$0xf] }
  0xdc   : > { %v3507_v61 = vcombine.low %v1904_v22, %v1908_v4  ;;  %v1789_v6 = vrot.slane %v1787_v7, 5  ;;  %v1792_v9 = vshrl.u32 %v1715_v59, 16  ;;  %v1795_v11 = vshll.u32 %v1715_v59, 16  ;;  %v2130_v54 = vld [vmem:[#allocation2 + $0x30] sm:$0xe]  ;;  %v4886_v51 = vld [vmem:[%s4964_s1 + $0x238] sm:$0xff]  }
  0xdd   : > { %2989 = vmatmul.mubr.bf16.gmra.mrb[20].mxu0 %v3494_v62  ;;  %v2073_v12 = vsel %vm4312_vm6, %v2068_v27, %v2072_v8  ;;  %v1784_v14 = vor.u32 %v1783_v25, %v1780_v3  ;;  %v1801_v52 = vshll.u32 %v1716_v60, 16  ;;  %v3396_v26 = vrot.slane %v4779_v50, 9  ;;  %v1718_v8 = vld [vmem:[#allocation2 + $0x3c] sm:$0x1]  ;;  %v1719_v35 = vld [vmem:[#allocation2 + $0x40] sm:$0xf] }
  0xde   : > { %3892 = vmatpush3.bf16.msra.mxu0 %v4816_v15  ;;  %3922 = vmatpush3.bf16.msra.mxu1 %v4826_v1  ;;  %v3515_v17 = vcombine.low %v2059_v21, %v2073_v12  ;;  %v1794_v23 = vrot.slane %v1792_v9, 4  ;;  %v1797_v31 = vrot.slane %v1795_v11, 5  ;;  %v2075_v41 = vshrl.u32 %v1986_v45, 16  ;;  %v4857_v15 = vld [vmem:[%s4964_s1 + $0x228] sm:$0xff]   ;;  %v4878_v33 = vld [vmem:[#allocation2 + $0x40] sm:$0xe] }
  0xdf   : > { %3893 = vmatprep.subr.bf16.mxu0 %v4826_v1  ;;  %3915 = vmatprep.subr.bf16.mxu1 %v4843_v2  ;;  %v1785_v39 = vrot.slane %v1784_v14, 4  ;;  %v1803_v40 = vrot.slane %v1801_v52, 5  ;;  %v857_v56 = vmax.f32 %v4779_v50, %v3396_v26  ;;  %v2078_v10 = vshll.u32 %v1986_v45, 16  ;;  %v2131_v44 = vld [vmem:[#allocation2 + $0x34] sm:$0x1] }
  0xe0   : > { %2996 = vmatprep.mubr.bf16.mxu0 %v3507_v61  ;;  %3061 = vmatprep.mubr.bf16.mxu1 %v3515_v17  ;;  %v1798_v20 = vor.u32 %v1797_v31, %v1794_v23  ;;  %v2077_v16 = vrot.slane %v2075_v41, 4  ;;  %v2089_v24 = vshrl.u32 %v1988_v46, 16  ;;  %v2092_v19 = vshll.u32 %v1988_v46, 16  ;;  %v2132_v21 = vld [vmem:[#allocation2 + $0x38] sm:$0xe] }
  0xe1   : > { %3062 = vmatmul.mubr.bf16.gmra.mrb[24].mxu1 %v4014_v13  ;;  %v3683_v42 = vpack.c.bf16 %v857_v56, %v857_v56  ;;  %v2080_v55 = vrot.slane %v2078_v10, 5  ;;  %v2098_v36 = vshll.u32 %v1989_v32, 16  ;;  %v1790_v50 = vsel %vm4312_vm6, %v1785_v39, %v1789_v6  ;;  %v2133_v4 = vld [vmem:[#allocation2 + $0x3c] sm:$0x1]  ;;  %v4893_v61 = vld [vmem:[#allocation2 + $0x40] sm:$0xe] }
  0xe2   : > { %3894 = vmatpush3.bf16.msra.mxu0 %v4826_v1  ;;  %3923 = vmatpush3.bf16.msra.mxu1 %v4843_v2  ;;  %v1799_v18 = vrot.slane %v1798_v20, 4  ;;  %v2091_v28 = vrot.slane %v2089_v24, 4  ;;  %v2094_v58 = vrot.slane %v2092_v19, 5  ;;  %v3503_v34 = vrot.slane %v4860_v30, 9  ;;  %v4895_v11 = vld [vmem:[#allocation2 + $0x48] sm:$0xe] }
  0xe3   : > { %3895 = vmatprep.subr.bf16.mxu0 %v4843_v2  ;;  %3916 = vmatprep.subr.bf16.mxu1 %v4857_v15  ;;  %v1393_v1 = vsel %vm4292_vm5, %v3683_v42, %v1392_v37  ;;  %v2081_v49 = vor.u32 %v2080_v55, %v2077_v16  ;;  %v1806_v0 = vshrl.u32 %v1717_v48, 16  ;;  %v4880_v59 = vrot.slane %v2098_v36, 5  ;;  %v4897_v12 = vld [vmem:[#allocation2 + $0x4c] sm:$0x1]  ;;  %v2122_v46 = vld [vmem:[#allocation2 + $0x10] sm:$0xe] }
  0xe4   : > { %v1804_v5 = vsel %vm4312_vm6, %v1799_v18, %v1803_v40  ;;  %1394 = vst [vmem:[#allocation2 + $0x44] sm:$0x1] %v1393_v1  ;;  %v2095_v38 = vor.u32 %v2094_v58, %v2091_v28  ;;  %v1911_v57 = vrot.slane %v1866_v43, 5  ;;  %v1809_v62 = vshll.u32 %v1717_v48, 16  ;;  %v2123_v41 = vld [vmem:[#allocation2 + $0x14] sm:$0x1] }
  0xe5   : > { %v3495_v47 = vcombine.low %v1790_v50, %v1804_v5  ;;  %v1808_v60 = vrot.slane %v1806_v0, 4  ;;  %v1815_v7 = vshll.u32 %v1718_v8, 16  ;;  %v1820_v27 = vshrl.u32 %v1719_v35, 16  ;;  %v2124_v39 = vld [vmem:[#allocation2 + $0x18] sm:$0xe] }
  0xe6   : > { %3896 = vmatpush3.bf16.msra.mxu0 %v4843_v2  ;;  %3924 = vmatpush3.bf16.msra.mxu1 %v4857_v15  ;;  %v4889_v22 = vrot.slane %v2095_v38, 4  ;;  %v1811_v2 = vrot.slane %v1809_v62, 5  ;;  %v1823_v3 = vshll.u32 %v1719_v35, 16  ;;  %v3521_v25 = vrot.slane %v2130_v54, 9  ;;  %v2125_v55 = vld [vmem:[#allocation2 + $0x1c] sm:$0x1] }
  0xe7   : > { %3897 = vmatprep.subr.bf16.mxu0 %v4857_v15  ;;  %2997 = vmatmul.mubr.bf16.gmra.mrb[24].mxu0 %v3495_v47  ;;  %v2172_v45 = vrot.slane %v2131_v44, 5  ;;  %v1822_v6 = vrot.slane %v1820_v27, 4  ;;  %v3522_v9 = vrot.slane %v2132_v21, 9  ;;  %v3504_v13 = vrot.slane %v4878_v33, 9  ;;  %v2128_v38 = vld [vmem:[#allocation2 + $0x28] sm:$0xe] }
  0xe8   : > { %3917 = vmatprep.subr.bf16.mxu1 %v4873_v29  ;;  %v1812_v14 = vor.u32 %v1811_v2, %v1808_v60  ;;  %v1825_v52 = vrot.slane %v1823_v3, 5  ;;  %v2176_v26 = vrot.slane %v2133_v4, 5  ;;  %v2082_v17 = vrot.slane %v2081_v49, 4  ;;  %v2129_v33 = vld [vmem:[#allocation2 + $0x2c] sm:$0x1] }
  0xe9   : > { %v1912_v23 = vsel %vm4212_vm12, %v3503_v34, %v1911_v57  ;;  %v1817_v31 = vrot.slane %v1815_v7, 5  ;;  %v3523_v32 = vrot.slane %v4893_v61, 9  ;;  %v2101_v40 = vsel %vm4312_vm6, %v4889_v22, %v4880_v59  ;;  %v2126_v34 = vld [vmem:[#allocation2 + $0x20] sm:$0xe] }
  0xea   : > { %3898 = vmatpush3.bf16.msra.mxu0 %v4857_v15  ;;  %3925 = vmatpush3.bf16.msra.mxu1 %v4873_v29  ;;  %v1826_v10 = vor.u32 %v1825_v52, %v1822_v6  ;;  %v2173_v20 = vsel %vm4212_vm12, %v3521_v25, %v2172_v45  ;;  %v2177_v16 = vsel %vm4212_vm12, %v3522_v9, %v2176_v26  ;;  %v1813_v30 = vrot.slane %v1812_v14, 4  ;;  %v4017_v44 = vld [vmem:[#allocation2 + $0x40] ss:$8 sps:$4 sm:$0xff]  }
  0xeb   : > { %3899 = vmatprep.subr.bf16.mxu0 %v4873_v29  ;;  %v1987_v15 = vld [vmem:[#allocation2 + $0x44] sm:$0x1]  ;;  %3918 = vmatprep.subr.bf16.mxu1 %v4886_v51  ;;  %v3524_v50 = vrot.slane %v4895_v11, 9  ;;  %v2184_v18 = vrot.slane %v4897_v12, 5  ;;  %v3517_v28 = vrot.slane %v2122_v46, 9  ;;  %v3527_v35 = vcombine.low %v2173_v20, %v2177_v16 }
  0xec   : > { %v1868_v56 = vld [vmem:[#allocation2 + $0x44] sm:$0x1]  ;;  %v2084_v24 = vshll.u32 %v1987_v15, 16  ;;  %v1827_v36 = vrot.slane %v1826_v10, 4  ;;  %v1818_v54 = vsel %vm4312_vm6, %v1813_v30, %v1817_v31  ;;  %v2156_v5 = vrot.slane %v2123_v41, 5 }
  0xed   : > { %v1720_v37 = vld [vmem:[#allocation2 + $0x44] sm:$0x1]  ;;  %v1915_v19 = vrot.slane %v1868_v56, 5  ;;  %v3518_v49 = vrot.slane %v2124_v39, 9  ;;  %v2160_v57 = vrot.slane %v2125_v55, 5  ;;  %v3519_v60 = vrot.slane %v2126_v34, 9 }
  0xee   : > { %v1829_v42 = vshll.u32 %v1720_v37, 16  ;;  %3900 = vmatpush3.bf16.msra.mxu0 %v4873_v29  ;;  %v2135_v48 = vld [vmem:[#allocation2 + $0x44] sm:$0x1]  ;;  %v2086_v58 = vrot.slane %v2084_v24, 5  ;;  %3926 = vmatpush3.bf16.msra.mxu1 %v4886_v51  ;;  %v2157_v22 = vsel %vm4212_vm12, %v3517_v28, %v2156_v5  ;;  %v3520_v4 = vrot.slane %v2128_v38, 9 }
  0xef   : > { %v1916_v43 = vsel %vm4212_vm12, %v3504_v13, %v1915_v19  ;;  %3901 = vmatprep.subr.bf16.mxu0 %v4886_v51  ;;  %v2127_v29 = vld [vmem:[#allocation2 + $0x24] sm:$0x1]  ;;  %v2180_v59 = vrot.slane %v2135_v48, 5  ;;  %v2161_v7 = vsel %vm4212_vm12, %v3518_v49, %v2160_v57  ;;  %v2168_v2 = vrot.slane %v2129_v33, 5 }
  0xf0   : > { %v1831_v1 = vrot.slane %v1829_v42, 5  ;;  %v3508_v8 = vcombine.low %v1912_v23, %v1916_v43  ;;  %v2087_v0 = vsel %vm4312_vm6, %v2082_v17, %v2086_v58  ;;  %v2164_v27 = vrot.slane %v2127_v29, 5 }
  0xf1   : > { %v3516_v62 = vcombine.low %v2087_v0, %v2101_v40  ;;  %v3525_v53 = vcombine.low %v2157_v22, %v2161_v7  ;;  %v2181_v25 = vsel %vm4212_vm12, %v3523_v32, %v2180_v59  ;;  %v2185_v45 = vsel %vm4212_vm12, %v3524_v50, %v2184_v18 }
  0xf2   : > { %v1832_v47 = vsel %vm4312_vm6, %v1827_v36, %v1831_v1  ;;  %3004 = vmatprep.mubr.bf16.mxu0 %v3508_v8  ;;  %3902 = vmatpush3.bf16.msra.mxu0 %v4886_v51  ;;  %v2165_v3 = vsel %vm4212_vm12, %v3519_v60, %v2164_v27  ;;  %v2169_v51 = vsel %vm4212_vm12, %v3520_v4, %v2168_v2 }
  0xf3   : > { %v3496_v21 = vcombine.low %v1818_v54, %v1832_v47  ;;  %3069 = vmatprep.mubr.bf16.mxu1 %v3516_v62  ;;  %v3526_v61 = vcombine.low %v2165_v3, %v2169_v51  ;;  %v3528_v6 = vcombine.low %v2181_v25, %v2185_v45 }
  0xf4   : > { %3070 = vmatmul.mubr.bf16.gmra.mrb[28].mxu1 %v4017_v44 }
  0xf5   : > { %3005 = vmatmul.mubr.bf16.gmra.mrb[28].mxu0 %v3496_v21  ;;  %3907 = vmatprep.mubr.bf16.mxu1 %v3527_v35 }
  0xf6   : > { %3903 = vmatprep.mubr.bf16.mxu0 %v3525_v53 }
  0xfc   : > { %3908 = vmatmul.mubr.bf16.vlgmr.msra.gmra.mrb[32].mxu1 %v3528_v6 }
  0xfd   : > { %3904 = vmatmul.mubr.bf16.vlgmr.msra.gmra.mrb[32].mxu0 %v3526_v61 }
 0x11f   : > { %v3771_v9 = vpop.f32.mrb[0].mxu1 }
 0x120   : > { %v3772_v11 = vpop.f32.mrb[1].mxu1 }
 0x121   : > { %v3773_v12 = vadd.f32 %v3772_v11, %v3771_v9  ;;  %v3774_v13 = vpop.f32.mrb[2].mxu1 }
 0x122   : > { %v3775_v52 = vpop.f32.mrb[3].mxu1 }
 0x123   : > { %v3731_v14 = vpop.f32.mrb[0].mxu0  ;;  %v3776_v46 = vadd.f32 %v3775_v52, %v3774_v13 }
 0x124   : > { %v3732_v26 = vpop.f32.mrb[1].mxu0 }
 0x125   : > { %v3733_v17 = vadd.f32 %v3732_v26, %v3731_v14  ;;  %v3734_v23 = vpop.f32.mrb[2].mxu0 }
 0x126   : > { %v3735_v31 = vpop.f32.mrb[3].mxu0 }
 0x127   : > { %v2918_v32 = vadd.f32 %v3773_v12, %v3733_v17  ;;  %v3736_v41 = vadd.f32 %v3735_v31, %v3734_v23 }
 0x129   : > { %v2921_v63 = vadd.f32 %v3776_v46, %v3736_v41 }
 0x148   : > { %v3777_v39 = vpop.f32.mrb[4].mxu1 }
 0x149   : > { %v3778_v15 = vpop.f32.mrb[5].mxu1 }
 0x14a   : > { %v3779_v40 = vadd.f32 %v3778_v15, %v3777_v39  ;;  %v3780_v56 = vpop.f32.mrb[6].mxu1 }
 0x14b   : > { %v3781_v10 = vpop.f32.mrb[7].mxu1 }
 0x14c   : > { %v3737_v37 = vpop.f32.mrb[4].mxu0  ;;  %v3782_v16 = vadd.f32 %v3781_v10, %v3780_v56 }
 0x14d   : > { %v3738_v20 = vpop.f32.mrb[5].mxu0 }
 0x14e   : > { %v3739_v24 = vadd.f32 %v3738_v20, %v3737_v37  ;;  %v3740_v19 = vpop.f32.mrb[6].mxu0 }
 0x14f   : > { %v3741_v30 = vpop.f32.mrb[7].mxu0 }
 0x150   : > { %v2926_v42 = vadd.f32 %v3779_v40, %v3739_v24  ;;  %v3742_v55 = vadd.f32 %v3741_v30, %v3740_v19 }
 0x152   : > { %v2929_v36 = vadd.f32 %v3782_v16, %v3742_v55 }
 0x172   : > { %v3783_v48 = vpop.f32.mrb[8].mxu1 }
 0x173   : > { %v3784_v50 = vpop.f32.mrb[9].mxu1 }
 0x174   : > { %v3785_v18 = vadd.f32 %v3784_v50, %v3783_v48  ;;  %v3786_v28 = vpop.f32.mrb[10].mxu1 }
 0x175   : > { %v3787_v43 = vpop.f32.mrb[11].mxu1 }
 0x176   : > { %v3743_v58 = vpop.f32.mrb[8].mxu0  ;;  %v3788_v1 = vadd.f32 %v3787_v43, %v3786_v28 }
 0x177   : > { %v3744_v54 = vpop.f32.mrb[9].mxu0 }
 0x178   : > { %v3745_v34 = vadd.f32 %v3744_v54, %v3743_v58  ;;  %v3746_v29 = vpop.f32.mrb[10].mxu0 }
 0x179   : > { %v3747_v8 = vpop.f32.mrb[11].mxu0 }
 0x17a   : > { %v2934_v35 = vadd.f32 %v3785_v18, %v3745_v34  ;;  %v3748_v5 = vadd.f32 %v3747_v8, %v3746_v29 }
 0x17c   : > { %v2937_v49 = vadd.f32 %v3788_v1, %v3748_v5 }
 0x19c   : > { %v3789_v38 = vpop.f32.mrb[12].mxu1 }
 0x19d   : > { %v3790_v33 = vpop.f32.mrb[13].mxu1 }
 0x19e   : > { %v3791_v0 = vadd.f32 %v3790_v33, %v3789_v38  ;;  %v3792_v44 = vpop.f32.mrb[14].mxu1 }
 0x19f   : > { %v3793_v59 = vpop.f32.mrb[15].mxu1 }
 0x1a0   : > { %v3749_v47 = vpop.f32.mrb[12].mxu0  ;;  %v3794_v62 = vadd.f32 %v3793_v59, %v3792_v44 }
 0x1a1   : > { %v3750_v57 = vpop.f32.mrb[13].mxu0 }
 0x1a2   : > { %v3751_v21 = vadd.f32 %v3750_v57, %v3749_v47  ;;  %v3752_v22 = vpop.f32.mrb[14].mxu0 }
 0x1a3   : > { %v3753_v60 = vpop.f32.mrb[15].mxu0 }
 0x1a4   : > { %v2942_v7 = vadd.f32 %v3791_v0, %v3751_v21  ;;  %v3754_v27 = vadd.f32 %v3753_v60, %v3752_v22  ;;  %v3851_v4 = vpop.f32.mrb[16].mxu1 }
 0x1a5   : > { %v3852_v53 = vpop.f32.mrb[17].mxu1 }
 0x1a6   : > { %v4941_v2 = vadd.f32 %v3794_v62, %v3754_v27  ;;  %v3853_v3 = vadd.f32 %v3852_v53, %v3851_v4  ;;  %v3854_v51 = vpop.f32.mrb[18].mxu1 }
 0x1a7   : > { %v3855_v45 = vpop.f32.mrb[19].mxu1 }
 0x1a8   : > { %v3811_v25 = vpop.f32.mrb[16].mxu0  ;;  %v3856_v6 = vadd.f32 %v3855_v45, %v3854_v51 }
 0x1a9   : > { %v3812_v61 = vpop.f32.mrb[17].mxu0 }
 0x1aa   : > { %v3813_v9 = vadd.f32 %v3812_v61, %v3811_v25  ;;  %v3814_v11 = vpop.f32.mrb[18].mxu0 }
 0x1ab   : > { %v3815_v12 = vpop.f32.mrb[19].mxu0 }
 0x1ac   : > { %v2983_v13 = vadd.f32 %v3813_v9, %v2918_v32  ;;  %v3816_v14 = vadd.f32 %v3815_v12, %v3814_v11  ;;  %v3857_v52 = vpop.f32.mrb[20].mxu1 }
 0x1ad   : > { %v3858_v46 = vpop.f32.mrb[21].mxu1 }
 0x1ae   : > { %v2986_v26 = vadd.f32 %v3816_v14, %v2921_v63  ;;  %v3048_v17 = vadd.f32 %v3853_v3, %v2983_v13  ;;  %v3859_v23 = vadd.f32 %v3858_v46, %v3857_v52  ;;  %v3860_v31 = vpop.f32.mrb[22].mxu1 }
 0x1af   : > { %v3861_v39 = vpop.f32.mrb[23].mxu1 }
 0x1b0   : > { %v3817_v41 = vpop.f32.mrb[20].mxu0  ;;  %v3051_v15 = vadd.f32 %v3856_v6, %v2986_v26  ;;  %v3862_v56 = vadd.f32 %v3861_v39, %v3860_v31 }
 0x1b1   : > { %v3818_v40 = vpop.f32.mrb[21].mxu0 }
 0x1b2   : > { %v3819_v37 = vadd.f32 %v3818_v40, %v3817_v41  ;;  %v3820_v10 = vpop.f32.mrb[22].mxu0 }
 0x1b3   : > { %v3821_v20 = vpop.f32.mrb[23].mxu0 }
 0x1b4   : > { %v2991_v16 = vadd.f32 %v3819_v37, %v2926_v42  ;;  %v3822_v24 = vadd.f32 %v3821_v20, %v3820_v10  ;;  %v3863_v19 = vpop.f32.mrb[24].mxu1 }
 0x1b5   : > { %v3864_v32 = vpop.f32.mrb[25].mxu1 }
 0x1b6   : > { %v2994_v30 = vadd.f32 %v3822_v24, %v2929_v36  ;;  %v3056_v55 = vadd.f32 %v3859_v23, %v2991_v16  ;;  %v3865_v48 = vadd.f32 %v3864_v32, %v3863_v19  ;;  %v3866_v63 = vpop.f32.mrb[26].mxu1 }
 0x1b7   : > { %v3867_v50 = vpop.f32.mrb[27].mxu1 }
 0x1b8   : > { %v3059_v18 = vadd.f32 %v3862_v56, %v2994_v30  ;;  %v3868_v28 = vadd.f32 %v3867_v50, %v3866_v63 }
 0x1ba   : > { %v3823_v58 = vpop.f32.mrb[24].mxu0 }
 0x1bb   : > { %v3824_v43 = vpop.f32.mrb[25].mxu0 }
 0x1bc   : > { %v3825_v54 = vadd.f32 %v3824_v43, %v3823_v58  ;;  %v3826_v1 = vpop.f32.mrb[26].mxu0 }
 0x1bd   : > { %v3827_v34 = vpop.f32.mrb[27].mxu0 }
 0x1be   : > { %v2999_v29 = vadd.f32 %v3825_v54, %v2934_v35  ;;  %v3828_v8 = vadd.f32 %v3827_v34, %v3826_v1 }
 0x1c0   : > { %v3002_v5 = vadd.f32 %v3828_v8, %v2937_v49  ;;  %v3064_v42 = vadd.f32 %v3865_v48, %v2999_v29 }
 0x1c2   : > { %v3067_v38 = vadd.f32 %v3868_v28, %v3002_v5 }
 0x1c7   : > { %v3869_v36 = vpop.f32.mrb[28].mxu1 }
 0x1c8   : > { %v3829_v33 = vpop.f32.mrb[28].mxu0  ;;  %v3870_v44 = vpop.f32.mrb[29].mxu1 }
 0x1c9   : > { %v3830_v0 = vpop.f32.mrb[29].mxu0  ;;  %v3871_v57 = vadd.f32 %v3870_v44, %v3869_v36  ;;  %v3872_v62 = vpop.f32.mrb[30].mxu1 }
 0x1ca   : > { %v3831_v47 = vadd.f32 %v3830_v0, %v3829_v33  ;;  %v3832_v59 = vpop.f32.mrb[30].mxu0  ;;  %v3873_v22 = vpop.f32.mrb[31].mxu1 }
 0x1cb   : > { %v3833_v21 = vpop.f32.mrb[31].mxu0  ;;  %v3874_v4 = vadd.f32 %v3873_v22, %v3872_v62 }
 0x1cc   : > { %v3007_v60 = vadd.f32 %v3831_v47, %v2942_v7  ;;  %v3834_v27 = vadd.f32 %v3833_v21, %v3832_v59 }
 0x1ce   : > { %v3072_v35 = vadd.f32 %v3871_v57, %v3007_v60  ;;  %v3010_v49 = vadd.f32 %v3834_v27, %v4941_v2 }
 0x1cf   : > { %v3909_v51 = vpop.f32.mrb[32].mxu1 }
 0x1d0   : > { %v3075_v53 = vadd.f32 %v3874_v4, %v3010_v49  ;;  %v3905_v3 = vpop.f32.mrb[32].mxu0  ;;  %v3137_v61 = vadd.f32 %v3909_v51, %v3072_v35  ;;  %v3128_v6 = vpop.f32.mrb[33].mxu1 }
 0x1d1   : > { %v3121_v25 = vadd.f32 %v3905_v3, %v3056_v55  ;;  %v3112_v45 = vpop.f32.mrb[33].mxu0  ;;  %v3129_v12 = vadd.f32 %v3128_v6, %v3064_v42  ;;  %v3910_v7 = vpop.f32.mrb[34].mxu1 }
 0x1d2   : > { %v3113_v9 = vadd.f32 %v3112_v45, %v3048_v17  ;;  %v3906_v11 = vpop.f32.mrb[34].mxu0  ;;  %v3140_v52 = vadd.f32 %v3910_v7, %v3075_v53  ;;  %v3131_v26 = vpop.f32.mrb[35].mxu1 }
 0x1d3   : > { %v3124_v13 = vadd.f32 %v3906_v11, %v3059_v18  ;;  %v3115_v14 = vpop.f32.mrb[35].mxu0  ;;  %v3132_v46 = vadd.f32 %v3131_v26, %v3067_v38  ;;  %v3199_v10 = vmul.f32 %v3121_v25, %v3121_v25  ;;  %v3201_v30 = vmul.f32 %v3129_v12, %v3129_v12 }
 0x1d4   : > { %v3116_v2 = vadd.f32 %v3115_v14, %v3051_v15  ;;  %v3710_v31 = vpack.c.bf16 %v3140_v52, %v3137_v61  ;;  %v3197_v17 = vmul.f32 %v3113_v9, %v3113_v9  ;;  %v3203_v18 = vmul.f32 %v3137_v61, %v3137_v61 }
 0x1d5   : > { %v3700_v23 = vpack.c.bf16 %v3124_v13, %v3121_v25  ;;  %v3705_v40 = vpack.c.bf16 %v3132_v46, %v3129_v12  ;;  %v3200_v16 = vmul.f32 %v3124_v13, %v3124_v13  ;;  %v3202_v48 = vmul.f32 %v3132_v46, %v3132_v46 }
 0x1d6   : > { %v3695_v41 = vpack.c.bf16 %v3116_v2, %v3113_v9  ;;  %v3183_v39 = vadd.f32 %v3116_v2, %v3113_v9  ;;  %v3198_v56 = vmul.f32 %v3116_v2, %v3116_v2  ;;  %3714 = vst [vmem:[%s210_s28 + $0x18] sm:$0xff] %v3710_v31   ;;  %v3204_v43 = vmul.f32 %v3140_v52, %v3140_v52 }
 0x1d7   : > { %3712 = vst [vmem:[%s210_s28 + $0x8] sm:$0xff] %v3700_v23   ;;  %3713 = vst [vmem:[%s210_s28 + $0x10] sm:$0xff] %v3705_v40  }
 0x1d8   : > { %3696 = vst [vmem:[%s210_s28] sm:$0xff] %v3695_v41   ;;  %v3184_v37 = vadd.f32 %v3183_v39, %v3121_v25  ;;  %v3205_v20 = vadd.f32 %v3198_v56, %v3197_v17 }
 0x1da   : > { %v3185_v15 = vadd.f32 %v3184_v37, %v3124_v13  ;;  %v3206_v24 = vadd.f32 %v3205_v20, %v3199_v10 }
 0x1dc   : > { %v3186_v19 = vadd.f32 %v3185_v15, %v3129_v12  ;;  %v3207_v32 = vadd.f32 %v3206_v24, %v3200_v16 }
 0x1de   : > { %v3187_v55 = vadd.f32 %v3186_v19, %v3132_v46  ;;  %v3208_v63 = vadd.f32 %v3207_v32, %v3201_v30 }
 0x1e0   : > { %v3188_v50 = vadd.f32 %v3187_v55, %v3137_v61  ;;  %v3209_v28 = vadd.f32 %v3208_v63, %v3202_v48 }
 0x1e2   : > { %v3189_v58 = vadd.f32 %v3188_v50, %v3140_v52  ;;  %v3210_v54 = vadd.f32 %v3209_v28, %v3203_v18 }
 0x1e4   : > { %v3190_v1 = vrot.slane %v3189_v58, 4  ;;  %v3211_v34 = vadd.f32 %v3210_v54, %v3204_v43 }
 0x1e6   : > { %v3191_v29 = vadd.f32 %v3190_v1, %v3189_v58  ;;  %v3212_v8 = vrot.slane %v3211_v34, 4 }
 0x1e8   : > { %v3192_v5 = vrot.slane %v3191_v29, 2  ;;  %v3213_v42 = vadd.f32 %v3212_v8, %v3211_v34 }
 0x1ea   : > { %v3193_v38 = vadd.f32 %v3192_v5, %v3191_v29  ;;  %v3214_v33 = vrot.slane %v3213_v42, 2 }
 0x1ec   : > { %v3194_v36 = vrot.slane %v3193_v38, 1  ;;  %v3215_v0 = vadd.f32 %v3214_v33, %v3213_v42 }
 0x1ee   : > { %v3195_v44 = vadd.f32 %v3194_v36, %v3193_v38  ;;  %v3216_v47 = vrot.slane %v3215_v0, 1 }
 0x1f0   : > { %3196 = vst [vmem:[%s213_s5] sm:$0x1] %v3195_v44  ;;  %v3217_v59 = vadd.f32 %v3216_v47, %v3215_v0 }
 0x1f2   : > { %3218 = vst [vmem:[%s216_s8] sm:$0x1] %v3217_v59 }
 0x1f3 PF: > { %s15_s15 = sadd.s32 1, %s4026_s15  }
 0x1f4   : > { %p12_p5 = scmp.ge.s32.totalorder %s15_s15, 4  }
 0x1f6   :  { %14 = sbr.rel (!%p12_p5) target bundleno = 1 (0x1), region = 84 }

</bundles_post_ra>
